<compile_context>
chip_gen: v7x
topology: tpu7x:2x2x1
jax: 0.10.0
libtpu: 0.0.40
codegen_flags: <defaults>
</compile_context>

<pallas_src>
import functools
import math

import jax
import jax.numpy as jnp
from jax.experimental import pallas as pl
from jax.experimental.pallas import tpu as pltpu

# ----------------------------- configuration (mirrors TKL_3.__init__) ------------------
EMB_DIM = 32
KERNELS_MU = [-0.75, -0.5, -0.25, 0.0, 0.25, 0.5, 0.75, 1.0]
KERNELS_SIGMA = [0.1] * len(KERNELS_MU)
ATT_HEADS = 2
ATT_LAYER = 1
ATT_FF_DIM = 32
MAX_LENGTH = 160
USE_POS_ENCODING = True
USE_DIFF_POSENCODING = True

CHUNK_SIZE = 40
OVERLAP = 5
EXT_CHUNK = CHUNK_SIZE + 2 * OVERLAP      # 50
TOP_K_CHUNKS = 3
SLIDING_WINDOW_INIT = 30.0                # value of the (non-updated) parameter

# Gaussian kernel constants baked into the interaction kernel (non-trainable buffers).
_MU = tuple(float(m) for m in KERNELS_MU)
_NEG_INV_2SIG2 = tuple(-1.0 / (2.0 * float(s) * float(s)) for s in KERNELS_SIGMA)
N_KERNELS = len(_MU)


# ----------------------------- Pallas kernel 1: multi-head attention core ---------------
def _mha_core_kernel(q_ref, k_ref, v_ref, m_ref, o_ref, *, num_heads, scale):
    q = q_ref[...]            # (Nb, S, D)
    k = k_ref[...]            # (Nb, S, D)
    v = v_ref[...]            # (Nb, S, D)
    m = m_ref[...]            # (Nb, 1, S)  1.0 = valid key, 0.0 = padded key
    D = q.shape[-1]
    dh = D // num_heads
    head_outs = []
    for h in range(num_heads):                       # static loop, H is tiny
        sl = slice(h * dh, (h + 1) * dh)
        qh = q[:, :, sl]                             # (Nb, S, dh)
        kh = k[:, :, sl]
        vh = v[:, :, sl]
        s = jnp.einsum('bqd,bkd->bqk', qh, kh,
                       preferred_element_type=jnp.float32) * scale    # (Nb, S, S)
        s = jnp.where(m > 0.0, s, -1e30)             # key padding mask (broadcast over q)
        s = s - jnp.max(s, axis=-1, keepdims=True)
        p = jnp.exp(s)
        inv = pl.reciprocal(jnp.sum(p, axis=-1, keepdims=True), approx=True)
        p = p * inv                                  # fully-masked rows -> uniform (finite)
        head_outs.append(jnp.einsum('bqk,bkd->bqd', p, vh,
                                    preferred_element_type=jnp.float32))
    o_ref[...] = jnp.concatenate(head_outs, axis=-1)  # (Nb, S, D), single store


def attention_pallas(q, k, v, key_mask, *, num_heads, scale):
    # q/k/v: (N, S, D) already in-projected; key_mask: (N, 1, S)
    N, S, D = q.shape
    G = 2 if (N % 2 == 0 and N >= 2) else 1          # 2-way parallel axis (v7x megacore)
    Nb = N // G
    kern = functools.partial(_mha_core_kernel, num_heads=num_heads, scale=scale)
    return pl.pallas_call(
        kern,
        out_shape=jax.ShapeDtypeStruct((N, S, D), jnp.float32),
        grid=(G,),
        in_specs=[pl.BlockSpec((Nb, S, D), lambda i: (i, 0, 0)),
                  pl.BlockSpec((Nb, S, D), lambda i: (i, 0, 0)),
                  pl.BlockSpec((Nb, S, D), lambda i: (i, 0, 0)),
                  pl.BlockSpec((Nb, 1, S), lambda i: (i, 0, 0))],
        out_specs=pl.BlockSpec((Nb, S, D), lambda i: (i, 0, 0)),
        compiler_params=pltpu.CompilerParams(dimension_semantics=("parallel",)),
    )(q, k, v, key_mask)


# --------------------- Pallas kernel 2: cosine + Gaussian kernel activations -----------
def _interaction_kernel(q_ref, d_ref, dm_ref, o_ref):
    q = q_ref[...]            # (Nb, Q, D)
    d = d_ref[...]            # (Nb, C, D)
    dm = dm_ref[...]          # (Nb, 1, C)
    # CosineMatrixAttention normalization (zero rows -> 0, matching x/(||x||+1e-13)).
    qn = q * jax.lax.rsqrt(jnp.sum(q * q, axis=-1, keepdims=True) + 1e-26)
    dn = d * jax.lax.rsqrt(jnp.sum(d * d, axis=-1, keepdims=True) + 1e-26)
    cos = jnp.einsum('bqd,bcd->bqc', qn, dn,
                     preferred_element_type=jnp.float32)              # (Nb, Q, C)
    for kk in range(N_KERNELS):                                       # static K=8 loop
        diff = cos - jnp.float32(_MU[kk])
        act = jnp.exp(diff * diff * jnp.float32(_NEG_INV_2SIG2[kk]))  # (Nb, Q, C)
        o_ref[:, kk, :, :] = act * dm                                 # mask doc positions


def interaction_pallas(q_emb, d_emb, d_mask):
    # q_emb: (N, Q, D); d_emb: (N, C, D); d_mask: (N, 1, C) -> out (N, K, Q, C)
    N, Q, D = q_emb.shape
    _, C, _ = d_emb.shape
    G = 2 if (N % 2 == 0 and N >= 2) else 1
    Nb = N // G
    return pl.pallas_call(
        _interaction_kernel,
        out_shape=jax.ShapeDtypeStruct((N, N_KERNELS, Q, C), jnp.float32),
        grid=(G,),
        in_specs=[pl.BlockSpec((Nb, Q, D), lambda i: (i, 0, 0)),
                  pl.BlockSpec((Nb, C, D), lambda i: (i, 0, 0)),
                  pl.BlockSpec((Nb, 1, C), lambda i: (i, 0, 0))],
        out_specs=pl.BlockSpec((Nb, N_KERNELS, Q, C), lambda i: (i, 0, 0, 0)),
        compiler_params=pltpu.CompilerParams(dimension_semantics=("parallel",)),
    )(q_emb, d_emb, d_mask)


# ----------------------------- plain-JAX glue -------------------------------------------
def get_positional_features(dimensions, max_length, min_timescale=1.0, max_timescale=1.0e4):
    timesteps = jnp.arange(max_length, dtype=jnp.float32)
    num_timescales = dimensions // 2
    ts_range = jnp.arange(num_timescales, dtype=jnp.float32)
    log_inc = math.log(float(max_timescale) / float(min_timescale)) / float(num_timescales - 1)
    inv = min_timescale * jnp.exp(ts_range * -log_inc)
    scaled = timesteps[:, None] * inv[None, :]
    sinusoids = jnp.concatenate([jnp.sin(scaled), jnp.cos(scaled)], axis=1)
    if dimensions % 2 != 0:
        sinusoids = jnp.concatenate(
            [sinusoids, jnp.zeros((max_length, 1), jnp.float32)], axis=1)
    return sinusoids[None]          # (1, T, D)


def layer_norm(x, g, b, eps=1e-5):
    mu = jnp.mean(x, axis=-1, keepdims=True)
    var = jnp.mean((x - mu) ** 2, axis=-1, keepdims=True)
    return (x - mu) / jnp.sqrt(var + eps) * g + b


def mha(x, mask, p):
    # x: (N, S, D); mask: (N, S) 1.0 = valid
    N, S, D = x.shape
    dh = D // ATT_HEADS
    qkv = x @ p['in_proj_w'].T + p['in_proj_b']          # (N, S, 3D)
    q, k, v = jnp.split(qkv, 3, axis=-1)
    km = mask[:, None, :]                                # (N, 1, S)
    out = attention_pallas(q, k, v, km, num_heads=ATT_HEADS, scale=1.0 / math.sqrt(dh))
    return out @ p['out_proj_w'].T + p['out_proj_b']


def transformer_layer(x, mask, p):
    # PyTorch TransformerEncoderLayer (post-norm, ReLU, dropout=0)
    a = mha(x, mask, p)
    x = layer_norm(x + a, p['ln1_g'], p['ln1_b'])
    ff = jnp.maximum(x @ p['lin1_w'].T + p['lin1_b'], 0.0) @ p['lin2_w'].T + p['lin2_b']
    x = layer_norm(x + ff, p['ln2_g'], p['ln2_b'])
    return x


def forward_representation(seq_emb, seq_mask, p):
    seq_emb = seq_emb * seq_mask[..., None]
    ctx = seq_emb
    for _ in range(ATT_LAYER):
        ctx = transformer_layer(ctx, seq_mask, p)
    mixer = p['mixer']
    return (mixer * seq_emb + (1.0 - mixer) * ctx) * seq_mask[..., None]


def saturation(kact, query_idfs, query_mask, p, window_size):
    # kact: (B, Q, L, K) kernel activations per document position
    B, Q, L, K = kact.shape
    W = (L - window_size) // 2 + 1
    idx = 2 * jnp.arange(W)[:, None] + jnp.arange(window_size)[None, :]      # (W, ws)
    unrolled = kact[:, :, idx, :]                                            # (B, Q, W, ws, K)
    lengths = jnp.sum(jnp.sum(unrolled, axis=-1) != 0, axis=-1)              # (B, Q, W)
    per_kernel_query = jnp.sum(unrolled, axis=-2)                            # (B, Q, W, K)

    qidf = jnp.broadcast_to(query_idfs, (B, Q, W))
    sat_inf = jnp.stack([qidf, lengths.astype(jnp.float32)], axis=-1)        # (B, Q, W, 2)
    sat1 = sat_inf @ p['sat1_w'].T + p['sat1_b']
    sat2 = 1.0 / (sat_inf @ p['sat2_w'].T + p['sat2_b'])
    sat3 = sat_inf @ p['sat3_w'].T + p['sat3_b']

    log_pkq = sat1 * jnp.power(jnp.clip(per_kernel_query, 1e-10), sat2) - sat3
    log_pkq = log_pkq * query_mask[:, :, None, None] \
        * (lengths > 0).astype(jnp.float32)[..., None]
    per_kernel = jnp.sum(log_pkq, axis=1)                                    # (B, W, K)
    score = (per_kernel @ p['dense_w'].T)[..., 0]                            # (B, W)

    if score.shape[1] < TOP_K_CHUNKS:
        score = jnp.pad(score, ((0, 0), (0, TOP_K_CHUNKS - score.shape[1])))
    score = jnp.where(score == 0.0, -9900.0, score)
    orig_score = score

    region_cols = min(orig_score.shape[1], int(SLIDING_WINDOW_INIT * TOP_K_CHUNKS + 1))
    max_per_region_score = orig_score[:, :region_cols]
    max_per_region_idx = jnp.argsort(-orig_score, axis=1)                    # descending, stable
    r = jnp.arange(max_per_region_score.shape[1])
    top_idx = jnp.zeros((orig_score.shape[0], TOP_K_CHUNKS), dtype=jnp.int32)
    for c in range(TOP_K_CHUNKS):
        best = max_per_region_idx[:, 0].astype(jnp.int32)
        top_idx = top_idx.at[:, c].set(best)
        region = jnp.abs(r[None, :] - best[:, None]) < (window_size / 2)
        max_per_region_score = jnp.where(region, float(-10001 - c), max_per_region_score)
        max_per_region_idx = jnp.argsort(-max_per_region_score, axis=1)

    top_k = jnp.take_along_axis(orig_score, top_idx, axis=1)                 # (B, top_k)
    top_k = jnp.where(top_k <= -9900.0, 0.0, top_k)
    return jnp.sum(top_k * p['chunk_scoring'], axis=1)                       # (B,)


def tkl3_forward(p, query_embeddings, document_embeddings,
                 query_pad_oov_mask, document_pad_oov_mask,
                 query_idfs, document_idfs):
    del document_idfs  # unused by the original forward pass
    B, QL, D = query_embeddings.shape

    pos_q = get_positional_features(D, 30)
    if USE_DIFF_POSENCODING:
        pos_d = get_positional_features(D, MAX_LENGTH + 500)[:, 500:, :]
    else:
        pos_d = pos_q

    if USE_POS_ENCODING:
        query_embeddings = query_embeddings + pos_q[:, :QL, :]
    query_ctx = forward_representation(query_embeddings, query_pad_oov_mask, p)

    # --- document chunking (torch: F.pad + unfold) ---
    doc_len = document_pad_oov_mask.shape[1]
    if doc_len > OVERLAP:
        needed = EXT_CHUNK - (doc_len - OVERLAP) % CHUNK_SIZE
    else:
        needed = EXT_CHUNK - OVERLAP - doc_len
    pe = jnp.pad(document_embeddings, ((0, 0), (OVERLAP, needed), (0, 0)))
    pm = jnp.pad(document_pad_oov_mask, ((0, 0), (OVERLAP, needed)))
    Lp = doc_len + OVERLAP + needed
    CP = (Lp - EXT_CHUNK) // CHUNK_SIZE + 1
    chunks_e = jnp.stack([pe[:, c * CHUNK_SIZE:c * CHUNK_SIZE + EXT_CHUNK, :]
                          for c in range(CP)], axis=1)                        # (B, CP, 50, D)
    chunks_m = jnp.stack([pm[:, c * CHUNK_SIZE:c * CHUNK_SIZE + EXT_CHUNK]
                          for c in range(CP)], axis=1)                        # (B, CP, 50)
    chunked_docs2 = chunks_e.reshape(B * CP, EXT_CHUNK, D)
    chunked_pad2 = chunks_m.reshape(B * CP, EXT_CHUNK)

    # NOTE: the original packs away all-padding chunks via data-dependent boolean indexing
    # (dynamic shapes).  We process every chunk instead; their document mask is all-zero so
    # the kernel activations are exactly zero — identical to the zeros left by packing.
    docs = chunked_docs2
    if USE_POS_ENCODING:
        docs = docs + pos_d[:, :EXT_CHUNK, :]
    docs_ctx = forward_representation(docs, chunked_pad2, p)
    docs_unique = docs_ctx[:, OVERLAP:-OVERLAP, :]                            # (N, 40, D)
    doc_mask_unique = chunked_pad2[:, OVERLAP:-OVERLAP]                       # (N, 40)

    packed_q = jnp.broadcast_to(query_ctx[:, None], (B, CP, QL, D)).reshape(B * CP, QL, D)

    kernel_results = interaction_pallas(
        packed_q, docs_unique, doc_mask_unique[:, None, :])                   # (N, K, QL, 40)
    K = kernel_results.shape[1]
    # (B*CP, K, QL, 40) -> (B, QL, CP*40, K)  (matches the torch transpose/reshape chain)
    kact = kernel_results.reshape(B, CP, K, QL, CHUNK_SIZE)
    kact = kact.transpose(0, 3, 1, 4, 2).reshape(B, QL, CP * CHUNK_SIZE, K)

    i0 = int(math.floor(SLIDING_WINDOW_INIT)) - 5
    i1 = i0 + 10
    y0 = saturation(kact, query_idfs, query_pad_oov_mask, p, i0)
    y1 = saturation(kact, query_idfs, query_pad_oov_mask, p, i1)
    Wa = jnp.float32(i1) - p['sliding_window_size']
    Wb = p['sliding_window_size'] - jnp.float32(i0)
    return Wa * y0 + Wb * y1


# ----------------------------- deterministic parameter init ----------------------------
def init_params(key):
    D, FF = EMB_DIM, ATT_FF_DIM
    K = N_KERNELS
    ks = jax.random.split(key, 8)

    def u(k, shape, lo, hi):
        return jax.random.uniform(k, shape, jnp.float32, lo, hi)

    def n(k, shape, scale):
        return jax.random.normal(k, shape, jnp.float32) * scale

    return dict(
        in_proj_w=n(ks[0], (3 * D, D), 0.05),
        in_proj_b=jnp.zeros((3 * D,), jnp.float32),
        out_proj_w=n(ks[1], (D, D), 0.05),
        out_proj_b=jnp.zeros((D,), jnp.float32),
        lin1_w=n(ks[2], (FF, D), 0.05),
        lin1_b=jnp.zeros((FF,), jnp.float32),
        lin2_w=n(ks[3], (D, FF), 0.05),
        lin2_b=jnp.zeros((D,), jnp.float32),
        ln1_g=jnp.ones((D,), jnp.float32), ln1_b=jnp.zeros((D,), jnp.float32),
        ln2_g=jnp.ones((D,), jnp.float32), ln2_b=jnp.zeros((D,), jnp.float32),
        mixer=jnp.float32(0.5),
        sat1_w=u(ks[4], (1, 2), -0.014, 0.014), sat1_b=jnp.full((1,), 100.0, jnp.float32),
        sat2_w=u(ks[5], (1, 2), -0.014, 0.014), sat2_b=jnp.full((1,), 100.0, jnp.float32),
        sat3_w=u(ks[6], (1, 2), -0.014, 0.014), sat3_b=jnp.full((1,), 100.0, jnp.float32),
        dense_w=u(ks[7], (1, K), -0.014, 0.014),
        chunk_scoring=jnp.ones((1, TOP_K_CHUNKS), jnp.float32),
        sliding_window_size=jnp.float32(SLIDING_WINDOW_INIT),
    )


# ----------------------------- main ------------------------------------------------------
if __name__ == "__main__":
    key = jax.random.PRNGKey(0)
    kp, kq, kd, kqi, kdi = jax.random.split(key, 5)
    params = init_params(kp)

    B, QL, DL, D = 2, 8, 155, EMB_DIM
    query_embeddings = jax.random.normal(kq, (B, QL, D), jnp.float32)
    document_embeddings = jax.random.normal(kd, (B, DL, D), jnp.float32)
    q_valid = jnp.array([8, 6])
    query_pad_oov_mask = (jnp.arange(QL)[None, :] < q_valid[:, None]).astype(jnp.float32)
    d_valid = jnp.array([155, 70])
    document_pad_oov_mask = (jnp.arange(DL)[None, :] < d_valid[:, None]).astype(jnp.float32)
    query_idfs = jax.random.uniform(kqi, (B, QL, 1), jnp.float32, 0.5, 3.0)
    document_idfs = jax.random.uniform(kdi, (B, DL, 1), jnp.float32, 0.5, 3.0)

    fwd = jax.jit(tkl3_forward)
    score = fwd(params, query_embeddings, document_embeddings,
                query_pad_oov_mask, document_pad_oov_mask,
                query_idfs, document_idfs)
    score = jax.block_until_ready(score)

    assert score.shape == (B,)
    assert bool(jnp.all(jnp.isfinite(score)))
    print("KERNEL_OK")
</pallas_src>

<mosaic_0001>
module attributes {stable_mosaic.version = 11 : i64} {
  func.func @_mha_core_kernel(%arg0: i32, %arg1: memref<1x8x32xf32, #tpu.memory_space<vmem>>, %arg2: memref<1x8x32xf32, #tpu.memory_space<vmem>>, %arg3: memref<1x8x32xf32, #tpu.memory_space<vmem>>, %arg4: memref<1x1x8xf32, #tpu.memory_space<vmem>>, %arg5: memref<1x8x32xf32, #tpu.memory_space<vmem>>) attributes {dimension_semantics = [#tpu.dimension_semantics<parallel>], iteration_bounds = array<i64: 2>, scalar_prefetch = 0 : i64, scratch_operands = 0 : i64, tpu.core_type = #tpu.core_type<tc>, window_params = [{transform_indices = @transform_0, window_bounds = array<i64: 1, 8, 32>}, {transform_indices = @transform_1, window_bounds = array<i64: 1, 8, 32>}, {transform_indices = @transform_2, window_bounds = array<i64: 1, 8, 32>}, {transform_indices = @transform_3, window_bounds = array<i64: 1, 1, 8>}, {transform_indices = @transform_4, window_bounds = array<i64: 1, 8, 32>}]} {
    %c0 = arith.constant 0 : index
    %c0_0 = arith.constant 0 : index
    %c0_1 = arith.constant 0 : index
    %0 = vector.load %arg1[%c0, %c0_0, %c0_1] : memref<1x8x32xf32, #tpu.memory_space<vmem>>, vector<1x8x32xf32>
    %c0_2 = arith.constant 0 : index
    %c0_3 = arith.constant 0 : index
    %c0_4 = arith.constant 0 : index
    %1 = vector.load %arg2[%c0_2, %c0_3, %c0_4] : memref<1x8x32xf32, #tpu.memory_space<vmem>>, vector<1x8x32xf32>
    %c0_5 = arith.constant 0 : index
    %c0_6 = arith.constant 0 : index
    %c0_7 = arith.constant 0 : index
    %2 = vector.load %arg3[%c0_5, %c0_6, %c0_7] : memref<1x8x32xf32, #tpu.memory_space<vmem>>, vector<1x8x32xf32>
    %c0_8 = arith.constant 0 : index
    %c0_9 = arith.constant 0 : index
    %c0_10 = arith.constant 0 : index
    %3 = vector.load %arg4[%c0_8, %c0_9, %c0_10] : memref<1x1x8xf32, #tpu.memory_space<vmem>>, vector<1x1x8xf32>
    %4 = vector.extract_strided_slice %0 {offsets = [0, 0, 0], sizes = [1, 8, 16], strides = [1, 1, 1]} : vector<1x8x32xf32> to vector<1x8x16xf32>
    %5 = vector.extract_strided_slice %1 {offsets = [0, 0, 0], sizes = [1, 8, 16], strides = [1, 1, 1]} : vector<1x8x32xf32> to vector<1x8x16xf32>
    %6 = vector.extract_strided_slice %2 {offsets = [0, 0, 0], sizes = [1, 8, 16], strides = [1, 1, 1]} : vector<1x8x32xf32> to vector<1x8x16xf32>
    "tpu.trace_start"() <{level = 10 : i32, message = "bqd,bkd->bqk"}> : () -> ()
    %cst = arith.constant dense<0.000000e+00> : vector<1x8x8xf32>
    %7 = tpu.matmul %4, %5, %cst {dimension_numbers = #tpu.dot_dimension_numbers<[2], [2], [1], [1], [0, 0, 0, 1, 1, 1], [0], [0]>} : vector<1x8x16xf32>, vector<1x8x16xf32>, vector<1x8x8xf32> -> vector<1x8x8xf32>
    "tpu.trace_stop"() : () -> ()
    %cst_11 = arith.constant 2.500000e-01 : f32
    %8 = vector.broadcast %cst_11 : f32 to vector<1x8x8xf32>
    %9 = arith.mulf %7, %8 : vector<1x8x8xf32>
    %cst_12 = arith.constant 0.000000e+00 : f32
    %10 = vector.broadcast %cst_12 : f32 to vector<1x1x8xf32>
    %11 = arith.cmpf ogt, %3, %10 : vector<1x1x8xf32>
    %cst_13 = arith.constant -1.000000e+30 : f32
    %12 = vector.shape_cast %11 : vector<1x1x8xi1> to vector<1x1x8xi1>
    %13 = vector.broadcast %12 : vector<1x1x8xi1> to vector<1x8x8xi1>
    %14 = vector.broadcast %cst_13 : f32 to vector<1x8x8xf32>
    %15 = arith.select %13, %9, %14 : vector<1x8x8xi1>, vector<1x8x8xf32>
    %cst_14 = arith.constant dense<0xFF800000> : vector<1x8xf32>
    %16 = vector.multi_reduction <maximumf>, %15, %cst_14 [2] : vector<1x8x8xf32> to vector<1x8xf32>
    %17 = vector.shape_cast %16 : vector<1x8xf32> to vector<1x8x1xf32>
    %18 = vector.broadcast %17 : vector<1x8x1xf32> to vector<1x8x8xf32>
    %19 = arith.subf %15, %18 : vector<1x8x8xf32>
    %20 = math.exp %19 : vector<1x8x8xf32>
    %cst_15 = arith.constant dense<0.000000e+00> : vector<1x8xf32>
    %21 = vector.multi_reduction <add>, %20, %cst_15 [2] : vector<1x8x8xf32> to vector<1x8xf32>
    %22 = vector.shape_cast %21 : vector<1x8xf32> to vector<1x8x1xf32>
    %23 = tpu.reciprocal %22 {approx = true} : vector<1x8x1xf32> -> vector<1x8x1xf32>
    %24 = vector.broadcast %23 : vector<1x8x1xf32> to vector<1x8x8xf32>
    %25 = arith.mulf %20, %24 : vector<1x8x8xf32>
    "tpu.trace_start"() <{level = 10 : i32, message = "bqk,bkd->bqd"}> : () -> ()
    %cst_16 = arith.constant dense<0.000000e+00> : vector<1x8x16xf32>
    %26 = tpu.matmul %25, %6, %cst_16 {dimension_numbers = #tpu.dot_dimension_numbers<[2], [1], [1], [2], [0, 0, 0, 1, 1, 2], [0], [0]>} : vector<1x8x8xf32>, vector<1x8x16xf32>, vector<1x8x16xf32> -> vector<1x8x16xf32>
    "tpu.trace_stop"() : () -> ()
    %27 = vector.extract_strided_slice %0 {offsets = [0, 0, 16], sizes = [1, 8, 16], strides = [1, 1, 1]} : vector<1x8x32xf32> to vector<1x8x16xf32>
    %28 = vector.extract_strided_slice %1 {offsets = [0, 0, 16], sizes = [1, 8, 16], strides = [1, 1, 1]} : vector<1x8x32xf32> to vector<1x8x16xf32>
    %29 = vector.extract_strided_slice %2 {offsets = [0, 0, 16], sizes = [1, 8, 16], strides = [1, 1, 1]} : vector<1x8x32xf32> to vector<1x8x16xf32>
    "tpu.trace_start"() <{level = 10 : i32, message = "bqd,bkd->bqk"}> : () -> ()
    %cst_17 = arith.constant dense<0.000000e+00> : vector<1x8x8xf32>
    %30 = tpu.matmul %27, %28, %cst_17 {dimension_numbers = #tpu.dot_dimension_numbers<[2], [2], [1], [1], [0, 0, 0, 1, 1, 1], [0], [0]>} : vector<1x8x16xf32>, vector<1x8x16xf32>, vector<1x8x8xf32> -> vector<1x8x8xf32>
    "tpu.trace_stop"() : () -> ()
    %cst_18 = arith.constant 2.500000e-01 : f32
    %31 = vector.broadcast %cst_18 : f32 to vector<1x8x8xf32>
    %32 = arith.mulf %30, %31 : vector<1x8x8xf32>
    %cst_19 = arith.constant 0.000000e+00 : f32
    %33 = vector.broadcast %cst_19 : f32 to vector<1x1x8xf32>
    %34 = arith.cmpf ogt, %3, %33 : vector<1x1x8xf32>
    %cst_20 = arith.constant -1.000000e+30 : f32
    %35 = vector.shape_cast %34 : vector<1x1x8xi1> to vector<1x1x8xi1>
    %36 = vector.broadcast %35 : vector<1x1x8xi1> to vector<1x8x8xi1>
    %37 = vector.broadcast %cst_20 : f32 to vector<1x8x8xf32>
    %38 = arith.select %36, %32, %37 : vector<1x8x8xi1>, vector<1x8x8xf32>
    %cst_21 = arith.constant dense<0xFF800000> : vector<1x8xf32>
    %39 = vector.multi_reduction <maximumf>, %38, %cst_21 [2] : vector<1x8x8xf32> to vector<1x8xf32>
    %40 = vector.shape_cast %39 : vector<1x8xf32> to vector<1x8x1xf32>
    %41 = vector.broadcast %40 : vector<1x8x1xf32> to vector<1x8x8xf32>
    %42 = arith.subf %38, %41 : vector<1x8x8xf32>
    %43 = math.exp %42 : vector<1x8x8xf32>
    %cst_22 = arith.constant dense<0.000000e+00> : vector<1x8xf32>
    %44 = vector.multi_reduction <add>, %43, %cst_22 [2] : vector<1x8x8xf32> to vector<1x8xf32>
    %45 = vector.shape_cast %44 : vector<1x8xf32> to vector<1x8x1xf32>
    %46 = tpu.reciprocal %45 {approx = true} : vector<1x8x1xf32> -> vector<1x8x1xf32>
    %47 = vector.broadcast %46 : vector<1x8x1xf32> to vector<1x8x8xf32>
    %48 = arith.mulf %43, %47 : vector<1x8x8xf32>
    "tpu.trace_start"() <{level = 10 : i32, message = "bqk,bkd->bqd"}> : () -> ()
    %cst_23 = arith.constant dense<0.000000e+00> : vector<1x8x16xf32>
    %49 = tpu.matmul %48, %29, %cst_23 {dimension_numbers = #tpu.dot_dimension_numbers<[2], [1], [1], [2], [0, 0, 0, 1, 1, 2], [0], [0]>} : vector<1x8x8xf32>, vector<1x8x16xf32>, vector<1x8x16xf32> -> vector<1x8x16xf32>
    "tpu.trace_stop"() : () -> ()
    %50 = tpu.concatenate %26, %49 in 2 : vector<1x8x16xf32>, vector<1x8x16xf32> -> vector<1x8x32xf32>
    %c0_24 = arith.constant 0 : index
    %c0_25 = arith.constant 0 : index
    %c0_26 = arith.constant 0 : index
    %51 = vector.load %arg5[%c0_24, %c0_25, %c0_26] : memref<1x8x32xf32, #tpu.memory_space<vmem>>, vector<1x8x32xf32>
    tpu.vector_store %arg5[%c0_24, %c0_25, %c0_26], %50 {strides = array<i32>} : memref<1x8x32xf32, #tpu.memory_space<vmem>>, vector<1x8x32xf32>,
    return
  }
  func.func @transform_0(%arg0: i32) -> (i32, i32, i32) {
    %c0_i32 = arith.constant 0 : i32
    %c0_i32_0 = arith.constant 0 : i32
    %c0_i32_1 = arith.constant 0 : i32
    return %arg0, %c0_i32, %c0_i32_0 : i32, i32, i32
  }
  func.func @transform_1(%arg0: i32) -> (i32, i32, i32) {
    %c0_i32 = arith.constant 0 : i32
    %c0_i32_0 = arith.constant 0 : i32
    %c0_i32_1 = arith.constant 0 : i32
    return %arg0, %c0_i32, %c0_i32_0 : i32, i32, i32
  }
  func.func @transform_2(%arg0: i32) -> (i32, i32, i32) {
    %c0_i32 = arith.constant 0 : i32
    %c0_i32_0 = arith.constant 0 : i32
    %c0_i32_1 = arith.constant 0 : i32
    return %arg0, %c0_i32, %c0_i32_0 : i32, i32, i32
  }
  func.func @transform_3(%arg0: i32) -> (i32, i32, i32) {
    %c0_i32 = arith.constant 0 : i32
    %c0_i32_0 = arith.constant 0 : i32
    %c0_i32_1 = arith.constant 0 : i32
    return %arg0, %c0_i32, %c0_i32_0 : i32, i32, i32
  }
  func.func @transform_4(%arg0: i32) -> (i32, i32, i32) {
    %c0_i32 = arith.constant 0 : i32
    %c0_i32_0 = arith.constant 0 : i32
    %c0_i32_1 = arith.constant 0 : i32
    return %arg0, %c0_i32, %c0_i32_0 : i32, i32, i32
  }
}

module attributes {stable_mosaic.version = 11 : i64} {
  func.func @_mha_core_kernel(%arg0: i32, %arg1: memref<4x50x32xf32, #tpu.memory_space<vmem>>, %arg2: memref<4x50x32xf32, #tpu.memory_space<vmem>>, %arg3: memref<4x50x32xf32, #tpu.memory_space<vmem>>, %arg4: memref<4x1x50xf32, #tpu.memory_space<vmem>>, %arg5: memref<4x50x32xf32, #tpu.memory_space<vmem>>) attributes {dimension_semantics = [#tpu.dimension_semantics<parallel>], iteration_bounds = array<i64: 2>, scalar_prefetch = 0 : i64, scratch_operands = 0 : i64, tpu.core_type = #tpu.core_type<tc>, window_params = [{transform_indices = @transform_0, window_bounds = array<i64: 4, 50, 32>}, {transform_indices = @transform_1, window_bounds = array<i64: 4, 50, 32>}, {transform_indices = @transform_2, window_bounds = array<i64: 4, 50, 32>}, {transform_indices = @transform_3, window_bounds = array<i64: 4, 1, 50>}, {transform_indices = @transform_4, window_bounds = array<i64: 4, 50, 32>}]} {
    %c0 = arith.constant 0 : index
    %c0_0 = arith.constant 0 : index
    %c0_1 = arith.constant 0 : index
    %0 = vector.load %arg1[%c0, %c0_0, %c0_1] : memref<4x50x32xf32, #tpu.memory_space<vmem>>, vector<4x50x32xf32>
    %c0_2 = arith.constant 0 : index
    %c0_3 = arith.constant 0 : index
    %c0_4 = arith.constant 0 : index
    %1 = vector.load %arg2[%c0_2, %c0_3, %c0_4] : memref<4x50x32xf32, #tpu.memory_space<vmem>>, vector<4x50x32xf32>
    %c0_5 = arith.constant 0 : index
    %c0_6 = arith.constant 0 : index
    %c0_7 = arith.constant 0 : index
    %2 = vector.load %arg3[%c0_5, %c0_6, %c0_7] : memref<4x50x32xf32, #tpu.memory_space<vmem>>, vector<4x50x32xf32>
    %c0_8 = arith.constant 0 : index
    %c0_9 = arith.constant 0 : index
    %c0_10 = arith.constant 0 : index
    %3 = vector.load %arg4[%c0_8, %c0_9, %c0_10] : memref<4x1x50xf32, #tpu.memory_space<vmem>>, vector<4x1x50xf32>
    %4 = vector.extract_strided_slice %0 {offsets = [0, 0, 0], sizes = [4, 50, 16], strides = [1, 1, 1]} : vector<4x50x32xf32> to vector<4x50x16xf32>
    %5 = vector.extract_strided_slice %1 {offsets = [0, 0, 0], sizes = [4, 50, 16], strides = [1, 1, 1]} : vector<4x50x32xf32> to vector<4x50x16xf32>
    %6 = vector.extract_strided_slice %2 {offsets = [0, 0, 0], sizes = [4, 50, 16], strides = [1, 1, 1]} : vector<4x50x32xf32> to vector<4x50x16xf32>
    "tpu.trace_start"() <{level = 10 : i32, message = "bqd,bkd->bqk"}> : () -> ()
    %cst = arith.constant dense<0.000000e+00> : vector<4x50x50xf32>
    %7 = tpu.matmul %4, %5, %cst {dimension_numbers = #tpu.dot_dimension_numbers<[2], [2], [1], [1], [0, 0, 0, 1, 1, 1], [0], [0]>} : vector<4x50x16xf32>, vector<4x50x16xf32>, vector<4x50x50xf32> -> vector<4x50x50xf32>
    "tpu.trace_stop"() : () -> ()
    %cst_11 = arith.constant 2.500000e-01 : f32
    %8 = vector.broadcast %cst_11 : f32 to vector<4x50x50xf32>
    %9 = arith.mulf %7, %8 : vector<4x50x50xf32>
    %cst_12 = arith.constant 0.000000e+00 : f32
    %10 = vector.broadcast %cst_12 : f32 to vector<4x1x50xf32>
    %11 = arith.cmpf ogt, %3, %10 : vector<4x1x50xf32>
    %cst_13 = arith.constant -1.000000e+30 : f32
    %12 = vector.shape_cast %11 : vector<4x1x50xi1> to vector<4x1x50xi1>
    %13 = vector.broadcast %12 : vector<4x1x50xi1> to vector<4x50x50xi1>
    %14 = vector.broadcast %cst_13 : f32 to vector<4x50x50xf32>
    %15 = arith.select %13, %9, %14 : vector<4x50x50xi1>, vector<4x50x50xf32>
    %cst_14 = arith.constant dense<0xFF800000> : vector<4x50xf32>
    %16 = vector.multi_reduction <maximumf>, %15, %cst_14 [2] : vector<4x50x50xf32> to vector<4x50xf32>
    %17 = vector.shape_cast %16 : vector<4x50xf32> to vector<4x50x1xf32>
    %18 = vector.broadcast %17 : vector<4x50x1xf32> to vector<4x50x50xf32>
    %19 = arith.subf %15, %18 : vector<4x50x50xf32>
    %20 = math.exp %19 : vector<4x50x50xf32>
    %cst_15 = arith.constant dense<0.000000e+00> : vector<4x50xf32>
    %21 = vector.multi_reduction <add>, %20, %cst_15 [2] : vector<4x50x50xf32> to vector<4x50xf32>
    %22 = vector.shape_cast %21 : vector<4x50xf32> to vector<4x50x1xf32>
    %23 = tpu.reciprocal %22 {approx = true} : vector<4x50x1xf32> -> vector<4x50x1xf32>
    %24 = vector.broadcast %23 : vector<4x50x1xf32> to vector<4x50x50xf32>
    %25 = arith.mulf %20, %24 : vector<4x50x50xf32>
    "tpu.trace_start"() <{level = 10 : i32, message = "bqk,bkd->bqd"}> : () -> ()
    %cst_16 = arith.constant dense<0.000000e+00> : vector<4x50x16xf32>
    %26 = tpu.matmul %25, %6, %cst_16 {dimension_numbers = #tpu.dot_dimension_numbers<[2], [1], [1], [2], [0, 0, 0, 1, 1, 2], [0], [0]>} : vector<4x50x50xf32>, vector<4x50x16xf32>, vector<4x50x16xf32> -> vector<4x50x16xf32>
    "tpu.trace_stop"() : () -> ()
    %27 = vector.extract_strided_slice %0 {offsets = [0, 0, 16], sizes = [4, 50, 16], strides = [1, 1, 1]} : vector<4x50x32xf32> to vector<4x50x16xf32>
    %28 = vector.extract_strided_slice %1 {offsets = [0, 0, 16], sizes = [4, 50, 16], strides = [1, 1, 1]} : vector<4x50x32xf32> to vector<4x50x16xf32>
    %29 = vector.extract_strided_slice %2 {offsets = [0, 0, 16], sizes = [4, 50, 16], strides = [1, 1, 1]} : vector<4x50x32xf32> to vector<4x50x16xf32>
    "tpu.trace_start"() <{level = 10 : i32, message = "bqd,bkd->bqk"}> : () -> ()
    %cst_17 = arith.constant dense<0.000000e+00> : vector<4x50x50xf32>
    %30 = tpu.matmul %27, %28, %cst_17 {dimension_numbers = #tpu.dot_dimension_numbers<[2], [2], [1], [1], [0, 0, 0, 1, 1, 1], [0], [0]>} : vector<4x50x16xf32>, vector<4x50x16xf32>, vector<4x50x50xf32> -> vector<4x50x50xf32>
    "tpu.trace_stop"() : () -> ()
    %cst_18 = arith.constant 2.500000e-01 : f32
    %31 = vector.broadcast %cst_18 : f32 to vector<4x50x50xf32>
    %32 = arith.mulf %30, %31 : vector<4x50x50xf32>
    %cst_19 = arith.constant 0.000000e+00 : f32
    %33 = vector.broadcast %cst_19 : f32 to vector<4x1x50xf32>
    %34 = arith.cmpf ogt, %3, %33 : vector<4x1x50xf32>
    %cst_20 = arith.constant -1.000000e+30 : f32
    %35 = vector.shape_cast %34 : vector<4x1x50xi1> to vector<4x1x50xi1>
    %36 = vector.broadcast %35 : vector<4x1x50xi1> to vector<4x50x50xi1>
    %37 = vector.broadcast %cst_20 : f32 to vector<4x50x50xf32>
    %38 = arith.select %36, %32, %37 : vector<4x50x50xi1>, vector<4x50x50xf32>
    %cst_21 = arith.constant dense<0xFF800000> : vector<4x50xf32>
    %39 = vector.multi_reduction <maximumf>, %38, %cst_21 [2] : vector<4x50x50xf32> to vector<4x50xf32>
    %40 = vector.shape_cast %39 : vector<4x50xf32> to vector<4x50x1xf32>
    %41 = vector.broadcast %40 : vector<4x50x1xf32> to vector<4x50x50xf32>
    %42 = arith.subf %38, %41 : vector<4x50x50xf32>
    %43 = math.exp %42 : vector<4x50x50xf32>
    %cst_22 = arith.constant dense<0.000000e+00> : vector<4x50xf32>
    %44 = vector.multi_reduction <add>, %43, %cst_22 [2] : vector<4x50x50xf32> to vector<4x50xf32>
    %45 = vector.shape_cast %44 : vector<4x50xf32> to vector<4x50x1xf32>
    %46 = tpu.reciprocal %45 {approx = true} : vector<4x50x1xf32> -> vector<4x50x1xf32>
    %47 = vector.broadcast %46 : vector<4x50x1xf32> to vector<4x50x50xf32>
    %48 = arith.mulf %43, %47 : vector<4x50x50xf32>
    "tpu.trace_start"() <{level = 10 : i32, message = "bqk,bkd->bqd"}> : () -> ()
    %cst_23 = arith.constant dense<0.000000e+00> : vector<4x50x16xf32>
    %49 = tpu.matmul %48, %29, %cst_23 {dimension_numbers = #tpu.dot_dimension_numbers<[2], [1], [1], [2], [0, 0, 0, 1, 1, 2], [0], [0]>} : vector<4x50x50xf32>, vector<4x50x16xf32>, vector<4x50x16xf32> -> vector<4x50x16xf32>
    "tpu.trace_stop"() : () -> ()
    %50 = tpu.concatenate %26, %49 in 2 : vector<4x50x16xf32>, vector<4x50x16xf32> -> vector<4x50x32xf32>
    %c0_24 = arith.constant 0 : index
    %c0_25 = arith.constant 0 : index
    %c0_26 = arith.constant 0 : index
    %51 = vector.load %arg5[%c0_24, %c0_25, %c0_26] : memref<4x50x32xf32, #tpu.memory_space<vmem>>, vector<4x50x32xf32>
    tpu.vector_store %arg5[%c0_24, %c0_25, %c0_26], %50 {strides = array<i32>} : memref<4x50x32xf32, #tpu.memory_space<vmem>>, vector<4x50x32xf32>,
    return
  }
  func.func @transform_0(%arg0: i32) -> (i32, i32, i32) {
    %c0_i32 = arith.constant 0 : i32
    %c0_i32_0 = arith.constant 0 : i32
    %c0_i32_1 = arith.constant 0 : i32
    return %arg0, %c0_i32, %c0_i32_0 : i32, i32, i32
  }
  func.func @transform_1(%arg0: i32) -> (i32, i32, i32) {
    %c0_i32 = arith.constant 0 : i32
    %c0_i32_0 = arith.constant 0 : i32
    %c0_i32_1 = arith.constant 0 : i32
    return %arg0, %c0_i32, %c0_i32_0 : i32, i32, i32
  }
  func.func @transform_2(%arg0: i32) -> (i32, i32, i32) {
    %c0_i32 = arith.constant 0 : i32
    %c0_i32_0 = arith.constant 0 : i32
    %c0_i32_1 = arith.constant 0 : i32
    return %arg0, %c0_i32, %c0_i32_0 : i32, i32, i32
  }
  func.func @transform_3(%arg0: i32) -> (i32, i32, i32) {
    %c0_i32 = arith.constant 0 : i32
    %c0_i32_0 = arith.constant 0 : i32
    %c0_i32_1 = arith.constant 0 : i32
    return %arg0, %c0_i32, %c0_i32_0 : i32, i32, i32
  }
  func.func @transform_4(%arg0: i32) -> (i32, i32, i32) {
    %c0_i32 = arith.constant 0 : i32
    %c0_i32_0 = arith.constant 0 : i32
    %c0_i32_1 = arith.constant 0 : i32
    return %arg0, %c0_i32, %c0_i32_0 : i32, i32, i32
  }
}

module attributes {stable_mosaic.version = 11 : i64} {
  func.func @_interaction_kernel(%arg0: i32, %arg1: memref<4x8x32xf32, #tpu.memory_space<vmem>>, %arg2: memref<4x40x32xf32, #tpu.memory_space<vmem>>, %arg3: memref<4x1x40xf32, #tpu.memory_space<vmem>>, %arg4: memref<4x8x8x40xf32, #tpu.memory_space<vmem>>) attributes {dimension_semantics = [#tpu.dimension_semantics<parallel>], iteration_bounds = array<i64: 2>, scalar_prefetch = 0 : i64, scratch_operands = 0 : i64, tpu.core_type = #tpu.core_type<tc>, window_params = [{transform_indices = @transform_0, window_bounds = array<i64: 4, 8, 32>}, {transform_indices = @transform_1, window_bounds = array<i64: 4, 40, 32>}, {transform_indices = @transform_2, window_bounds = array<i64: 4, 1, 40>}, {transform_indices = @transform_3, window_bounds = array<i64: 4, 8, 8, 40>}]} {
    %c0 = arith.constant 0 : index
    %c0_0 = arith.constant 0 : index
    %c0_1 = arith.constant 0 : index
    %0 = vector.load %arg1[%c0, %c0_0, %c0_1] : memref<4x8x32xf32, #tpu.memory_space<vmem>>, vector<4x8x32xf32>
    %c0_2 = arith.constant 0 : index
    %c0_3 = arith.constant 0 : index
    %c0_4 = arith.constant 0 : index
    %1 = vector.load %arg2[%c0_2, %c0_3, %c0_4] : memref<4x40x32xf32, #tpu.memory_space<vmem>>, vector<4x40x32xf32>
    %c0_5 = arith.constant 0 : index
    %c0_6 = arith.constant 0 : index
    %c0_7 = arith.constant 0 : index
    %2 = vector.load %arg3[%c0_5, %c0_6, %c0_7] : memref<4x1x40xf32, #tpu.memory_space<vmem>>, vector<4x1x40xf32>
    %3 = arith.mulf %0, %0 : vector<4x8x32xf32>
    %cst = arith.constant dense<0.000000e+00> : vector<4x8xf32>
    %4 = vector.multi_reduction <add>, %3, %cst [2] : vector<4x8x32xf32> to vector<4x8xf32>
    %5 = vector.shape_cast %4 : vector<4x8xf32> to vector<4x8x1xf32>
    %cst_8 = arith.constant 9.99999988E-27 : f32
    %6 = vector.broadcast %cst_8 : f32 to vector<4x8x1xf32>
    %7 = arith.addf %5, %6 : vector<4x8x1xf32>
    %8 = math.rsqrt %7 : vector<4x8x1xf32>
    %9 = vector.broadcast %8 : vector<4x8x1xf32> to vector<4x8x32xf32>
    %10 = arith.mulf %0, %9 : vector<4x8x32xf32>
    %11 = arith.mulf %1, %1 : vector<4x40x32xf32>
    %cst_9 = arith.constant dense<0.000000e+00> : vector<4x40xf32>
    %12 = vector.multi_reduction <add>, %11, %cst_9 [2] : vector<4x40x32xf32> to vector<4x40xf32>
    %13 = vector.shape_cast %12 : vector<4x40xf32> to vector<4x40x1xf32>
    %cst_10 = arith.constant 9.99999988E-27 : f32
    %14 = vector.broadcast %cst_10 : f32 to vector<4x40x1xf32>
    %15 = arith.addf %13, %14 : vector<4x40x1xf32>
    %16 = math.rsqrt %15 : vector<4x40x1xf32>
    %17 = vector.broadcast %16 : vector<4x40x1xf32> to vector<4x40x32xf32>
    %18 = arith.mulf %1, %17 : vector<4x40x32xf32>
    "tpu.trace_start"() <{level = 10 : i32, message = "bqd,bcd->bqc"}> : () -> ()
    %cst_11 = arith.constant dense<0.000000e+00> : vector<4x8x40xf32>
    %19 = tpu.matmul %10, %18, %cst_11 {dimension_numbers = #tpu.dot_dimension_numbers<[2], [2], [1], [1], [0, 0, 0, 1, 1, 1], [0], [0]>} : vector<4x8x32xf32>, vector<4x40x32xf32>, vector<4x8x40xf32> -> vector<4x8x40xf32>
    "tpu.trace_stop"() : () -> ()
    %cst_12 = arith.constant -7.500000e-01 : f32
    %20 = vector.broadcast %cst_12 : f32 to vector<4x8x40xf32>
    %21 = arith.subf %19, %20 : vector<4x8x40xf32>
    %22 = arith.mulf %21, %21 : vector<4x8x40xf32>
    %cst_13 = arith.constant -5.000000e+01 : f32
    %23 = vector.broadcast %cst_13 : f32 to vector<4x8x40xf32>
    %24 = arith.mulf %22, %23 : vector<4x8x40xf32>
    %25 = math.exp %24 : vector<4x8x40xf32>
    %26 = vector.broadcast %2 : vector<4x1x40xf32> to vector<4x8x40xf32>
    %27 = arith.mulf %25, %26 : vector<4x8x40xf32>
    %c0_14 = arith.constant 0 : index
    %c0_15 = arith.constant 0 : index
    %c0_16 = arith.constant 0 : index
    %c0_17 = arith.constant 0 : index
    %28 = vector.load %arg4[%c0_14, %c0_15, %c0_16, %c0_17] : memref<4x8x8x40xf32, #tpu.memory_space<vmem>>, vector<4x1x8x40xf32>
    %29 = vector.shape_cast %28 : vector<4x1x8x40xf32> to vector<4x8x40xf32>
    %30 = vector.shape_cast %27 : vector<4x8x40xf32> to vector<4x1x8x40xf32>
    tpu.vector_store %arg4[%c0_14, %c0_15, %c0_16, %c0_17], %30 {strides = array<i32>} : memref<4x8x8x40xf32, #tpu.memory_space<vmem>>, vector<4x1x8x40xf32>,
    %cst_18 = arith.constant -5.000000e-01 : f32
    %31 = vector.broadcast %cst_18 : f32 to vector<4x8x40xf32>
    %32 = arith.subf %19, %31 : vector<4x8x40xf32>
    %33 = arith.mulf %32, %32 : vector<4x8x40xf32>
    %cst_19 = arith.constant -5.000000e+01 : f32
    %34 = vector.broadcast %cst_19 : f32 to vector<4x8x40xf32>
    %35 = arith.mulf %33, %34 : vector<4x8x40xf32>
    %36 = math.exp %35 : vector<4x8x40xf32>
    %37 = vector.broadcast %2 : vector<4x1x40xf32> to vector<4x8x40xf32>
    %38 = arith.mulf %36, %37 : vector<4x8x40xf32>
    %c0_20 = arith.constant 0 : index
    %c1 = arith.constant 1 : index
    %c0_21 = arith.constant 0 : index
    %c0_22 = arith.constant 0 : index
    %39 = vector.load %arg4[%c0_20, %c1, %c0_21, %c0_22] : memref<4x8x8x40xf32, #tpu.memory_space<vmem>>, vector<4x1x8x40xf32>
    %40 = vector.shape_cast %39 : vector<4x1x8x40xf32> to vector<4x8x40xf32>
    %41 = vector.shape_cast %38 : vector<4x8x40xf32> to vector<4x1x8x40xf32>
    tpu.vector_store %arg4[%c0_20, %c1, %c0_21, %c0_22], %41 {strides = array<i32>} : memref<4x8x8x40xf32, #tpu.memory_space<vmem>>, vector<4x1x8x40xf32>,
    %cst_23 = arith.constant -2.500000e-01 : f32
    %42 = vector.broadcast %cst_23 : f32 to vector<4x8x40xf32>
    %43 = arith.subf %19, %42 : vector<4x8x40xf32>
    %44 = arith.mulf %43, %43 : vector<4x8x40xf32>
    %cst_24 = arith.constant -5.000000e+01 : f32
    %45 = vector.broadcast %cst_24 : f32 to vector<4x8x40xf32>
    %46 = arith.mulf %44, %45 : vector<4x8x40xf32>
    %47 = math.exp %46 : vector<4x8x40xf32>
    %48 = vector.broadcast %2 : vector<4x1x40xf32> to vector<4x8x40xf32>
    %49 = arith.mulf %47, %48 : vector<4x8x40xf32>
    %c0_25 = arith.constant 0 : index
    %c2 = arith.constant 2 : index
    %c0_26 = arith.constant 0 : index
    %c0_27 = arith.constant 0 : index
    %50 = vector.load %arg4[%c0_25, %c2, %c0_26, %c0_27] : memref<4x8x8x40xf32, #tpu.memory_space<vmem>>, vector<4x1x8x40xf32>
    %51 = vector.shape_cast %50 : vector<4x1x8x40xf32> to vector<4x8x40xf32>
    %52 = vector.shape_cast %49 : vector<4x8x40xf32> to vector<4x1x8x40xf32>
    tpu.vector_store %arg4[%c0_25, %c2, %c0_26, %c0_27], %52 {strides = array<i32>} : memref<4x8x8x40xf32, #tpu.memory_space<vmem>>, vector<4x1x8x40xf32>,
    %cst_28 = arith.constant 0.000000e+00 : f32
    %53 = vector.broadcast %cst_28 : f32 to vector<4x8x40xf32>
    %54 = arith.subf %19, %53 : vector<4x8x40xf32>
    %55 = arith.mulf %54, %54 : vector<4x8x40xf32>
    %cst_29 = arith.constant -5.000000e+01 : f32
    %56 = vector.broadcast %cst_29 : f32 to vector<4x8x40xf32>
    %57 = arith.mulf %55, %56 : vector<4x8x40xf32>
    %58 = math.exp %57 : vector<4x8x40xf32>
    %59 = vector.broadcast %2 : vector<4x1x40xf32> to vector<4x8x40xf32>
    %60 = arith.mulf %58, %59 : vector<4x8x40xf32>
    %c0_30 = arith.constant 0 : index
    %c3 = arith.constant 3 : index
    %c0_31 = arith.constant 0 : index
    %c0_32 = arith.constant 0 : index
    %61 = vector.load %arg4[%c0_30, %c3, %c0_31, %c0_32] : memref<4x8x8x40xf32, #tpu.memory_space<vmem>>, vector<4x1x8x40xf32>
    %62 = vector.shape_cast %61 : vector<4x1x8x40xf32> to vector<4x8x40xf32>
    %63 = vector.shape_cast %60 : vector<4x8x40xf32> to vector<4x1x8x40xf32>
    tpu.vector_store %arg4[%c0_30, %c3, %c0_31, %c0_32], %63 {strides = array<i32>} : memref<4x8x8x40xf32, #tpu.memory_space<vmem>>, vector<4x1x8x40xf32>,
    %cst_33 = arith.constant 2.500000e-01 : f32
    %64 = vector.broadcast %cst_33 : f32 to vector<4x8x40xf32>
    %65 = arith.subf %19, %64 : vector<4x8x40xf32>
    %66 = arith.mulf %65, %65 : vector<4x8x40xf32>
    %cst_34 = arith.constant -5.000000e+01 : f32
    %67 = vector.broadcast %cst_34 : f32 to vector<4x8x40xf32>
    %68 = arith.mulf %66, %67 : vector<4x8x40xf32>
    %69 = math.exp %68 : vector<4x8x40xf32>
    %70 = vector.broadcast %2 : vector<4x1x40xf32> to vector<4x8x40xf32>
    %71 = arith.mulf %69, %70 : vector<4x8x40xf32>
    %c0_35 = arith.constant 0 : index
    %c4 = arith.constant 4 : index
    %c0_36 = arith.constant 0 : index
    %c0_37 = arith.constant 0 : index
    %72 = vector.load %arg4[%c0_35, %c4, %c0_36, %c0_37] : memref<4x8x8x40xf32, #tpu.memory_space<vmem>>, vector<4x1x8x40xf32>
    %73 = vector.shape_cast %72 : vector<4x1x8x40xf32> to vector<4x8x40xf32>
    %74 = vector.shape_cast %71 : vector<4x8x40xf32> to vector<4x1x8x40xf32>
    tpu.vector_store %arg4[%c0_35, %c4, %c0_36, %c0_37], %74 {strides = array<i32>} : memref<4x8x8x40xf32, #tpu.memory_space<vmem>>, vector<4x1x8x40xf32>,
    %cst_38 = arith.constant 5.000000e-01 : f32
    %75 = vector.broadcast %cst_38 : f32 to vector<4x8x40xf32>
    %76 = arith.subf %19, %75 : vector<4x8x40xf32>
    %77 = arith.mulf %76, %76 : vector<4x8x40xf32>
    %cst_39 = arith.constant -5.000000e+01 : f32
    %78 = vector.broadcast %cst_39 : f32 to vector<4x8x40xf32>
    %79 = arith.mulf %77, %78 : vector<4x8x40xf32>
    %80 = math.exp %79 : vector<4x8x40xf32>
    %81 = vector.broadcast %2 : vector<4x1x40xf32> to vector<4x8x40xf32>
    %82 = arith.mulf %80, %81 : vector<4x8x40xf32>
    %c0_40 = arith.constant 0 : index
    %c5 = arith.constant 5 : index
    %c0_41 = arith.constant 0 : index
    %c0_42 = arith.constant 0 : index
    %83 = vector.load %arg4[%c0_40, %c5, %c0_41, %c0_42] : memref<4x8x8x40xf32, #tpu.memory_space<vmem>>, vector<4x1x8x40xf32>
    %84 = vector.shape_cast %83 : vector<4x1x8x40xf32> to vector<4x8x40xf32>
    %85 = vector.shape_cast %82 : vector<4x8x40xf32> to vector<4x1x8x40xf32>
    tpu.vector_store %arg4[%c0_40, %c5, %c0_41, %c0_42], %85 {strides = array<i32>} : memref<4x8x8x40xf32, #tpu.memory_space<vmem>>, vector<4x1x8x40xf32>,
    %cst_43 = arith.constant 7.500000e-01 : f32
    %86 = vector.broadcast %cst_43 : f32 to vector<4x8x40xf32>
    %87 = arith.subf %19, %86 : vector<4x8x40xf32>
    %88 = arith.mulf %87, %87 : vector<4x8x40xf32>
    %cst_44 = arith.constant -5.000000e+01 : f32
    %89 = vector.broadcast %cst_44 : f32 to vector<4x8x40xf32>
    %90 = arith.mulf %88, %89 : vector<4x8x40xf32>
    %91 = math.exp %90 : vector<4x8x40xf32>
    %92 = vector.broadcast %2 : vector<4x1x40xf32> to vector<4x8x40xf32>
    %93 = arith.mulf %91, %92 : vector<4x8x40xf32>
    %c0_45 = arith.constant 0 : index
    %c6 = arith.constant 6 : index
    %c0_46 = arith.constant 0 : index
    %c0_47 = arith.constant 0 : index
    %94 = vector.load %arg4[%c0_45, %c6, %c0_46, %c0_47] : memref<4x8x8x40xf32, #tpu.memory_space<vmem>>, vector<4x1x8x40xf32>
    %95 = vector.shape_cast %94 : vector<4x1x8x40xf32> to vector<4x8x40xf32>
    %96 = vector.shape_cast %93 : vector<4x8x40xf32> to vector<4x1x8x40xf32>
    tpu.vector_store %arg4[%c0_45, %c6, %c0_46, %c0_47], %96 {strides = array<i32>} : memref<4x8x8x40xf32, #tpu.memory_space<vmem>>, vector<4x1x8x40xf32>,
    %cst_48 = arith.constant 1.000000e+00 : f32
    %97 = vector.broadcast %cst_48 : f32 to vector<4x8x40xf32>
    %98 = arith.subf %19, %97 : vector<4x8x40xf32>
    %99 = arith.mulf %98, %98 : vector<4x8x40xf32>
    %cst_49 = arith.constant -5.000000e+01 : f32
    %100 = vector.broadcast %cst_49 : f32 to vector<4x8x40xf32>
    %101 = arith.mulf %99, %100 : vector<4x8x40xf32>
    %102 = math.exp %101 : vector<4x8x40xf32>
    %103 = vector.broadcast %2 : vector<4x1x40xf32> to vector<4x8x40xf32>
    %104 = arith.mulf %102, %103 : vector<4x8x40xf32>
    %c0_50 = arith.constant 0 : index
    %c7 = arith.constant 7 : index
    %c0_51 = arith.constant 0 : index
    %c0_52 = arith.constant 0 : index
    %105 = vector.load %arg4[%c0_50, %c7, %c0_51, %c0_52] : memref<4x8x8x40xf32, #tpu.memory_space<vmem>>, vector<4x1x8x40xf32>
    %106 = vector.shape_cast %105 : vector<4x1x8x40xf32> to vector<4x8x40xf32>
    %107 = vector.shape_cast %104 : vector<4x8x40xf32> to vector<4x1x8x40xf32>
    tpu.vector_store %arg4[%c0_50, %c7, %c0_51, %c0_52], %107 {strides = array<i32>} : memref<4x8x8x40xf32, #tpu.memory_space<vmem>>, vector<4x1x8x40xf32>,
    return
  }
  func.func @transform_0(%arg0: i32) -> (i32, i32, i32) {
    %c0_i32 = arith.constant 0 : i32
    %c0_i32_0 = arith.constant 0 : i32
    %c0_i32_1 = arith.constant 0 : i32
    return %arg0, %c0_i32, %c0_i32_0 : i32, i32, i32
  }
  func.func @transform_1(%arg0: i32) -> (i32, i32, i32) {
    %c0_i32 = arith.constant 0 : i32
    %c0_i32_0 = arith.constant 0 : i32
    %c0_i32_1 = arith.constant 0 : i32
    return %arg0, %c0_i32, %c0_i32_0 : i32, i32, i32
  }
  func.func @transform_2(%arg0: i32) -> (i32, i32, i32) {
    %c0_i32 = arith.constant 0 : i32
    %c0_i32_0 = arith.constant 0 : i32
    %c0_i32_1 = arith.constant 0 : i32
    return %arg0, %c0_i32, %c0_i32_0 : i32, i32, i32
  }
  func.func @transform_3(%arg0: i32) -> (i32, i32, i32, i32) {
    %c0_i32 = arith.constant 0 : i32
    %c0_i32_0 = arith.constant 0 : i32
    %c0_i32_1 = arith.constant 0 : i32
    %c0_i32_2 = arith.constant 0 : i32
    return %arg0, %c0_i32, %c0_i32_0, %c0_i32_1 : i32, i32, i32, i32
  }
}

</mosaic_0001>

<bundles_post_ra>
// kernel: tkl3_forward.3
= control target key start
LH: loop header
LB: loop body
LE: loop exit
PB: predicated region body
PF: predicated region fallthrough
CT: control target
= control target key end

     0   :  { %9 = vsyncpa [#allocation3], 0  ;;  %s1045_s0 = inlined_call_operand.vmem [shape: f32[2,8,32], index: 0, kind: input, shape index: {}]   ;;  %s1046_s1 = inlined_call_operand.vmem [shape: f32[2,8,32], index: 1, kind: input, shape index: {}]   ;;  %s1047_s2 = inlined_call_operand.vmem [shape: f32[2,8,32], index: 2, kind: input, shape index: {}]   ;;  %s1048_s3 = inlined_call_operand.hbm [shape: f32[2,1,8], index: 3, kind: input, shape index: {}]   ;;  %s1049_s4 = inlined_call_operand.vmem [shape: f32[2,8,32], index: 4, kind: output, shape index: {}]  }
   0x1   :  { %11 = vsyncpa [#allocation3 + $0x1], 0  ;;  %s903_s15 = smov 0   ;;  %s905_s16 = smov 0  }
   0x2   :  { %s907_s17 = smov 0   ;;  %s909_s18 = smov 0  }
   0x3 LB: > { %s922_s19 = sadd.s32 4294967295, %s870_s18   ;;  %s925_s20 = sadd.s32 1, %s870_s18   ;;  %s870_s18 = sphi %s909_s18, %s1057_s18   ;;  %s866_s17 = sphi %s907_s17, %s1056_s17   ;;  %s862_s16 = sphi %s905_s16, %s1055_s16   ;;  %s858_s15 = sphi %s903_s15, %s1054_s15  }
   0x4   : > { %s99_s21 = ssub.s32 %s870_s18, %s925_s20  ;;  %s102_s22 = sadd.s32 1, %s866_s17 }
   0x5   : > { %p100_p0 = scmp.eq.s32.totalorder %s99_s21, 0  ;;  %p109_p1 = scmp.ne.s32.totalorder %s866_s17, %s862_s16 }
   0x6   : > { %p110_p2 = scmp.eq.s32.totalorder %s870_s18, 0  ;;  %p115_p3 = scmp.ne.s32.totalorder %s862_s16, %s858_s15 }
   0x7   : > { %s935_s23 = scalar_select %p100_p0, %s866_s17, %s102_s22  }
   0x8   : > { %p111_p4 = por %p110_p2, %p109_p1  ;;  %p116_p5 = scmp.eq.s32.totalorder %s922_s19, 0 }
   0x9   : > { %p760_p6 = scmp.lt.s32.totalorder %s870_s18, 2  ;;  %s186_s25 = sand.u32 1, %s866_s17  }
   0xa   : > { %p939_p7 = por %p116_p5, %p115_p3  ;;  %s712_s26 = sshll.u32 %s870_s18, 4 }
   0xb   : > { %s189_s27 = scalar_lea.vmem [#allocation2], %s186_s25  ;;  %s948_s5 = scalar_lea.hbm %s1048_s3, %s712_s26 }
   0xc   : > { %s196_s28 = sshll.u32 %s189_s27, 4  ;;  %p952_p8 = pnand %p760_p6, %p111_p4  ;;  %s950_s28 = int_to_ptr.vmem [resolvable:$true] %s196_s28 }
   0xd   : > { %s187_s7 = scalar_lea.sflag [#allocation3], %s186_s25  ;;  %s806_s8 = scalar_lea.hbm %s948_s5, 16 }
   0xe   : > { %p807_p11 = scmp.ne.s32.totalorder %s948_s5, %s806_s8  ;;  %p808_p12 = pneg %p952_p8 }
   0xf   : > { %s811_s11 = scalar_lea.hbm %s1048_s3, 32  ;;  %p812_p1 = scmp.lt.u32.totalorder %s948_s5, %s1048_s3 }
  0x10   : > { %p809_p13 = pnand %p808_p12, %p807_p11  ;;  %p813_p2 = scmp.lt.u32.totalorder %s811_s11, %s806_s8 }
  0x11   : > { %p815_p4 = scmp.lt.u32.totalorder %s806_s8, %s948_s5 }
  0x12   : > { %p810_p0 = pneg %p809_p13  ;;  %p814_p3 = por %p813_p2, %p812_p1 }
  0x14   : > { %p816_p5 = por %p815_p4, %p814_p3 }
  0x16   : > { %p817_p6 = pnand %p816_p5, %p810_p0 }
  0x18   : > { %820 = shalt.err (!%p817_p6)
}
  0x19   : > { %s821_s14 = scalar_lea.vmem %s950_s28, 16  ;;  %s872_s15 = smov [#allocation2]  }
  0x1a   : > { %p822_p11 = scmp.ne.s32.totalorder %s950_s28, %s821_s14  ;;  %s826_s21 = sshll.u32 %s872_s15, 4  ;;  %s827_s21 = int_to_ptr.vmem [resolvable:$false] %s826_s21 }
  0x1b   : > { %s828_s22 = scalar_lea.vmem %s827_s21, 32  ;;  %p829_p10 = scmp.lt.s32.totalorder %s950_s28, %s827_s21 }
  0x1c   : > { %p824_p13 = pnand %p822_p11, %p808_p12  ;;  %p830_p1 = scmp.lt.s32.totalorder %s828_s22, %s821_s14 }
  0x1e   : > { %p825_p9 = pneg %p824_p13  ;;  %p831_p2 = por %p830_p1, %p829_p10 }
  0x20   : > { %p832_p3 = pnand %p831_p2, %p825_p9 }
  0x22   : > { %835 = shalt.err (!%p832_p3)
}
  0x23   : > { %759 = dma.hbm_to_vmem [thread:$0]  (!%p952_p8), %s948_s5, 16, %s950_s28, %s187_s7  }
  0x24   : > { %p1052_p0 = scmp.lt.s32.totalorder %s870_s18, 3  ;;  %p1053_p4 = scmp.ge.s32.totalorder %s870_s18, 1 }
  0x26   : > { %p202_p12 = pnand %p1053_p4, %p1052_p0 }
  0x27   : > { %s207_s25 = sand.u32 (!%p202_p12), 1, %s862_s16  }
  0x28   : > { %205 = sbr.rel (%p202_p12) target bundleno = 1448 (0x5a8), region = 36  ;;  %s208_s26 = scalar_lea.sflag (!%p202_p12), [#allocation3], %s207_s25 }
  0x29   : > { %s210_s27 = scalar_lea.vmem (!%p202_p12), [#allocation2], %s207_s25 }
  0x2f   : > { %853 = dma.done.wait (%p939_p7), %s208_s26, 16  }
  0x30   : > { %855 = vsyncadd (%p939_p7), %s208_s26, 4294967280  ;;  %p245_p9 = scmp.lt.s32.totalorder %s922_s19, 1  ;;  %v873_v0 = vmov 0.0   ;;  %vm874_vm0 = vmmov 0   ;;  %vm265_vm1 = vcmask 130048   ;;  %v345_v3 = vlaneseq  ;;  %s877_s10 = smov 16  }
  0x31   : > { %734 = vmatprep.subr.mxu0 %v873_v0  ;;  %736 = vmatprep.mubr.msk.f32.mxu0 %vm874_vm0, %v873_v0  ;;  %v264_v4 = vld [vmem:[%s210_s27] sm:$0x1]  ;;  %v875_v7 = vmov 0   ;;  %vm351_vm4 = vcmask 64512   ;;  %vm609_vm5 = vcmask 261120  }
  0x32   : > { %s1059_s19 = smov (!%p245_p9, %s922_s19), 1  ;;  %739 = vmatprep.subr.mxu1 %v873_v0  ;;  %741 = vmatprep.mubr.msk.f32.mxu1 %vm874_vm0, %v873_v0  ;;  %v346_v5 = vshrl.u32 %v345_v3, 7  ;;  %vm343_vm2 = vcmp.gt.f32.partialorder %v264_v4, 0.0 }
  0x33   : > { %s996_s18 = sshll.u32 %s1059_s19, 3  ;;  %v344_v8 = vsel %vm343_vm2, 1, %v875_v7  ;;  %s876_s19 = smov 112  }
  0x34   : > { %s252_s24 = scalar_lea.vmem %s1046_s1, %s996_s18  ;;  %s248_s6 = scalar_lea.vmem %s1045_s0, %s996_s18  ;;  %v347_v6 = vsub.s32 0, %v346_v5 }
  0x35   : > { %v262_v1 = vld [vmem:[%s252_s24] sm:$0xff]  ;;  %s256_s9 = scalar_lea.vmem %s1047_s2, %s996_s18  ;;  %s260_s13 = scalar_lea.vmem %s1049_s4, %s996_s18 }
  0x36   : > { %735 = vmatpush3.xpose.msk.msra.mxu0 %vm265_vm1, %v262_v1  ;;  %v261_v2 = vld [vmem:[%s248_s6] sm:$0xff]  ;;  %v348_v9 = vrot.slane %v344_v8, %v347_v6  ;;  %438 = vrot.lane.b32.xlu1 %v262_v1, %s876_s19 }
  0x37   : > { %749 = vmatprep.subr.mxu0 %v873_v0  ;;  %v263_v20 = vld [vmem:[%s256_s9] sm:$0xff] }
  0x38   : > { %vm349_vm3 = vcmp.eq.s32.totalorder %v348_v9, 1  ;;  %740 = vmatpush3.msra.mxu1 %v263_v20 }
  0x39   : > { %737 = vmatmul.mubr.msk.f32.vlgmr.msra.gmra.mrb[0].mxu0 %vm265_vm1, %v261_v2  ;;  %744 = vmatprep.subr.mxu1 %v873_v0 }
  0x3a   : > { %751 = vmatprep.mubr.msk.f32.mxu0 %vm874_vm0, %v873_v0  ;;  %436 = vrot.lane.b32.xlu1 %v261_v2, %s876_s19 }
  0xa8   : > { %v439_v22 = vpop.permute.xlu1 %438 }
  0xac   : > { %v437_v25 = vpop.permute.xlu1 %436 }
 0x10c   : > { %v338_v10 = vpop.f32.mrb[0].mxu0 }
 0x10d   : > { %v342_v11 = vmul.f32 0.25, %v338_v10  ;;  %v738_v12 = vpop.f32.mrb[1].mxu0 }
 0x10f   : > { %v350_v13 = vsel %vm349_vm3, %v342_v11, -1e+30 }
 0x110   : > { %v352_v14 = vsel %vm351_vm4, %v350_v13, -inf }
 0x111   : > { %353 = vmax.xlane.f32.xlu0 %v352_v14 }
 0x19e   : > { %v354_v15 = vpop.xlane.xlu0 %353 }
 0x19f   : > { %v355_v16 = vsub.f32 %v350_v13, %v354_v15 }
 0x1a1   : > { %v356_v17 = vmul.f32 1.442695, %v355_v16 }
 0x1a3   : > { %798 = vpow2.f32 %v356_v17 }
 0x1ad   : > { %v799_v18 = vpop.eup %798 }
 0x1ae   : > { %v358_v19 = vsel %vm351_vm4, %v799_v18, 0.0 }
 0x1af   : > { %359 = vadd.xlane.f32.xlu0 %v358_v19 }
 0x23c   : > { %v360_v21 = vpop.xlane.xlu0 %359 }
 0x23d   : > { %800 = vrcp.f32 %v360_v21 }
 0x247   : > { %v801_v23 = vpop.eup %800 }
 0x248   : > { %v362_v24 = vmul.f32 %v801_v23, %v799_v18 }
 0x24a   : > { %742 = vmatmul.mubr.msk.f32.vlgmr.msra.gmra.mrb[0].mxu1 %vm351_vm4, %v362_v24 }
 0x24b   : > { %745 = vmatpush3.xpose.msk.msra.mxu1 %vm265_vm1, %v439_v22  ;;  %746 = vmatprep.mubr.msk.f32.mxu1 %vm874_vm0, %v873_v0 }
 0x24e   : > { %747 = vmatmul.mubr.msk.f32.vlgmr.msra.gmra.mrb[2].mxu1 %vm265_vm1, %v437_v25 }
 0x31d   : > { %v432_v26 = vpop.f32.mrb[0].mxu1 }
 0x31e   : > { %v743_v27 = vpop.f32.mrb[1].mxu1 }
 0x321   : > { %v510_v28 = vpop.f32.mrb[2].mxu1 }
 0x322   : > { %v514_v29 = vmul.f32 0.25, %v510_v28  ;;  %v748_v30 = vpop.f32.mrb[3].mxu1 }
 0x324   : > { %v515_v31 = vsel %vm349_vm3, %v514_v29, -1e+30 }
 0x325   : > { %v516_v32 = vsel %vm351_vm4, %v515_v31, -inf }
 0x326   : > { %517 = vmax.xlane.f32.xlu0 %v516_v32 }
 0x33c   : > { %528 = vrot.lane.b32.xlu0 %v263_v20, %s876_s19 }
 0x3b3   : > { %v518_v33 = vpop.xlane.xlu0 %517 }
 0x3b4   : > { %v519_v34 = vsub.f32 %v515_v31, %v518_v33 }
 0x3b6   : > { %v520_v35 = vmul.f32 1.442695, %v519_v34 }
 0x3b7   : > { %v529_v38 = vpop.permute.xlu0 %528 }
 0x3b8   : > { %802 = vpow2.f32 %v520_v35  ;;  %750 = vmatpush3.msra.mxu0 %v529_v38 }
 0x3c2   : > { %v803_v36 = vpop.eup %802 }
 0x3c3   : > { %v522_v37 = vsel %vm351_vm4, %v803_v36, 0.0 }
 0x3c4   : > { %523 = vadd.xlane.f32.xlu1 %v522_v37 }
 0x451   : > { %v524_v39 = vpop.xlane.xlu1 %523 }
 0x452   : > { %804 = vrcp.f32 %v524_v39 }
 0x45c   : > { %v805_v40 = vpop.eup %804 }
 0x45d   : > { %v526_v41 = vmul.f32 %v805_v40, %v803_v36 }
 0x45f   : > { %752 = vmatmul.mubr.msk.f32.vlgmr.msra.gmra.mrb[2].mxu0 %vm351_vm4, %v526_v41 }
 0x532   : > { %v600_v42 = vpop.f32.mrb[2].mxu0 }
 0x533   : > { %605 = vrot.lane.b32.xlu0 %v600_v42, %s877_s10  ;;  %v753_v43 = vpop.f32.mrb[3].mxu0 }
 0x5a5   : > { %v606_v44 = vpop.permute.xlu0 %605 }
 0x5a6   : > { %v608_v45 = vsel %vm265_vm1, %v432_v26, %v606_v44 }
 0x5a7   : > { %610 = vst.msk [vmem:[%s260_s13] sm:$0xff] %vm609_vm5, %v608_v45 }
 0x5a8 PF: > { %p14_p7 = scmp.ge.s32.totalorder %s925_s20, 4   ;;  %s1054_s15 = smov %s862_s16 }
 0x5a9   : > { %s1055_s16 = smov %s866_s17  ;;  %s1056_s17 = smov %s935_s23 }
 0x5aa   : > { %s1057_s18 = smov %s925_s20  ;;  %16 = sbr.rel (!%p14_p7) target bundleno = 3 (0x3), region = 85 }
 0x5b1   :  { %630 = vsyncpa [#allocation3], 1 }
 0x5b2   :  { %632 = vsyncpa [#allocation3 + $0x1], 1 }

// kernel: tkl3_forward.4
= control target key start
LH: loop header
LB: loop body
LE: loop exit
PB: predicated region body
PF: predicated region fallthrough
CT: control target
= control target key end

     0   :  { %s5238_s15 = smov 0   ;;  %s7061_s0 = inlined_call_operand.vmem [shape: f32[8,50,32], index: 0, kind: input, shape index: {}]   ;;  %s7062_s1 = inlined_call_operand.vmem [shape: f32[8,50,32], index: 1, kind: input, shape index: {}]   ;;  %s7063_s2 = inlined_call_operand.vmem [shape: f32[8,50,32], index: 2, kind: input, shape index: {}]   ;;  %s7064_s3 = inlined_call_operand.vmem [shape: f32[8,1,50], index: 3, kind: input, shape index: {}]   ;;  %s7065_s4 = inlined_call_operand.vmem [shape: f32[8,50,32], index: 4, kind: output, shape index: {}]  }
   0x1 LB: > { %s3668_s16 = sadd.s32 4294967295, %s5205_s15   ;;  %p3672_p0 = scmp.ge.s32.totalorder %s5205_s15, 1  ;;  %s5205_s15 = sphi %s5238_s15, %s14_s15  }
   0x2   : > { %p198_p1 = scmp.lt.s32.totalorder %s5205_s15, 3 }
   0x4   : > { %p199_p2 = pnand %p3672_p0, %p198_p1 }
   0x6   : > { %202 = sbr.rel (%p199_p2) target bundleno = 1667 (0x683), region = 36 }
   0xd   : > { %s3673_s17 = sshll.u32 %s3668_s16, 2  ;;  %v7068_v0 = vmov 0.0|0.0   ;;  %vm5208_vm0 = vmmov 0   ;;  %v7066_v1 = vmov 0.0   ;;  %vm363_vm1 = vcmask 130048   ;;  %s5210_s22 = smov 112  }
   0xe   : > { %4644 = vmatprep.subr.bf16.mxu0 %v7068_v0  ;;  %p243_p3 = scmp.lt.s32.totalorder %s3673_s17, 7  ;;  %4656 = vmatprep.subr.bf16.mxu1 %v7068_v0  ;;  %vm5265_vm2 = vmpackc.low %vm363_vm1, %vm363_vm1  ;;  %vm1016_vm6 = vcmask 408576   ;;  %vm1035_vm10 = vcmask 402432   ;;  %vm1347_vm13 = vcmask 1041408   ;;  %s5212_s6 = smov 16   ;;  %vm3547_vm14 = vcmask 261120  }
   0xf   : > { %4098 = vmatprep.mubr.msk.f32.mxu0 %vm5208_vm0, %v7066_v1  ;;  %4133 = vmatprep.mubr.msk.f32.mxu1 %vm5208_vm0, %v7066_v1  ;;  %vm3554_vm15 = vcmask 254976  }
  0x10   : > { %s7171_s17 = smov (!%p243_p3, %s3673_s17), 7 }
  0x11   : > { %s5255_s18 = smul.u32 56, %s7171_s17  ;;  %s5513_s28 = scalar_lea.vmem %s7064_s3, %s7171_s17 }
  0x13   : > { %s5261_s21 = scalar_lea.vmem %s7062_s1, %s5255_s18  ;;  %s5318_s25 = scalar_lea.vmem %s7061_s0, %s5255_s18 }
  0x14   : > { %v303_v3 = vld [vmem:[%s5261_s21] sm:$0xff]  ;;  %v304_v4 = vld [vmem:[%s5261_s21 + $0x8] sm:$0xff]  ;;  %v310_v5 = vld [vmem:[%s5261_s21 + $0x38] sm:$0xff]  ;;  %s5789_s5 = scalar_lea.vmem %s7063_s2, %s5255_s18  ;;  %s6924_s9 = scalar_lea.vmem %s7065_s4, %s5255_s18 }
  0x15   : > { %v4645_v6 = vpack.c.bf16 %v304_v4, %v303_v3  ;;  %v311_v7 = vld [vmem:[%s5261_s21 + $0x40] sm:$0xff]  ;;  %v4827_v8 = vpack.i.bf16 %v304_v4, %v303_v3  ;;  %v305_v11 = vld [vmem:[%s5261_s21 + $0x10] sm:$0xff]  ;;  %v306_v12 = vld [vmem:[%s5261_s21 + $0x18] sm:$0xff] }
  0x16   : > { %v4657_v9 = vpack.c.bf16 %v311_v7, %v310_v5  ;;  %v4832_v10 = vpack.i.bf16 %v311_v7, %v310_v5  ;;  %v307_v13 = vld [vmem:[%s5261_s21 + $0x20] sm:$0xff]  ;;  %v308_v14 = vld [vmem:[%s5261_s21 + $0x28] sm:$0xff]  ;;  %v313_v16 = vld [vmem:[%s5261_s21 + $0x50] sm:$0xff]  ;;  %v4837_v17 = vpack.i.bf16 %v306_v12, %v305_v11  ;;  %v4649_v19 = vpack.c.bf16 %v306_v12, %v305_v11 }
  0x17   : > { %4647 = vmatpush3.bf16.xpose.msk.msra.mxu0 %vm5265_vm2, %v4645_v6  ;;  %4828 = vrot.lane.b32.xlu0 %v4827_v8, %s5210_s22  ;;  %v312_v15 = vld [vmem:[%s5261_s21 + $0x48] sm:$0xff]  ;;  %v4847_v18 = vpack.i.bf16 %v308_v14, %v307_v13  ;;  %v309_v22 = vld [vmem:[%s5261_s21 + $0x30] sm:$0x3]  ;;  %v318_v24 = vld [vmem:[%s5261_s21 + $0x78] sm:$0xff]  ;;  %v4653_v31 = vpack.c.bf16 %v308_v14, %v307_v13 }
  0x18   : > { %4659 = vmatpush3.bf16.xpose.msk.msra.mxu1 %vm5265_vm2, %v4657_v9  ;;  %4648 = vmatprep.subr.bf16.mxu0 %v7068_v0  ;;  %v4661_v20 = vpack.c.bf16 %v313_v16, %v312_v15  ;;  %v4842_v21 = vpack.i.bf16 %v313_v16, %v312_v15  ;;  %v317_v23 = vld [vmem:[%s5261_s21 + $0x70] sm:$0xff]  ;;  %v314_v26 = vld [vmem:[%s5261_s21 + $0x58] sm:$0xff]  ;;  %v315_v27 = vld [vmem:[%s5261_s21 + $0x60] sm:$0xff] }
  0x19   : > { %4660 = vmatprep.subr.bf16.mxu1 %v7068_v0  ;;  %4833 = vrot.lane.b32.xlu1 %v4832_v10, %s5210_s22  ;;  %v4857_v25 = vpack.i.bf16 %v318_v24, %v317_v23  ;;  %v4852_v28 = vpack.i.bf16 %v315_v27, %v314_v26  ;;  %v324_v29 = vld [vmem:[%s5261_s21 + $0xa8] sm:$0xff]  ;;  %v325_v30 = vld [vmem:[%s5261_s21 + $0xb0] sm:$0xff]  ;;  %v4665_v33 = vpack.c.bf16 %v315_v27, %v314_v26  ;;  %v275_v36 = vld [vmem:[%s5318_s25] sm:$0xff] }
  0x1a   : > { %v4862_v32 = vpack.i.bf16 %v325_v30, %v324_v29  ;;  %v316_v34 = vld [vmem:[%s5261_s21 + $0x68] sm:$0x3]  ;;  %v4669_v37 = vpack.c.bf16 %v318_v24, %v317_v23  ;;  %v282_v38 = vld [vmem:[%s5318_s25 + $0x38] sm:$0xff]  ;;  %v4681_v39 = vpack.c.bf16 %v325_v30, %v324_v29  ;;  %v5339_v40 = vld [vmem:[%s5261_s21 + $0x80] sm:$0xff]  ;;  %v5211_v23 = vmov 0  }
  0x1b   : > { %4848 = vrot.lane.b32.xlu0 %v4847_v18, %s5210_s22  ;;  %v276_v35 = vld [vmem:[%s5318_s25 + $0x8] sm:$0xff]  ;;  %v283_v42 = vld [vmem:[%s5318_s25 + $0x40] sm:$0xff]  ;;  %v326_v43 = vld [vmem:[%s5261_s21 + $0xb8] sm:$0xff]  ;;  %v968_v18 = vlaneseq  ;;  %v7092_v29 = vmov 0 }
  0x1c   : > { %v5342_v41 = vld [vmem:[%s5261_s21 + $0x88] sm:$0xff]  ;;  %v327_v44 = vld [vmem:[%s5261_s21 + $0xc0] sm:$0xff]  ;;  %v5356_v45 = vld [vmem:[%s5318_s25 + $0x10] sm:$0xff] }
  0x1d   : > { %4838 = vrot.lane.b32.xlu1 %v4837_v17, %s5210_s22  ;;  %v4673_v46 = vpack.c.bf16 %v5342_v41, %v5339_v40  ;;  %v284_v47 = vld [vmem:[%s5318_s25 + $0x48] sm:$0xff]  ;;  %v4685_v48 = vpack.c.bf16 %v327_v44, %v326_v43  ;;  %v278_v49 = vld [vmem:[%s5318_s25 + $0x18] sm:$0xff]  ;;  %v321_v50 = vld [vmem:[%s5261_s21 + $0x90] sm:$0xff] }
  0x1e   : > { %v322_v51 = vld [vmem:[%s5261_s21 + $0x98] sm:$0xff]  ;;  %v285_v52 = vld [vmem:[%s5318_s25 + $0x50] sm:$0xff]  ;;  %v328_v53 = vld [vmem:[%s5261_s21 + $0xc8] sm:$0xff] }
  0x1f   : > { %4651 = vmatpush3.bf16.xpose.msk.msra.mxu0 %vm5265_vm2, %v4649_v19  ;;  %1849 = vrot.lane.b32.xlu0 %v309_v22, %s5210_s22  ;;  %v329_v54 = vld [vmem:[%s5261_s21 + $0xd0] sm:$0xff]  ;;  %v279_v55 = vld [vmem:[%s5318_s25 + $0x20] sm:$0xff]  ;;  %v4677_v56 = vpack.c.bf16 %v322_v51, %v321_v50  ;;  %v286_v57 = vld [vmem:[%s5318_s25 + $0x58] sm:$0xff] }
  0x20   : > { %4663 = vmatpush3.bf16.xpose.msk.msra.mxu1 %vm5265_vm2, %v4661_v20  ;;  %4652 = vmatprep.subr.bf16.mxu0 %v7068_v0  ;;  %v4689_v58 = vpack.c.bf16 %v329_v54, %v328_v53  ;;  %v280_v59 = vld [vmem:[%s5318_s25 + $0x28] sm:$0xff]  ;;  %v287_v60 = vld [vmem:[%s5318_s25 + $0x60] sm:$0xff]  ;;  %v5410_v61 = vld [vmem:[%s5318_s25 + $0x30] sm:$0x3]  ;;  %v969_v20 = vshrl.u32 %v968_v18, 7 }
  0x21   : > { %4664 = vmatprep.subr.bf16.mxu1 %v7068_v0  ;;  %4843 = vrot.lane.b32.xlu1 %v4842_v21, %s5210_s22  ;;  %v5414_v62 = vld [vmem:[%s5261_s21 + $0xa0] sm:$0x3]  ;;  %v288_v63 = vld [vmem:[%s5318_s25 + $0x68] sm:$0x3]  ;;  %v330_v3 = vld [vmem:[%s5261_s21 + $0xd8] sm:$0x3] }
  0x22   : > { %v5427_v4 = vld [vmem:[%s5318_s25 + $0x70] sm:$0xff]  ;;  %v296_v5 = vld [vmem:[%s5318_s25 + $0xa8] sm:$0xff]  ;;  %v5441_v6 = vld [vmem:[%s5318_s25 + $0x78] sm:$0xff] }
  0x23   : > { %4858 = vrot.lane.b32.xlu0 %v4857_v25, %s5210_s22  ;;  %v297_v7 = vld [vmem:[%s5318_s25 + $0xb0] sm:$0xff]  ;;  %v5452_v8 = vld [vmem:[%s5318_s25 + $0x80] sm:$0xff]  ;;  %v298_v9 = vld [vmem:[%s5318_s25 + $0xb8] sm:$0xff] }
  0x24   : > { %v5463_v10 = vld [vmem:[%s5318_s25 + $0x88] sm:$0xff]  ;;  %v299_v11 = vld [vmem:[%s5318_s25 + $0xc0] sm:$0xff]  ;;  %v5474_v12 = vld [vmem:[%s5318_s25 + $0x90] sm:$0xff] }
  0x25   : > { %4853 = vrot.lane.b32.xlu1 %v4852_v28, %s5210_s22  ;;  %v300_v13 = vld [vmem:[%s5318_s25 + $0xc8] sm:$0xff]  ;;  %v5485_v14 = vld [vmem:[%s5318_s25 + $0x98] sm:$0xff]  ;;  %v301_v15 = vld [vmem:[%s5318_s25 + $0xd0] sm:$0xff] }
  0x26   : > { %v5496_v16 = vld [vmem:[%s5318_s25 + $0xa0] sm:$0x3]  ;;  %v302_v17 = vld [vmem:[%s5318_s25 + $0xd8] sm:$0x3]  ;;  %v361_v18 = vld [vmem:[%s5513_s28 + $0x2] sm:$0x1] }
  0x27   : > { %4655 = vmatpush3.bf16.xpose.msk.msra.mxu0 %vm5265_vm2, %v4653_v31  ;;  %4863 = vrot.lane.b32.xlu0 %v4862_v32, %s5210_s22  ;;  %v359_v19 = vld [vmem:[%s5513_s28] sm:$0x1]  ;;  %v360_v21 = vld [vmem:[%s5513_s28 + $0x1] sm:$0x1]  ;;  %vm962_vm8 = vcmp.gt.f32.partialorder %v361_v18, 0.0 }
  0x28   : > { %4667 = vmatpush3.bf16.xpose.msk.msra.mxu1 %vm5265_vm2, %v4665_v33  ;;  %4096 = vmatprep.subr.mxu0 %v7066_v1  ;;  %vm960_vm3 = vcmp.gt.f32.partialorder %v359_v19, 0.0  ;;  %vm961_vm4 = vcmp.gt.f32.partialorder %v360_v21, 0.0  ;;  %v7095_v33 = vmov 0 }
  0x29   : > { %4131 = vmatprep.subr.mxu1 %v7066_v1  ;;  %2005 = vrot.lane.b32.xlu1 %v316_v34, %s5210_s22  ;;  %v964_v24 = vsel %vm960_vm3, 1, %v5211_v23  ;;  %v965_v25 = vsel %vm961_vm4, 1, %v5211_v23 }
  0x2b   : > { %1825 = vrot.lane.b32.xlu0 %v276_v35, %s5210_s22 }
  0x2d   : > { %1823 = vrot.lane.b32.xlu1 %v275_v36, %s5210_s22 }
  0x2f   : > { %4097 = vmatpush3.xpose.msk.msra.mxu0 %vm363_vm1, %v309_v22  ;;  %v5517_v22 = vsub.s32 0, %v969_v20 }
  0x30   : > { %4132 = vmatpush3.xpose.msk.msra.mxu1 %vm363_vm1, %v316_v34  ;;  %4668 = vmatprep.subr.bf16.mxu0 %v7068_v0 }
  0x31   : > { %4680 = vmatprep.subr.bf16.mxu1 %v7068_v0  ;;  %1979 = vrot.lane.b32.xlu1 %v282_v38, %s5210_s22  ;;  %v971_v26 = vrot.slane %v964_v24, %v5517_v22  ;;  %v975_v27 = vrot.slane %v965_v25, %v5517_v22 }
  0x32   : > { %4099 = vmatmul.mubr.msk.f32.vlgmr.msra.gmra.mrb[0].mxu0 %vm363_vm1, %v275_v36 }
  0x33   : > { %4671 = vmatpush3.bf16.xpose.msk.msra.mxu0 %vm5265_vm2, %v4669_v37  ;;  %4101 = vmatprep.mubr.msk.f32.mxu0 %vm5208_vm0, %v7066_v1  ;;  %vm5523_vm5 = vcmp.eq.s32.totalorder %v971_v26, 1  ;;  %vm5527_vm7 = vcmp.eq.s32.totalorder %v975_v27, 1  ;;  %v362_v26 = vld [vmem:[%s5513_s28 + $0x3] sm:$0x1] }
  0x34   : > { %4134 = vmatmul.mubr.msk.f32.vlgmr.msra.gmra.mrb[0].mxu1 %vm363_vm1, %v282_v38  ;;  %4672 = vmatprep.subr.bf16.mxu0 %v7068_v0  ;;  %v7093_v29 = vsel %vm5523_vm5, 4294967295, %v7092_v29  ;;  %v7096_v33 = vsel %vm5527_vm7, 4294967295, %v7095_v33  ;;  %vm963_vm9 = vcmp.gt.f32.partialorder %v362_v26, 0.0 }
  0x35   : > { %4683 = vmatpush3.bf16.xpose.msk.msra.mxu1 %vm5265_vm2, %v4681_v39  ;;  %4136 = vmatprep.mubr.msk.f32.mxu1 %vm5208_vm0, %v7066_v1  ;;  %7094 = vst [vmem:[#allocation2_spill] sm:$0xff] %v7093_v29  ;;  %7097 = vst [vmem:[#allocation3_spill] sm:$0xff] %v7096_v33 }
  0x36   : > { %4102 = vmatmul.mubr.msk.f32.gmra.mrb[2].mxu0 %vm363_vm1, %v276_v35  ;;  %4684 = vmatprep.subr.bf16.mxu1 %v7068_v0 }
  0x37   : > { %4104 = vmatprep.mubr.msk.f32.mxu0 %vm5208_vm0, %v7066_v1  ;;  %1981 = vrot.lane.b32.xlu1 %v283_v42, %s5210_s22 }
  0x38   : > { %4137 = vmatmul.mubr.msk.f32.gmra.mrb[2].mxu1 %vm363_vm1, %v283_v42 }
  0x39   : > { %4139 = vmatprep.mubr.msk.f32.mxu1 %vm5208_vm0, %v7066_v1 }
  0x3a   : > { %4105 = vmatmul.mubr.msk.f32.gmra.mrb[4].mxu0 %vm363_vm1, %v5356_v45 }
  0x3b   : > { %4675 = vmatpush3.bf16.xpose.msk.msra.mxu0 %vm5265_vm2, %v4673_v46  ;;  %4107 = vmatprep.mubr.msk.f32.mxu0 %vm5208_vm0, %v7066_v1 }
  0x3c   : > { %4140 = vmatmul.mubr.msk.f32.gmra.mrb[4].mxu1 %vm363_vm1, %v284_v47  ;;  %4676 = vmatprep.subr.bf16.mxu0 %v7068_v0 }
  0x3d   : > { %4687 = vmatpush3.bf16.xpose.msk.msra.mxu1 %vm5265_vm2, %v4685_v48  ;;  %4142 = vmatprep.mubr.msk.f32.mxu1 %vm5208_vm0, %v7066_v1 }
  0x3e   : > { %4108 = vmatmul.mubr.msk.f32.gmra.mrb[6].mxu0 %vm363_vm1, %v278_v49  ;;  %4688 = vmatprep.subr.bf16.mxu1 %v7068_v0 }
  0x3f   : > { %4110 = vmatprep.mubr.msk.f32.mxu0 %vm5208_vm0, %v7066_v1 }
  0x40   : > { %4143 = vmatmul.mubr.msk.f32.gmra.mrb[6].mxu1 %vm363_vm1, %v285_v52 }
  0x41   : > { %4145 = vmatprep.mubr.msk.f32.mxu1 %vm5208_vm0, %v7066_v1 }
  0x42   : > { %4111 = vmatmul.mubr.msk.f32.gmra.mrb[8].mxu0 %vm363_vm1, %v279_v55 }
  0x43   : > { %4679 = vmatpush3.bf16.xpose.msk.msra.mxu0 %vm5265_vm2, %v4677_v56  ;;  %4113 = vmatprep.mubr.msk.f32.mxu0 %vm5208_vm0, %v7066_v1 }
  0x44   : > { %4146 = vmatmul.mubr.msk.f32.gmra.mrb[8].mxu1 %vm363_vm1, %v286_v57  ;;  %4166 = vmatprep.subr.mxu0 %v7066_v1 }
  0x45   : > { %4691 = vmatpush3.bf16.xpose.msk.msra.mxu1 %vm5265_vm2, %v4689_v58  ;;  %4148 = vmatprep.mubr.msk.f32.mxu1 %vm5208_vm0, %v7066_v1 }
  0x46   : > { %4114 = vmatmul.mubr.msk.f32.gmra.mrb[10].mxu0 %vm363_vm1, %v280_v59  ;;  %4201 = vmatprep.subr.mxu1 %v7066_v1 }
  0x47   : > { %4116 = vmatprep.mubr.msk.f32.mxu0 %vm5208_vm0, %v7066_v1 }
  0x48   : > { %4149 = vmatmul.mubr.msk.f32.gmra.mrb[10].mxu1 %vm363_vm1, %v287_v60 }
  0x49   : > { %4151 = vmatprep.mubr.msk.f32.mxu1 %vm5208_vm0, %v7066_v1 }
  0x4a   : > { %4117 = vmatmul.mubr.msk.f32.gmra.mrb[12].mxu0 %vm363_vm1, %v5410_v61 }
  0x4b   : > { %4167 = vmatpush3.xpose.msk.msra.mxu0 %vm363_vm1, %v5414_v62  ;;  %4168 = vmatprep.mubr.msk.f32.mxu0 %vm5208_vm0, %v7066_v1 }
  0x4c   : > { %4152 = vmatmul.mubr.msk.f32.gmra.mrb[12].mxu1 %vm363_vm1, %v288_v63  ;;  %4692 = vmatprep.subr.bf16.mxu0 %v7068_v0 }
  0x4d   : > { %4202 = vmatpush3.xpose.msk.msra.mxu1 %vm363_vm1, %v330_v3  ;;  %4203 = vmatprep.mubr.msk.f32.mxu1 %vm5208_vm0, %v7066_v1 }
  0x4e   : > { %4169 = vmatmul.mubr.msk.f32.vlgmr.msra.gmra.mrb[14].mxu0 %vm363_vm1, %v5427_v4  ;;  %4701 = vmatprep.subr.bf16.mxu1 %v7068_v0 }
  0x4f   : > { %4171 = vmatprep.mubr.msk.f32.mxu0 %vm5208_vm0, %v7066_v1 }
  0x50   : > { %4204 = vmatmul.mubr.msk.f32.vlgmr.msra.gmra.mrb[14].mxu1 %vm363_vm1, %v296_v5 }
  0x51   : > { %4206 = vmatprep.mubr.msk.f32.mxu1 %vm5208_vm0, %v7066_v1 }
  0x52   : > { %4172 = vmatmul.mubr.msk.f32.gmra.mrb[16].mxu0 %vm363_vm1, %v5441_v6 }
  0x53   : > { %4174 = vmatprep.mubr.msk.f32.mxu0 %vm5208_vm0, %v7066_v1 }
  0x54   : > { %4207 = vmatmul.mubr.msk.f32.gmra.mrb[16].mxu1 %vm363_vm1, %v297_v7 }
  0x55   : > { %4209 = vmatprep.mubr.msk.f32.mxu1 %vm5208_vm0, %v7066_v1 }
  0x56   : > { %4175 = vmatmul.mubr.msk.f32.gmra.mrb[18].mxu0 %vm363_vm1, %v5452_v8 }
  0x57   : > { %4177 = vmatprep.mubr.msk.f32.mxu0 %vm5208_vm0, %v7066_v1 }
  0x58   : > { %4210 = vmatmul.mubr.msk.f32.gmra.mrb[18].mxu1 %vm363_vm1, %v298_v9 }
  0x59   : > { %4212 = vmatprep.mubr.msk.f32.mxu1 %vm5208_vm0, %v7066_v1 }
  0x5a   : > { %4178 = vmatmul.mubr.msk.f32.gmra.mrb[20].mxu0 %vm363_vm1, %v5463_v10 }
  0x5b   : > { %4180 = vmatprep.mubr.msk.f32.mxu0 %vm5208_vm0, %v7066_v1 }
  0x5c   : > { %4213 = vmatmul.mubr.msk.f32.gmra.mrb[20].mxu1 %vm363_vm1, %v299_v11 }
  0x5d   : > { %4215 = vmatprep.mubr.msk.f32.mxu1 %vm5208_vm0, %v7066_v1 }
  0x5e   : > { %4181 = vmatmul.mubr.msk.f32.gmra.mrb[22].mxu0 %vm363_vm1, %v5474_v12 }
  0x5f   : > { %4183 = vmatprep.mubr.msk.f32.mxu0 %vm5208_vm0, %v7066_v1 }
  0x60   : > { %4216 = vmatmul.mubr.msk.f32.gmra.mrb[22].mxu1 %vm363_vm1, %v300_v13 }
  0x61   : > { %4218 = vmatprep.mubr.msk.f32.mxu1 %vm5208_vm0, %v7066_v1 }
  0x62   : > { %4184 = vmatmul.mubr.msk.f32.gmra.mrb[24].mxu0 %vm363_vm1, %v5485_v14 }
  0x63   : > { %4186 = vmatprep.mubr.msk.f32.mxu0 %vm5208_vm0, %v7066_v1 }
  0x64   : > { %4219 = vmatmul.mubr.msk.f32.gmra.mrb[24].mxu1 %vm363_vm1, %v301_v15 }
  0x65   : > { %4221 = vmatprep.mubr.msk.f32.mxu1 %vm5208_vm0, %v7066_v1 }
  0x66   : > { %4187 = vmatmul.mubr.msk.f32.gmra.mrb[26].mxu0 %vm363_vm1, %v5496_v16 }
  0x67   : > { %4238 = vmatprep.mubr.msk.f32.mxu0 %vm5208_vm0, %v7066_v1 }
  0x68   : > { %4222 = vmatmul.mubr.msk.f32.gmra.mrb[26].mxu1 %vm363_vm1, %v302_v17 }
  0x69   : > { %4273 = vmatprep.mubr.msk.f32.mxu1 %vm5208_vm0, %v7066_v1 }
 0x105   : > { %v472_v28 = vpop.f32.mrb[0].mxu0 }
 0x106   : > { %v932_v30 = vmul.f32 0.25, %v472_v28  ;;  %v4100_v31 = vpop.f32.mrb[1].mxu0 }
 0x107   : > { %v614_v32 = vpop.f32.mrb[0].mxu1 }
 0x108   : > { %v939_v34 = vmul.f32 0.25, %v614_v32  ;;  %v4135_v35 = vpop.f32.mrb[1].mxu1  ;;  %v5533_v36 = vsel %vm5523_vm5, %v932_v30, -1e+30 }
 0x109   : > { %v477_v37 = vpop.f32.mrb[2].mxu0  ;;  %v1017_v38 = vsel %vm1016_vm6, %v5533_v36, -inf }
 0x10a   : > { %v933_v39 = vmul.f32 0.25, %v477_v37  ;;  %1018 = vmax.xlane.f32.xlu0 %v1017_v38  ;;  %v4103_v42 = vpop.f32.mrb[3].mxu0  ;;  %v5539_v43 = vsel %vm5527_vm7, %v939_v34, -1e+30 }
 0x10b   : > { %v619_v44 = vpop.f32.mrb[2].mxu1  ;;  %v1039_v46 = vsel %vm1016_vm6, %v5539_v43, -inf  ;;  %v966_v42 = vsel %vm962_vm8, 1, %v5211_v23 }
 0x10c   : > { %v940_v47 = vmul.f32 0.25, %v619_v44  ;;  %v4138_v48 = vpop.f32.mrb[3].mxu1  ;;  %v5545_v49 = vsel %vm5523_vm5, %v933_v39, -1e+30 }
 0x10d   : > { %v482_v50 = vpop.f32.mrb[4].mxu0  ;;  %v1020_v51 = vsel %vm1016_vm6, %v5545_v49, -inf }
 0x10e   : > { %v934_v52 = vmul.f32 0.25, %v482_v50  ;;  %1040 = vmax.xlane.f32.xlu0 %v1039_v46  ;;  %1021 = vmax.xlane.f32.xlu1 %v1020_v51  ;;  %v4106_v53 = vpop.f32.mrb[5].mxu0  ;;  %v5551_v54 = vsel %vm5527_vm7, %v940_v47, -1e+30  ;;  %v967_v51 = vsel %vm963_vm9, 1, %v5211_v23 }
 0x10f   : > { %v624_v55 = vpop.f32.mrb[4].mxu1  ;;  %v1042_v56 = vsel %vm1016_vm6, %v5551_v54, -inf  ;;  %v983_v23 = vrot.slane %v967_v51, %v5517_v22 }
 0x110   : > { %v941_v57 = vmul.f32 0.25, %v624_v55  ;;  %v4141_v58 = vpop.f32.mrb[5].mxu1  ;;  %v5557_v59 = vsel %vm5523_vm5, %v934_v52, -1e+30  ;;  %v979_v55 = vrot.slane %v966_v42, %v5517_v22 }
 0x111   : > { %v487_v60 = vpop.f32.mrb[6].mxu0  ;;  %v1023_v63 = vsel %vm1016_vm6, %v5557_v59, -inf  ;;  %vm5625_vm12 = vcmp.eq.s32.totalorder %v983_v23, 1 }
 0x112   : > { %v935_v3 = vmul.f32 0.25, %v487_v60  ;;  %1043 = vmax.xlane.f32.xlu1 %v1042_v56  ;;  %1024 = vmax.xlane.f32.xlu0 %v1023_v63  ;;  %v4109_v5 = vpop.f32.mrb[7].mxu0  ;;  %v5563_v7 = vsel %vm5527_vm7, %v941_v57, -1e+30  ;;  %vm5615_vm11 = vcmp.eq.s32.totalorder %v979_v55, 1 }
 0x113   : > { %v629_v9 = vpop.f32.mrb[6].mxu1  ;;  %v1045_v11 = vsel %vm1016_vm6, %v5563_v7, -inf }
 0x114   : > { %v942_v13 = vmul.f32 0.25, %v629_v9  ;;  %v4144_v15 = vpop.f32.mrb[7].mxu1  ;;  %v5569_v17 = vsel %vm5523_vm5, %v935_v3, -1e+30 }
 0x115   : > { %v492_v19 = vpop.f32.mrb[8].mxu0  ;;  %v1026_v20 = vsel %vm1016_vm6, %v5569_v17, -inf  ;;  %v7098_v15 = vmov 0 }
 0x116   : > { %v936_v21 = vmul.f32 0.25, %v492_v19  ;;  %1046 = vmax.xlane.f32.xlu1 %v1045_v11  ;;  %1027 = vmax.xlane.f32.xlu0 %v1026_v20  ;;  %v4112_v24 = vpop.f32.mrb[9].mxu0  ;;  %v5576_v25 = vsel %vm5527_vm7, %v942_v13, -1e+30  ;;  %v7099_v15 = vsel %vm5615_vm11, 4294967295, %v7098_v15 }
 0x117   : > { %v634_v27 = vpop.f32.mrb[8].mxu1  ;;  %v1048_v28 = vsel %vm1016_vm6, %v5576_v25, -inf  ;;  %7100 = vst [vmem:[#allocation4_spill] sm:$0xff] %v7099_v15  ;;  %v7101_v24 = vmov 0 }
 0x118   : > { %v943_v30 = vmul.f32 0.25, %v634_v27  ;;  %v4147_v31 = vpop.f32.mrb[9].mxu1  ;;  %v5583_v32 = vsel %vm5523_vm5, %v936_v21, -1e+30  ;;  %v7102_v24 = vsel %vm5625_vm12, 4294967295, %v7101_v24 }
 0x119   : > { %v497_v34 = vpop.f32.mrb[10].mxu0  ;;  %v1029_v35 = vsel %vm1016_vm6, %v5583_v32, -inf  ;;  %7103 = vst [vmem:[#allocation5_spill] sm:$0xff] %v7102_v24 }
 0x11a   : > { %v937_v37 = vmul.f32 0.25, %v497_v34  ;;  %1049 = vmax.xlane.f32.xlu1 %v1048_v28  ;;  %1030 = vmax.xlane.f32.xlu0 %v1029_v35  ;;  %v4115_v38 = vpop.f32.mrb[11].mxu0  ;;  %v5589_v39 = vsel %vm5527_vm7, %v943_v30, -1e+30 }
 0x11b   : > { %v639_v44 = vpop.f32.mrb[10].mxu1  ;;  %v1051_v46 = vsel %vm1016_vm6, %v5589_v39, -inf }
 0x11c   : > { %v944_v47 = vmul.f32 0.25, %v639_v44  ;;  %v4150_v48 = vpop.f32.mrb[11].mxu1  ;;  %v5596_v50 = vsel %vm5523_vm5, %v937_v37, -1e+30 }
 0x11d   : > { %v502_v52 = vpop.f32.mrb[12].mxu0  ;;  %v1032_v53 = vsel %vm1016_vm6, %v5596_v50, -inf }
 0x11e   : > { %v938_v56 = vmul.f32 0.25, %v502_v52  ;;  %1052 = vmax.xlane.f32.xlu1 %v1051_v46  ;;  %1033 = vmax.xlane.f32.xlu0 %v1032_v53  ;;  %v4118_v57 = vpop.f32.mrb[13].mxu0  ;;  %v5604_v58 = vsel %vm5527_vm7, %v944_v47, -1e+30 }
 0x11f   : > { %v644_v60 = vpop.f32.mrb[12].mxu1  ;;  %v1054_v63 = vsel %vm1016_vm6, %v5604_v58, -inf }
 0x120   : > { %v945_v3 = vmul.f32 0.25, %v644_v60  ;;  %v4153_v5 = vpop.f32.mrb[13].mxu1  ;;  %v5611_v9 = vsel %vm5523_vm5, %v938_v56, -1e+30 }
 0x121   : > { %v756_v11 = vpop.f32.mrb[14].mxu0  ;;  %v1036_v13 = vsel %vm1035_vm10, %v5611_v9, -inf }
 0x122   : > { %v946_v18 = vmul.f32 0.25, %v756_v11  ;;  %1055 = vmax.xlane.f32.xlu1 %v1054_v63  ;;  %1037 = vmax.xlane.f32.xlu0 %v1036_v13  ;;  %v4170_v19 = vpop.f32.mrb[15].mxu0  ;;  %v5621_v22 = vsel %vm5527_vm7, %v945_v3, -1e+30 }
 0x123   : > { %v898_v20 = vpop.f32.mrb[14].mxu1  ;;  %v1057_v21 = vsel %vm1035_vm10, %v5621_v22, -inf }
 0x124   : > { %v953_v26 = vmul.f32 0.25, %v898_v20  ;;  %v4205_v27 = vpop.f32.mrb[15].mxu1  ;;  %v5631_v28 = vsel %vm5615_vm11, %v946_v18, -1e+30 }
 0x125   : > { %v761_v30 = vpop.f32.mrb[16].mxu0  ;;  %v1060_v31 = vsel %vm1016_vm6, %v5631_v28, -inf }
 0x126   : > { %v947_v34 = vmul.f32 0.25, %v761_v30  ;;  %1058 = vmax.xlane.f32.xlu1 %v1057_v21  ;;  %1061 = vmax.xlane.f32.xlu0 %v1060_v31  ;;  %v4173_v35 = vpop.f32.mrb[17].mxu0  ;;  %v5637_v37 = vsel %vm5625_vm12, %v953_v26, -1e+30 }
 0x127   : > { %v903_v38 = vpop.f32.mrb[16].mxu1  ;;  %v1081_v42 = vsel %vm1016_vm6, %v5637_v37, -inf }
 0x128   : > { %v954_v44 = vmul.f32 0.25, %v903_v38  ;;  %v4208_v46 = vpop.f32.mrb[17].mxu1  ;;  %v5643_v47 = vsel %vm5615_vm11, %v947_v34, -1e+30 }
 0x129   : > { %v766_v48 = vpop.f32.mrb[18].mxu0  ;;  %v1063_v51 = vsel %vm1016_vm6, %v5643_v47, -inf }
 0x12a   : > { %v948_v52 = vmul.f32 0.25, %v766_v48  ;;  %1082 = vmax.xlane.f32.xlu1 %v1081_v42  ;;  %1064 = vmax.xlane.f32.xlu0 %v1063_v51  ;;  %v4176_v53 = vpop.f32.mrb[19].mxu0  ;;  %v5649_v55 = vsel %vm5625_vm12, %v954_v44, -1e+30 }
 0x12b   : > { %v908_v56 = vpop.f32.mrb[18].mxu1  ;;  %v1084_v57 = vsel %vm1016_vm6, %v5649_v55, -inf }
 0x12c   : > { %v955_v60 = vmul.f32 0.25, %v908_v56  ;;  %v4211_v63 = vpop.f32.mrb[19].mxu1  ;;  %v5655_v23 = vsel %vm5615_vm11, %v948_v52, -1e+30 }
 0x12d   : > { %v771_v3 = vpop.f32.mrb[20].mxu0  ;;  %v1066_v5 = vsel %vm1016_vm6, %v5655_v23, -inf }
 0x12e   : > { %v949_v11 = vmul.f32 0.25, %v771_v3  ;;  %1085 = vmax.xlane.f32.xlu1 %v1084_v57  ;;  %1067 = vmax.xlane.f32.xlu0 %v1066_v5  ;;  %v4179_v13 = vpop.f32.mrb[21].mxu0  ;;  %v5661_v18 = vsel %vm5625_vm12, %v955_v60, -1e+30 }
 0x12f   : > { %v913_v19 = vpop.f32.mrb[20].mxu1  ;;  %v1087_v20 = vsel %vm1016_vm6, %v5661_v18, -inf }
 0x130   : > { %v956_v21 = vmul.f32 0.25, %v913_v19  ;;  %v4214_v26 = vpop.f32.mrb[21].mxu1  ;;  %v5667_v27 = vsel %vm5615_vm11, %v949_v11, -1e+30 }
 0x131   : > { %v776_v30 = vpop.f32.mrb[22].mxu0  ;;  %v1069_v31 = vsel %vm1016_vm6, %v5667_v27, -inf }
 0x132   : > { %v950_v34 = vmul.f32 0.25, %v776_v30  ;;  %1088 = vmax.xlane.f32.xlu1 %v1087_v20  ;;  %1070 = vmax.xlane.f32.xlu0 %v1069_v31  ;;  %v4182_v35 = vpop.f32.mrb[23].mxu0  ;;  %v5673_v38 = vsel %vm5625_vm12, %v956_v21, -1e+30 }
 0x133   : > { %v918_v42 = vpop.f32.mrb[22].mxu1  ;;  %v1090_v44 = vsel %vm1016_vm6, %v5673_v38, -inf }
 0x134   : > { %v957_v46 = vmul.f32 0.25, %v918_v42  ;;  %v4217_v48 = vpop.f32.mrb[23].mxu1  ;;  %v5679_v51 = vsel %vm5615_vm11, %v950_v34, -1e+30 }
 0x135   : > { %v781_v52 = vpop.f32.mrb[24].mxu0  ;;  %v1072_v53 = vsel %vm1016_vm6, %v5679_v51, -inf }
 0x136   : > { %v951_v56 = vmul.f32 0.25, %v781_v52  ;;  %1091 = vmax.xlane.f32.xlu1 %v1090_v44  ;;  %1073 = vmax.xlane.f32.xlu0 %v1072_v53  ;;  %v4185_v57 = vpop.f32.mrb[25].mxu0  ;;  %v5685_v60 = vsel %vm5625_vm12, %v957_v46, -1e+30  ;;  %v4867_v46 = vpack.i.bf16 %v5342_v41, %v5339_v40  ;;  %v5712_v52 = vpop.permute.xlu1 %4833 }
 0x137   : > { %v923_v63 = vpop.f32.mrb[24].mxu1  ;;  %v1093_v3 = vsel %vm1016_vm6, %v5685_v60, -inf }
 0x138   : > { %v958_v5 = vmul.f32 0.25, %v923_v63  ;;  %v4220_v11 = vpop.f32.mrb[25].mxu1  ;;  %v5691_v13 = vsel %vm5615_vm11, %v951_v56, -1e+30  ;;  %v5722_v63 = vpop.permute.xlu0 %4828 }
 0x139   : > { %v786_v19 = vpop.f32.mrb[26].mxu0  ;;  %v1075_v20 = vsel %vm1016_vm6, %v5691_v13, -inf }
 0x13a   : > { %v952_v21 = vmul.f32 0.25, %v786_v19  ;;  %1094 = vmax.xlane.f32.xlu1 %v1093_v3  ;;  %1076 = vmax.xlane.f32.xlu0 %v1075_v20  ;;  %v5697_v26 = vsel %vm5625_vm12, %v958_v5, -1e+30  ;;  %v4188_v30 = vpop.f32.mrb[27].mxu0  ;;  %v5720_v57 = vpop.permute.xlu1 %4838 }
 0x13b   : > { %v1096_v31 = vsel %vm1016_vm6, %v5697_v26, -inf  ;;  %v928_v34 = vpop.f32.mrb[26].mxu1 }
 0x13c   : > { %v5703_v35 = vsel %vm5615_vm11, %v952_v21, -1e+30  ;;  %v4223_v42 = vpop.f32.mrb[27].mxu1  ;;  %v959_v48 = vmul.f32 0.25, %v928_v34  ;;  %v5726_v40 = vpop.permute.xlu0 %4848 }
 0x13d   : > { %v1078_v44 = vsel %vm1035_vm10, %v5703_v35, -inf }
 0x13e   : > { %1097 = vmax.xlane.f32.xlu1 %v1096_v31  ;;  %1079 = vmax.xlane.f32.xlu0 %v1078_v44  ;;  %v5716_v53 = vsel %vm5625_vm12, %v959_v48, -1e+30 }
 0x13f   : > { %v1099_v56 = vsel %vm1035_vm10, %v5716_v53, -inf }
 0x140   : > { %v5730_v3 = vpop.permute.xlu0 %1849 }
 0x144   : > { %v5734_v11 = vpop.permute.xlu0 %4858 }
 0x148   : > { %v5738_v20 = vpop.permute.xlu0 %4863 }
 0x149   : > { %7104 = vst [vmem:[#allocation6_spill] sm:$0xff] %v5738_v20 }
 0x14c   : > { %v5742_v30 = vpop.permute.xlu0 %1825 }
 0x14f   : > { %1827 = vrot.lane.b32.xlu1 %v5356_v45, %s5210_s22  ;;  %v5724_v45 = vpop.permute.xlu1 %4843 }
 0x153   : > { %v5728_v41 = vpop.permute.xlu1 %4853 }
 0x154   : > { %4868 = vrot.lane.b32.xlu0 %v4867_v46, %s5210_s22 }
 0x157   : > { %v5732_v5 = vpop.permute.xlu1 %2005 }
 0x15b   : > { %v5736_v19 = vpop.permute.xlu1 %1823 }
 0x15f   : > { %v5740_v21 = vpop.permute.xlu1 %1979 }
 0x160   : > { %7105 = vst [vmem:[#allocation7_spill] sm:$0xff] %v5740_v21 }
 0x163   : > { %v5744_v31 = vpop.permute.xlu1 %1981 }
 0x164   : > { %7106 = vst [vmem:[#allocation8_spill] sm:$0xff] %v5744_v31 }
 0x173   : > { %1100 = vmax.xlane.f32.xlu1 %v1099_v56 }
 0x197   : > { %v1019_v34 = vpop.xlane.xlu0 %1018 }
 0x198   : > { %v1102_v42 = vsub.f32 %v5533_v36, %v1019_v34 }
 0x19a   : > { %v1130_v44 = vmul.f32 1.442695, %v1102_v42 }
 0x19b   : > { %v1041_v46 = vpop.xlane.xlu0 %1040  ;;  %v1022_v48 = vpop.xlane.xlu1 %1021 }
 0x19c   : > { %4947 = vpow2.f32 %v1130_v44  ;;  %v1109_v56 = vsub.f32 %v5539_v43, %v1041_v46  ;;  %v1103_v1 = vsub.f32 %v5545_v49, %v1022_v48 }
 0x19e   : > { %v1144_v0 = vmul.f32 1.442695, %v1109_v56  ;;  %v1132_v24 = vmul.f32 1.442695, %v1103_v1 }
 0x19f   : > { %v1044_v15 = vpop.xlane.xlu1 %1043  ;;  %v1025_v33 = vpop.xlane.xlu0 %1024 }
 0x1a0   : > { %4949 = vpow2.f32 %v1144_v0  ;;  %v1110_v29 = vsub.f32 %v5551_v54, %v1044_v15  ;;  %v1104_v31 = vsub.f32 %v5557_v59, %v1025_v33 }
 0x1a1   : > { %4951 = vpow2.f32 %v1132_v24 }
 0x1a2   : > { %v1146_v21 = vmul.f32 1.442695, %v1110_v29  ;;  %v1134_v36 = vmul.f32 1.442695, %v1104_v31 }
 0x1a3   : > { %v1047_v34 = vpop.xlane.xlu1 %1046  ;;  %v1028_v42 = vpop.xlane.xlu0 %1027 }
 0x1a4   : > { %4953 = vpow2.f32 %v1146_v21  ;;  %v1111_v44 = vsub.f32 %v5563_v7, %v1047_v34  ;;  %v1105_v43 = vsub.f32 %v5569_v17, %v1028_v42 }
 0x1a5   : > { %4955 = vpow2.f32 %v1134_v36 }
 0x1a6   : > { %v5753_v49 = vpop.eup %4947  ;;  %v1148_v1 = vmul.f32 1.442695, %v1111_v44  ;;  %v1136_v46 = vmul.f32 1.442695, %v1105_v43 }
 0x1a7   : > { %v1050_v0 = vpop.xlane.xlu1 %1049  ;;  %v1031_v48 = vpop.xlane.xlu0 %1030  ;;  %v1186_v33 = vsel %vm1016_vm6, %v5753_v49, 0.0 }
 0x1a8   : > { %4957 = vpow2.f32 %v1148_v1  ;;  %v1112_v29 = vsub.f32 %v5576_v25, %v1050_v0  ;;  %v1106_v54 = vsub.f32 %v5583_v32, %v1031_v48  ;;  %1187 = vadd.xlane.f32.xlu0 %v1186_v33 }
 0x1a9   : > { %4959 = vpow2.f32 %v1136_v46 }
 0x1aa   : > { %v5759_v59 = vpop.eup %4949  ;;  %v1150_v7 = vmul.f32 1.442695, %v1112_v29  ;;  %v1138_v17 = vmul.f32 1.442695, %v1106_v54 }
 0x1ab   : > { %v5761_v15 = vpop.eup %4951  ;;  %v1053_v24 = vpop.xlane.xlu1 %1052  ;;  %v1207_v31 = vsel %vm1016_vm6, %v5759_v59, 0.0 }
 0x1ac   : > { %v1034_v21 = vpop.xlane.xlu0 %1033  ;;  %4961 = vpow2.f32 %v1150_v7  ;;  %v1113_v56 = vsub.f32 %v5589_v39, %v1053_v24  ;;  %1208 = vadd.xlane.f32.xlu1 %v1207_v31  ;;  %v1189_v32 = vsel %vm1016_vm6, %v5761_v15, 0.0  ;;  %v331_v31 = vld [vmem:[%s5789_s5] sm:$0xff] }
 0x1ad   : > { %v1107_v25 = vsub.f32 %v5596_v50, %v1034_v21  ;;  %4963 = vpow2.f32 %v1138_v17  ;;  %1190 = vadd.xlane.f32.xlu0 %v1189_v32 }
 0x1ae   : > { %v5769_v36 = vpop.eup %4953  ;;  %v1152_v34 = vmul.f32 1.442695, %v1113_v56  ;;  %v332_v56 = vld [vmem:[%s5789_s5 + $0x8] sm:$0xff] }
 0x1af   : > { %v1140_v42 = vmul.f32 1.442695, %v1107_v25  ;;  %v5771_v44 = vpop.eup %4955  ;;  %v1056_v43 = vpop.xlane.xlu1 %1055  ;;  %v1210_v39 = vsel %vm1016_vm6, %v5769_v36, 0.0  ;;  %v4693_v25 = vpack.c.bf16 %v332_v56, %v331_v31 }
 0x1b0   : > { %v1038_v1 = vpop.xlane.xlu0 %1037  ;;  %4965 = vpow2.f32 %v1152_v34  ;;  %v1114_v50 = vsub.f32 %v5604_v58, %v1056_v43  ;;  %1211 = vadd.xlane.f32.xlu1 %v1210_v39  ;;  %v1192_v0 = vsel %vm1016_vm6, %v5771_v44, 0.0 }
 0x1b1   : > { %v1108_v46 = vsub.f32 %v5611_v9, %v1038_v1  ;;  %4967 = vpow2.f32 %v1140_v42  ;;  %1193 = vadd.xlane.f32.xlu0 %v1192_v0  ;;  %4694 = vmatpush3.bf16.msra.mxu0 %v4693_v25  ;;  %v7107_v0 = vmov 0.0|0.0  }
 0x1b2   : > { %v5779_v48 = vpop.eup %4957  ;;  %v1154_v33 = vmul.f32 1.442695, %v1114_v50  ;;  %4695 = vmatprep.subr.bf16.mxu0 %v7107_v0 }
 0x1b3   : > { %v1142_v29 = vmul.f32 1.442695, %v1108_v46  ;;  %v5781_v54 = vpop.eup %4959  ;;  %v1059_v7 = vpop.xlane.xlu1 %1058  ;;  %v1213_v24 = vsel %vm1016_vm6, %v5779_v48, 0.0 }
 0x1b4   : > { %v1062_v17 = vpop.xlane.xlu0 %1061  ;;  %4969 = vpow2.f32 %v1154_v33  ;;  %v1115_v58 = vsub.f32 %v5621_v22, %v1059_v7  ;;  %1214 = vadd.xlane.f32.xlu1 %v1213_v24  ;;  %v1195_v21 = vsel %vm1016_vm6, %v5781_v54, 0.0  ;;  %v5809_v33 = vld [vmem:[%s5789_s5 + $0x10] sm:$0xff]  ;;  %v5815_v7 = vld [vmem:[%s5789_s5 + $0x38] sm:$0xff] }
 0x1b5   : > { %v1116_v9 = vsub.f32 %v5631_v28, %v1062_v17  ;;  %4971 = vpow2.f32 %v1142_v29  ;;  %1196 = vadd.xlane.f32.xlu0 %v1195_v21  ;;  %7108 = vst [vmem:[#allocation9_spill] sm:$0xff] %v5809_v33  ;;  %v5812_v29 = vld [vmem:[%s5789_s5 + $0x18] sm:$0xff] }
 0x1b6   : > { %v5797_v32 = vpop.eup %4961  ;;  %v1156_v34 = vmul.f32 1.442695, %v1115_v58  ;;  %7109 = vst [vmem:[#allocation10_spill] sm:$0xff] %v5812_v29  ;;  %v4696_v17 = vpack.c.bf16 %v5812_v29, %v5809_v33  ;;  %v5177_v29 = vld [vmem:[%s5261_s21 + $0xc8] sm:$0xff]  ;;  %v5178_v33 = vld [vmem:[%s5261_s21 + $0xd0] sm:$0xff] }
 0x1b7   : > { %v1158_v42 = vmul.f32 1.442695, %v1116_v9  ;;  %v5799_v43 = vpop.eup %4963  ;;  %v1083_v22 = vpop.xlane.xlu1 %1082  ;;  %v1216_v1 = vsel %vm1016_vm6, %v5797_v32, 0.0 }
 0x1b8   : > { %v1065_v28 = vpop.xlane.xlu0 %1064  ;;  %4973 = vpow2.f32 %v1156_v34  ;;  %v1123_v39 = vsub.f32 %v5637_v37, %v1083_v22  ;;  %1217 = vadd.xlane.f32.xlu1 %v1216_v1  ;;  %v1198_v46 = vsel %vm1016_vm6, %v5799_v43, 0.0  ;;  %v5820_v37 = vld [vmem:[%s5789_s5 + $0x40] sm:$0xff]  ;;  %4697 = vmatpush3.bf16.msra.mxu0 %v4696_v17  ;;  %v5838_v1 = vld [vmem:[%s5789_s5 + $0x28] sm:$0xff] }
 0x1b9   : > { %v1117_v50 = vsub.f32 %v5643_v47, %v1065_v28  ;;  %4975 = vpow2.f32 %v1158_v42  ;;  %1199 = vadd.xlane.f32.xlu0 %v1198_v46  ;;  %7110 = vst [vmem:[#allocation11_spill] sm:$0xff] %v5820_v37  ;;  %v4702_v9 = vpack.c.bf16 %v5820_v37, %v5815_v7  ;;  %v5835_v28 = vld [vmem:[%s5789_s5 + $0x20] sm:$0xff]  ;;  %7112 = vst [vmem:[#allocation13_spill] sm:$0xff] %v5838_v1  ;;  %4698 = vmatprep.subr.bf16.mxu0 %v7107_v0 }
 0x1ba   : > { %v5822_v47 = vpop.eup %4965  ;;  %v1172_v24 = vmul.f32 1.442695, %v1123_v39  ;;  %7111 = vst [vmem:[#allocation12_spill] sm:$0xff] %v5835_v28  ;;  %v5841_v39 = vld [vmem:[%s5789_s5 + $0x48] sm:$0xff] }
 0x1bb   : > { %v1160_v58 = vmul.f32 1.442695, %v1117_v50  ;;  %v5826_v21 = vpop.eup %4967  ;;  %v1086_v31 = vpop.xlane.xlu1 %1085  ;;  %v1219_v25 = vsel %vm1016_vm6, %v5822_v47, 0.0  ;;  %4703 = vmatpush3.bf16.msra.mxu1 %v4702_v9  ;;  %7113 = vst [vmem:[#allocation14_spill] sm:$0xff] %v5841_v39  ;;  %v5847_v50 = vld [vmem:[%s5789_s5 + $0x50] sm:$0xff] }
 0x1bc   : > { %v1068_v56 = vpop.xlane.xlu0 %1067  ;;  %4977 = vpow2.f32 %v1172_v24  ;;  %v1124_v34 = vsub.f32 %v5649_v55, %v1086_v31  ;;  %1220 = vadd.xlane.f32.xlu1 %v1219_v25  ;;  %v1201_v22 = vsel %vm1016_vm6, %v5826_v21, 0.0  ;;  %v4699_v55 = vpack.c.bf16 %v5838_v1, %v5835_v28  ;;  %7114 = vst [vmem:[#allocation15_spill] sm:$0xff] %v5847_v50  ;;  %4704 = vmatprep.subr.bf16.mxu1 %v7107_v0  ;;  %v5175_v1 = vld [vmem:[%s5261_s21 + $0x90] sm:$0xff]  ;;  %v5176_v28 = vld [vmem:[%s5261_s21 + $0x98] sm:$0xff] }
 0x1bd   : > { %v1118_v42 = vsub.f32 %v5655_v23, %v1068_v56  ;;  %4979 = vpow2.f32 %v1160_v58  ;;  %1202 = vadd.xlane.f32.xlu0 %v1201_v22  ;;  %v4705_v24 = vpack.c.bf16 %v5847_v50, %v5841_v39  ;;  %v5863_v22 = vld [vmem:[%s5789_s5 + $0x58] sm:$0xff]  ;;  %v5866_v50 = vld [vmem:[%s5789_s5 + $0x60] sm:$0xff]  ;;  %v7117_v39 = vmov 0.0  }
 0x1be   : > { %v5849_v23 = vpop.eup %4969  ;;  %v1174_v46 = vmul.f32 1.442695, %v1124_v34  ;;  %4700 = vmatpush3.bf16.msra.mxu0 %v4699_v55  ;;  %7115 = vst [vmem:[#allocation16_spill] sm:$0xff] %v5863_v22  ;;  %7116 = vst [vmem:[#allocation17_spill] sm:$0xff] %v5866_v50  ;;  %v4708_v55 = vpack.c.bf16 %v5866_v50, %v5863_v22 }
 0x1bf   : > { %v1162_v17 = vmul.f32 1.442695, %v1118_v42  ;;  %v5854_v58 = vpop.eup %4971  ;;  %v1089_v9 = vpop.xlane.xlu1 %1088  ;;  %v1222_v56 = vsel %vm1016_vm6, %v5849_v23, 0.0  ;;  %4706 = vmatpush3.bf16.msra.mxu1 %v4705_v24  ;;  %4236 = vmatprep.subr.mxu0 %v7117_v39 }
 0x1c0   : > { %v1071_v31 = vpop.xlane.xlu0 %1070  ;;  %4981 = vpow2.f32 %v1174_v46  ;;  %v1125_v25 = vsub.f32 %v5661_v18, %v1089_v9  ;;  %1223 = vadd.xlane.f32.xlu1 %v1222_v56  ;;  %v1204_v42 = vsel %vm1035_vm10, %v5854_v58, 0.0  ;;  %4707 = vmatprep.subr.bf16.mxu1 %v7107_v0  ;;  %v5875_v9 = vld [vmem:[%s5789_s5 + $0x30] sm:$0x3] }
 0x1c1   : > { %v1119_v34 = vsub.f32 %v5667_v27, %v1071_v31  ;;  %4983 = vpow2.f32 %v1162_v17  ;;  %1205 = vadd.xlane.f32.xlu0 %v1204_v42  ;;  %7118 = vst [vmem:[#allocation18_spill] sm:$0xff] %v5875_v9 }
 0x1c2   : > { %v5871_v46 = vpop.eup %4973  ;;  %v1176_v18 = vmul.f32 1.442695, %v1125_v25  ;;  %4237 = vmatpush3.msk.msra.mxu0 %vm1347_vm13, %v5875_v9 }
 0x1c3   : > { %v1164_v27 = vmul.f32 1.442695, %v1119_v34  ;;  %v5877_v24 = vpop.eup %4975  ;;  %v1092_v31 = vpop.xlane.xlu1 %1091  ;;  %v1225_v17 = vsel %vm1035_vm10, %v5871_v46, 0.0  ;;  %4709 = vmatpush3.bf16.msra.mxu1 %v4708_v55  ;;  %4710 = vmatprep.subr.bf16.mxu0 %v7107_v0 }
 0x1c4   : > { %v1074_v56 = vpop.xlane.xlu0 %1073  ;;  %4985 = vpow2.f32 %v1176_v18  ;;  %v1126_v42 = vsub.f32 %v5673_v38, %v1092_v31  ;;  %1226 = vadd.xlane.f32.xlu1 %v1225_v17  ;;  %v1228_v25 = vsel %vm1016_vm6, %v5877_v24, 0.0  ;;  %4271 = vmatprep.subr.mxu1 %v7117_v39  ;;  %v5891_v18 = vld [vmem:[%s5789_s5 + $0x68] sm:$0x3] }
 0x1c5   : > { %v1120_v20 = vsub.f32 %v5679_v51, %v1074_v56  ;;  %4987 = vpow2.f32 %v1164_v27  ;;  %1229 = vadd.xlane.f32.xlu0 %v1228_v25  ;;  %7119 = vst [vmem:[#allocation19_spill] sm:$0xff] %v5891_v18 }
 0x1c6   : > { %v5887_v34 = vpop.eup %4977  ;;  %v1178_v50 = vmul.f32 1.442695, %v1126_v42 }
 0x1c7   : > { %v1166_v22 = vmul.f32 1.442695, %v1120_v20  ;;  %v5894_v38 = vpop.eup %4979  ;;  %v1095_v51 = vpop.xlane.xlu1 %1094  ;;  %v1249_v56 = vsel %vm1016_vm6, %v5887_v34, 0.0  ;;  %4272 = vmatpush3.msk.msra.mxu1 %vm1347_vm13, %v5891_v18 }
 0x1c8   : > { %v1077_v31 = vpop.xlane.xlu0 %1076  ;;  %4989 = vpow2.f32 %v1178_v50  ;;  %v1127_v55 = vsub.f32 %v5685_v60, %v1095_v51  ;;  %1250 = vadd.xlane.f32.xlu1 %v1249_v56  ;;  %v1231_v20 = vsel %vm1016_vm6, %v5894_v38, 0.0  ;;  %4719 = vmatprep.subr.bf16.mxu1 %v7107_v0 }
 0x1c9   : > { %v1121_v27 = vsub.f32 %v5691_v13, %v1077_v31  ;;  %4991 = vpow2.f32 %v1166_v22  ;;  %1232 = vadd.xlane.f32.xlu0 %v1231_v20 }
 0x1ca   : > { %v5904_v17 = vpop.eup %4981  ;;  %v1180_v42 = vmul.f32 1.442695, %v1127_v55 }
 0x1cb   : > { %v1168_v25 = vmul.f32 1.442695, %v1121_v27  ;;  %v5907_v50 = vpop.eup %4983  ;;  %v1098_v60 = vpop.xlane.xlu1 %1097  ;;  %v1252_v13 = vsel %vm1016_vm6, %v5904_v17, 0.0 }
 0x1cc   : > { %v1080_v51 = vpop.xlane.xlu0 %1079  ;;  %4993 = vpow2.f32 %v1180_v42  ;;  %v1128_v22 = vsub.f32 %v5697_v26, %v1098_v60  ;;  %1253 = vadd.xlane.f32.xlu1 %v1252_v13  ;;  %v1234_v56 = vsel %vm1016_vm6, %v5907_v50, 0.0 }
 0x1cd   : > { %v1122_v31 = vsub.f32 %v5703_v35, %v1080_v51  ;;  %4995 = vpow2.f32 %v1168_v25  ;;  %1235 = vadd.xlane.f32.xlu0 %v1234_v56 }
 0x1ce   : > { %v5915_v55 = vpop.eup %4985  ;;  %v1182_v27 = vmul.f32 1.442695, %v1128_v22 }
 0x1cf   : > { %v1170_v20 = vmul.f32 1.442695, %v1122_v31  ;;  %v5917_v9 = vpop.eup %4987  ;;  %v1255_v18 = vsel %vm1016_vm6, %v5915_v55, 0.0  ;;  %v5959_v37 = vpop.permute.xlu1 %1827 }
 0x1d0   : > { %4997 = vpow2.f32 %v1182_v27  ;;  %1256 = vadd.xlane.f32.xlu1 %v1255_v18  ;;  %v1237_v26 = vsel %vm1016_vm6, %v5917_v9, 0.0 }
 0x1d1   : > { %4999 = vpow2.f32 %v1170_v20  ;;  %1238 = vadd.xlane.f32.xlu0 %v1237_v26  ;;  %v5171_v26 = vld [vmem:[%s5318_s25 + $0x48] sm:$0xff] }
 0x1d2   : > { %v5923_v35 = vpop.eup %4989 }
 0x1d3   : > { %v5925_v42 = vpop.eup %4991  ;;  %v1258_v25 = vsel %vm1016_vm6, %v5923_v35, 0.0 }
 0x1d4   : > { %1259 = vadd.xlane.f32.xlu1 %v1258_v25  ;;  %v1240_v60 = vsel %vm1016_vm6, %v5925_v42, 0.0  ;;  %v5172_v25 = vld [vmem:[%s5261_s21 + $0xb8] sm:$0xff] }
 0x1d5   : > { %1241 = vadd.xlane.f32.xlu0 %v1240_v60  ;;  %v5173_v60 = vld [vmem:[%s5261_s21 + $0xc0] sm:$0xff] }
 0x1d6   : > { %v5931_v18 = vpop.eup %4993 }
 0x1d7   : > { %v5933_v51 = vpop.eup %4995  ;;  %v1261_v13 = vsel %vm1016_vm6, %v5931_v18, 0.0 }
 0x1d8   : > { %1262 = vadd.xlane.f32.xlu1 %v1261_v13  ;;  %v1243_v22 = vsel %vm1016_vm6, %v5933_v51, 0.0  ;;  %v4872_v13 = vpack.i.bf16 %v5173_v60, %v5172_v25 }
 0x1d9   : > { %1244 = vadd.xlane.f32.xlu0 %v1243_v22  ;;  %v5174_v22 = vld [vmem:[%s5318_s25 + $0x18] sm:$0xff] }
 0x1da   : > { %v5939_v31 = vpop.eup %4997 }
 0x1db   : > { %v5941_v56 = vpop.eup %4999  ;;  %v1264_v27 = vsel %vm1016_vm6, %v5939_v31, 0.0 }
 0x1dc   : > { %1265 = vadd.xlane.f32.xlu1 %v1264_v27  ;;  %v1246_v20 = vsel %vm1035_vm10, %v5941_v56, 0.0  ;;  %v4877_v27 = vpack.i.bf16 %v5176_v28, %v5175_v1  ;;  %v5186_v28 = vld [vmem:[%s5318_s25 + $0xa8] sm:$0xff] }
 0x1dd   : > { %1247 = vadd.xlane.f32.xlu0 %v1246_v20  ;;  %v4882_v20 = vpack.i.bf16 %v5178_v33, %v5177_v29 }
 0x1ed   : > { %1983 = vrot.lane.b32.xlu1 %v5171_v26, %s5210_s22 }
 0x1f3   : > { %4873 = vrot.lane.b32.xlu0 %v4872_v13, %s5210_s22  ;;  %v5179_v13 = vld [vmem:[%s5318_s25 + $0x28] sm:$0xff] }
 0x1f7   : > { %1829 = vrot.lane.b32.xlu0 %v5174_v22, %s5210_s22  ;;  %v6004_v22 = vld [vmem:[%s5789_s5 + $0x70] sm:$0xff] }
 0x1fb   : > { %4878 = vrot.lane.b32.xlu0 %v4877_v27, %s5210_s22  ;;  %v6007_v27 = vld [vmem:[%s5789_s5 + $0x78] sm:$0xff] }
 0x1ff   : > { %4883 = vrot.lane.b32.xlu0 %v4882_v20, %s5210_s22 }
 0x200   : > { %v1101_v26 = vpop.xlane.xlu1 %1100 }
 0x201   : > { %v1129_v25 = vsub.f32 %v5716_v53, %v1101_v26  ;;  %v5187_v26 = vld [vmem:[%s5318_s25 + $0xb0] sm:$0xff] }
 0x203   : > { %v1184_v60 = vmul.f32 1.442695, %v1129_v25  ;;  %1833 = vrot.lane.b32.xlu0 %v5179_v13, %s5210_s22 }
 0x205   : > { %5001 = vpow2.f32 %v1184_v60  ;;  %v4711_v60 = vpack.c.bf16 %v6007_v27, %v6004_v22 }
 0x207   : > { %1835 = vrot.lane.b32.xlu0 %v5410_v61, %s5210_s22  ;;  %v5180_v61 = vld [vmem:[%s5318_s25 + $0x50] sm:$0xff] }
 0x20b   : > { %2161 = vrot.lane.b32.xlu0 %v5414_v62, %s5210_s22  ;;  %v5181_v62 = vld [vmem:[%s5318_s25 + $0x20] sm:$0xff] }
 0x20f   : > { %v5969_v33 = vpop.eup %5001  ;;  %2135 = vrot.lane.b32.xlu0 %v5427_v4, %s5210_s22  ;;  %v5182_v4 = vld [vmem:[%s5318_s25 + $0x58] sm:$0xff] }
 0x210   : > { %v1267_v53 = vsel %vm1035_vm10, %v5969_v33, 0.0 }
 0x211   : > { %1268 = vadd.xlane.f32.xlu1 %v1267_v53 }
 0x213   : > { %2137 = vrot.lane.b32.xlu0 %v5441_v6, %s5210_s22  ;;  %v5183_v6 = vld [vmem:[%s5318_s25 + $0x60] sm:$0xff] }
 0x217   : > { %2139 = vrot.lane.b32.xlu0 %v5452_v8, %s5210_s22  ;;  %v5995_v8 = vpop.permute.xlu0 %4868 }
 0x21b   : > { %2141 = vrot.lane.b32.xlu0 %v5463_v10, %s5210_s22  ;;  %v5184_v10 = vld [vmem:[%s5318_s25 + $0x68] sm:$0x3] }
 0x21f   : > { %2143 = vrot.lane.b32.xlu0 %v5474_v12, %s5210_s22 }
 0x222   : > { %1985 = vrot.lane.b32.xlu1 %v5180_v61, %s5210_s22 }
 0x223   : > { %2145 = vrot.lane.b32.xlu0 %v5485_v14, %s5210_s22  ;;  %v5185_v14 = vld [vmem:[%s5261_s21 + $0xd8] sm:$0x3] }
 0x226   : > { %1831 = vrot.lane.b32.xlu1 %v5181_v62, %s5210_s22  ;;  %v6015_v62 = vld [vmem:[%s5789_s5 + $0x80] sm:$0xff] }
 0x227   : > { %2147 = vrot.lane.b32.xlu0 %v5496_v16, %s5210_s22 }
 0x22a   : > { %1987 = vrot.lane.b32.xlu1 %v5182_v4, %s5210_s22  ;;  %v6018_v4 = vld [vmem:[%s5789_s5 + $0x88] sm:$0xff] }
 0x22e   : > { %1989 = vrot.lane.b32.xlu1 %v5183_v6, %s5210_s22  ;;  %v5188_v6 = vld [vmem:[%s5318_s25 + $0xb8] sm:$0xff] }
 0x232   : > { %1991 = vrot.lane.b32.xlu1 %v5184_v10, %s5210_s22  ;;  %v6024_v10 = vld [vmem:[%s5789_s5 + $0xa8] sm:$0xff] }
 0x235   : > { %v1188_v12 = vpop.xlane.xlu0 %1187 }
 0x236   : > { %5003 = vrcp.f32 %v1188_v12  ;;  %2317 = vrot.lane.b32.xlu1 %v5185_v14, %s5210_s22  ;;  %v6027_v12 = vld [vmem:[%s5789_s5 + $0xb0] sm:$0xff] }
 0x239   : > { %v1209_v16 = vpop.xlane.xlu1 %1208 }
 0x23a   : > { %5005 = vrcp.f32 %v1209_v16  ;;  %v1191_v29 = vpop.xlane.xlu0 %1190  ;;  %2291 = vrot.lane.b32.xlu1 %v5186_v28, %s5210_s22  ;;  %v4714_v28 = vpack.c.bf16 %v6018_v4, %v6015_v62 }
 0x23b   : > { %5007 = vrcp.f32 %v1191_v29 }
 0x23d   : > { %v1212_v1 = vpop.xlane.xlu1 %1211 }
 0x23e   : > { %5009 = vrcp.f32 %v1212_v1  ;;  %v1194_v20 = vpop.xlane.xlu0 %1193  ;;  %2293 = vrot.lane.b32.xlu1 %v5187_v26, %s5210_s22  ;;  %v4720_v26 = vpack.c.bf16 %v6027_v12, %v6024_v10 }
 0x23f   : > { %5011 = vrcp.f32 %v1194_v20 }
 0x240   : > { %v5004_v25 = vpop.eup %5003 }
 0x241   : > { %v1298_v13 = vmul.f32 %v5004_v25, %v5753_v49  ;;  %v1215_v53 = vpop.xlane.xlu1 %1214  ;;  %v6039_v25 = vld [vmem:[%s5789_s5 + $0x90] sm:$0xff] }
 0x242   : > { %5013 = vrcp.f32 %v1215_v53  ;;  %v1197_v61 = vpop.xlane.xlu0 %1196  ;;  %2295 = vrot.lane.b32.xlu1 %v5188_v6, %s5210_s22  ;;  %v6051_v53 = vld [vmem:[%s5789_s5 + $0xc0] sm:$0xff] }
 0x243   : > { %5015 = vrcp.f32 %v1197_v61  ;;  %4239 = vmatmul.mubr.msk.f32.vlgmr.msra.gmra.mrb[28].mxu0 %vm1016_vm6, %v1298_v13  ;;  %v5189_v13 = vld [vmem:[%s5318_s25 + $0xc0] sm:$0xff] }
 0x244   : > { %v5006_v49 = vpop.eup %5005  ;;  %4241 = vmatprep.mubr.msk.f32.mxu0 %vm5208_vm0, %v7117_v39  ;;  %4712 = vmatpush3.bf16.msra.mxu0 %v4711_v60  ;;  %v6042_v60 = vld [vmem:[%s5789_s5 + $0x98] sm:$0xff] }
 0x245   : > { %v5008_v14 = vpop.eup %5007  ;;  %v1305_v16 = vmul.f32 %v5006_v49, %v5759_v59  ;;  %v1218_v29 = vpop.xlane.xlu1 %1217  ;;  %4713 = vmatprep.subr.bf16.mxu0 %v7107_v0  ;;  %v6048_v59 = vld [vmem:[%s5789_s5 + $0xb8] sm:$0xff] }
 0x246   : > { %5017 = vrcp.f32 %v1218_v29  ;;  %v1200_v1 = vpop.xlane.xlu0 %1199  ;;  %v1299_v20 = vmul.f32 %v5008_v14, %v5761_v15  ;;  %2297 = vrot.lane.b32.xlu1 %v5189_v13, %s5210_s22  ;;  %v4717_v14 = vpack.c.bf16 %v6042_v60, %v6039_v25 }
 0x247   : > { %5019 = vrcp.f32 %v1200_v1  ;;  %4274 = vmatmul.mubr.msk.f32.vlgmr.msra.gmra.mrb[28].mxu1 %vm1016_vm6, %v1305_v16  ;;  %v4723_v1 = vpack.c.bf16 %v6051_v53, %v6048_v59 }
 0x248   : > { %v5010_v61 = vpop.eup %5009  ;;  %4242 = vmatmul.mubr.msk.f32.gmra.mrb[30].mxu0 %vm1016_vm6, %v1299_v20  ;;  %4276 = vmatprep.mubr.msk.f32.mxu1 %vm5208_vm0, %v7117_v39 }
 0x249   : > { %v5012_v15 = vpop.eup %5011  ;;  %v1221_v6 = vpop.xlane.xlu1 %1220  ;;  %4244 = vmatprep.mubr.msk.f32.mxu0 %vm5208_vm0, %v7117_v39  ;;  %v1306_v49 = vmul.f32 %v5010_v61, %v5769_v36  ;;  %4715 = vmatpush3.bf16.msra.mxu0 %v4714_v28  ;;  %v356_v36 = vld [vmem:[%s5789_s5 + $0xc8] sm:$0xff]  ;;  %v357_v28 = vld [vmem:[%s5789_s5 + $0xd0] sm:$0xff] }
 0x24a   : > { %5021 = vrcp.f32 %v1221_v6  ;;  %v1203_v16 = vpop.xlane.xlu0 %1202  ;;  %v1300_v29 = vmul.f32 %v5012_v15, %v5771_v44  ;;  %4721 = vmatpush3.bf16.msra.mxu1 %v4720_v26  ;;  %4716 = vmatprep.subr.bf16.mxu0 %v7107_v0  ;;  %v351_v6 = vld [vmem:[%s5789_s5 + $0xa0] sm:$0x3] }
 0x24b   : > { %5023 = vrcp.f32 %v1203_v16  ;;  %4277 = vmatmul.mubr.msk.f32.gmra.mrb[30].mxu1 %vm1016_vm6, %v1306_v49  ;;  %4722 = vmatprep.subr.bf16.mxu1 %v7107_v0  ;;  %v4726_v49 = vpack.c.bf16 %v357_v28, %v356_v36  ;;  %v358_v36 = vld [vmem:[%s5789_s5 + $0xd8] sm:$0x3] }
 0x24c   : > { %v5014_v20 = vpop.eup %5013  ;;  %4245 = vmatmul.mubr.msk.f32.gmra.mrb[32].mxu0 %vm1016_vm6, %v1300_v29  ;;  %4279 = vmatprep.mubr.msk.f32.mxu1 %vm5208_vm0, %v7117_v39 }
 0x24d   : > { %v5016_v44 = vpop.eup %5015  ;;  %v1224_v26 = vpop.xlane.xlu1 %1223  ;;  %4247 = vmatprep.mubr.msk.f32.mxu0 %vm5208_vm0, %v7117_v39  ;;  %v1307_v13 = vmul.f32 %v5014_v20, %v5779_v48  ;;  %4718 = vmatpush3.bf16.msra.mxu0 %v4717_v14 }
 0x24e   : > { %5025 = vrcp.f32 %v1224_v26  ;;  %v1206_v61 = vpop.xlane.xlu0 %1205  ;;  %v1301_v15 = vmul.f32 %v5016_v44, %v5781_v54  ;;  %4724 = vmatpush3.bf16.msra.mxu1 %v4723_v1  ;;  %4306 = vmatprep.subr.mxu0 %v7117_v39  ;;  %v5190_v44 = vld [vmem:[%s5318_s25 + $0xc8] sm:$0xff] }
 0x24f   : > { %5027 = vrcp.f32 %v1206_v61  ;;  %4280 = vmatmul.mubr.msk.f32.gmra.mrb[32].mxu1 %vm1016_vm6, %v1307_v13  ;;  %4725 = vmatprep.subr.bf16.mxu1 %v7107_v0 }
 0x250   : > { %v5018_v16 = vpop.eup %5017  ;;  %4248 = vmatmul.mubr.msk.f32.gmra.mrb[34].mxu0 %vm1016_vm6, %v1301_v15  ;;  %4282 = vmatprep.mubr.msk.f32.mxu1 %vm5208_vm0, %v7117_v39 }
 0x251   : > { %v5020_v48 = vpop.eup %5019  ;;  %v1227_v14 = vpop.xlane.xlu1 %1226  ;;  %4250 = vmatprep.mubr.msk.f32.mxu0 %vm5208_vm0, %v7117_v39  ;;  %v1308_v54 = vmul.f32 %v5018_v16, %v5797_v32  ;;  %4307 = vmatpush3.msk.msra.mxu0 %vm1347_vm13, %v351_v6  ;;  %v5191_v6 = vld [vmem:[%s5318_s25 + $0xd0] sm:$0xff] }
 0x252   : > { %5029 = vrcp.f32 %v1227_v14  ;;  %v1230_v29 = vpop.xlane.xlu0 %1229  ;;  %v1302_v1 = vmul.f32 %v5020_v48, %v5799_v43  ;;  %4727 = vmatpush3.bf16.msra.mxu1 %v4726_v49  ;;  %4728 = vmatprep.subr.bf16.mxu0 %v7107_v0  ;;  %v4831_v48 = vunpack.i.h.bf16 %v5722_v63  ;;  %v4830_v14 = vunpack.i.l.bf16 %v5722_v63 }
 0x253   : > { %5031 = vrcp.f32 %v1230_v29  ;;  %4283 = vmatmul.mubr.msk.f32.gmra.mrb[34].mxu1 %vm1016_vm6, %v1308_v54  ;;  %4341 = vmatprep.subr.mxu1 %v7117_v39  ;;  %v4836_v63 = vunpack.i.h.bf16 %v5712_v52 }
 0x254   : > { %v5022_v28 = vpop.eup %5021  ;;  %4251 = vmatmul.mubr.msk.f32.gmra.mrb[36].mxu0 %vm1016_vm6, %v1302_v1  ;;  %4285 = vmatprep.mubr.msk.f32.mxu1 %vm5208_vm0, %v7117_v39  ;;  %v5192_v1 = vld [vmem:[%s5318_s25 + $0xd8] sm:$0x3] }
 0x255   : > { %v5024_v32 = vpop.eup %5023  ;;  %v1251_v20 = vpop.xlane.xlu1 %1250  ;;  %4253 = vmatprep.mubr.msk.f32.mxu0 %vm5208_vm0, %v7117_v39  ;;  %v1309_v43 = vmul.f32 %v5022_v28, %v5822_v47  ;;  %2299 = vrot.lane.b32.xlu1 %v5190_v44, %s5210_s22 }
 0x256   : > { %5033 = vrcp.f32 %v1251_v20  ;;  %v1233_v26 = vpop.xlane.xlu0 %1232  ;;  %v1303_v13 = vmul.f32 %v5024_v32, %v5826_v21  ;;  %4342 = vmatpush3.msk.msra.mxu1 %vm1347_vm13, %v358_v36  ;;  %v4835_v36 = vunpack.i.l.bf16 %v5712_v52  ;;  %v4729_v20 = vpack.c.bf16 %v4831_v48, %v4830_v14 }
 0x257   : > { %5035 = vrcp.f32 %v1233_v26  ;;  %4286 = vmatmul.mubr.msk.f32.gmra.mrb[36].mxu1 %vm1016_vm6, %v1309_v43  ;;  %4740 = vmatprep.subr.bf16.mxu1 %v7107_v0 }
 0x258   : > { %v5026_v61 = vpop.eup %5025  ;;  %4254 = vmatmul.mubr.msk.f32.gmra.mrb[38].mxu0 %vm1016_vm6, %v1303_v13  ;;  %4288 = vmatprep.mubr.msk.f32.mxu1 %vm5208_vm0, %v7117_v39 }
 0x259   : > { %v5028_v47 = vpop.eup %5027  ;;  %v1254_v15 = vpop.xlane.xlu1 %1253  ;;  %4256 = vmatprep.mubr.msk.f32.mxu0 %vm5208_vm0, %v7117_v39  ;;  %v1310_v21 = vmul.f32 %v5026_v61, %v5849_v23  ;;  %2301 = vrot.lane.b32.xlu1 %v5191_v6, %s5210_s22  ;;  %v4841_v61 = vunpack.i.h.bf16 %v5720_v57  ;;  %v4845_v6 = vunpack.i.l.bf16 %v5724_v45 }
 0x25a   : > { %5037 = vrcp.f32 %v1254_v15  ;;  %v1236_v49 = vpop.xlane.xlu0 %1235  ;;  %v1304_v16 = vmul.f32 %v5028_v47, %v5854_v58  ;;  %v4840_v47 = vunpack.i.l.bf16 %v5720_v57  ;;  %v4846_v57 = vunpack.i.h.bf16 %v5724_v45 }
 0x25b   : > { %5039 = vrcp.f32 %v1236_v49  ;;  %4289 = vmatmul.mubr.msk.f32.gmra.mrb[38].mxu1 %vm1016_vm6, %v1310_v21 }
 0x25c   : > { %v5030_v54 = vpop.eup %5029  ;;  %4257 = vmatmul.mubr.msk.f32.gmra.mrb[40].mxu0 %vm1016_vm6, %v1304_v16  ;;  %4291 = vmatprep.mubr.msk.f32.mxu1 %vm5208_vm0, %v7117_v39  ;;  %v4733_v48 = vpack.c.bf16 %v4841_v61, %v4840_v47 }
 0x25d   : > { %v5032_v23 = vpop.eup %5031  ;;  %v1257_v29 = vpop.xlane.xlu1 %1256  ;;  %4308 = vmatprep.mubr.msk.f32.mxu0 %vm5208_vm0, %v7117_v39  ;;  %v1311_v58 = vmul.f32 %v5030_v54, %v5871_v46  ;;  %2303 = vrot.lane.b32.xlu1 %v5192_v1, %s5210_s22  ;;  %v4745_v54 = vpack.c.bf16 %v4846_v57, %v4845_v6  ;;  %v4850_v1 = vunpack.i.l.bf16 %v5726_v40  ;;  %v7121_v6 = vld [vmem:[#allocation9_spill] sm:$0xff] }
 0x25e   : > { %v1312_v28 = vmul.f32 %v5032_v23, %v5877_v24  ;;  %5041 = vrcp.f32 %v1257_v29  ;;  %v1239_v32 = vpop.xlane.xlu0 %1238  ;;  %v4741_v24 = vpack.c.bf16 %v4836_v63, %v4835_v36  ;;  %v4855_v36 = vunpack.i.l.bf16 %v5728_v41 }
 0x25f   : > { %5043 = vrcp.f32 %v1239_v32  ;;  %4292 = vmatmul.mubr.msk.f32.gmra.mrb[40].mxu1 %vm1016_vm6, %v1311_v58  ;;  %v4851_v58 = vunpack.i.h.bf16 %v5726_v40  ;;  %v4856_v40 = vunpack.i.h.bf16 %v5728_v41 }
 0x260   : > { %v5034_v43 = vpop.eup %5033  ;;  %4309 = vmatmul.mubr.msk.f32.vlgmr.msra.gmra.mrb[42].mxu0 %vm1016_vm6, %v1312_v28  ;;  %4343 = vmatprep.mubr.msk.f32.mxu1 %vm5208_vm0, %v7117_v39 }
 0x261   : > { %v5036_v46 = vpop.eup %5035  ;;  %v1319_v44 = vmul.f32 %v5034_v43, %v5887_v34  ;;  %4731 = vmatpush3.bf16.xpose.msk.msra.mxu0 %vm5265_vm2, %v4729_v20  ;;  %v1260_v52 = vpop.xlane.xlu1 %1259  ;;  %4311 = vmatprep.mubr.msk.f32.mxu0 %vm5208_vm0, %v7117_v39  ;;  %v4737_v20 = vpack.c.bf16 %v4851_v58, %v4850_v1 }
 0x262   : > { %5045 = vrcp.f32 %v1260_v52  ;;  %v1242_v26 = vpop.xlane.xlu0 %1241  ;;  %v1313_v13 = vmul.f32 %v5036_v46, %v5894_v38  ;;  %4732 = vmatprep.subr.bf16.mxu0 %v7107_v0 }
 0x263   : > { %5047 = vrcp.f32 %v1242_v26  ;;  %4344 = vmatmul.mubr.msk.f32.vlgmr.msra.gmra.mrb[42].mxu1 %vm1016_vm6, %v1319_v44  ;;  %v4861_v26 = vunpack.i.h.bf16 %v5734_v11 }
 0x264   : > { %v5038_v34 = vpop.eup %5037  ;;  %4312 = vmatmul.mubr.msk.f32.gmra.mrb[44].mxu0 %vm1016_vm6, %v1313_v13  ;;  %4743 = vmatpush3.bf16.xpose.msk.msra.mxu1 %vm5265_vm2, %v4741_v24  ;;  %v4860_v13 = vunpack.i.l.bf16 %v5734_v11  ;;  %v4870_v11 = vunpack.i.l.bf16 %v5995_v8 }
 0x265   : > { %v5040_v15 = vpop.eup %5039  ;;  %v1263_v21 = vpop.xlane.xlu1 %1262  ;;  %4314 = vmatprep.mubr.msk.f32.mxu0 %vm5208_vm0, %v7117_v39  ;;  %4346 = vmatprep.mubr.msk.f32.mxu1 %vm5208_vm0, %v7117_v39  ;;  %v1320_v38 = vmul.f32 %v5038_v34, %v5904_v17 }
 0x266   : > { %5049 = vrcp.f32 %v1263_v21  ;;  %v1245_v49 = vpop.xlane.xlu0 %1244  ;;  %v1314_v16 = vmul.f32 %v5040_v15, %v5907_v50  ;;  %4744 = vmatprep.subr.bf16.mxu1 %v7107_v0  ;;  %v7120_v21 = vld [vmem:[#allocation11_spill] sm:$0xff] }
 0x267   : > { %5051 = vrcp.f32 %v1245_v49  ;;  %4347 = vmatmul.mubr.msk.f32.gmra.mrb[44].mxu1 %vm1016_vm6, %v1320_v38  ;;  %v4892_v38 = vpack.i.bf16 %v7120_v21, %v5815_v7  ;;  %v7122_v49 = vld [vmem:[#allocation10_spill] sm:$0xff]  ;;  %v7125_v7 = vld [vmem:[#allocation16_spill] sm:$0xff] }
 0x268   : > { %v5042_v14 = vpop.eup %5041  ;;  %4315 = vmatmul.mubr.msk.f32.gmra.mrb[46].mxu0 %vm1016_vm6, %v1314_v16  ;;  %4349 = vmatprep.mubr.msk.f32.mxu1 %vm5208_vm0, %v7117_v39  ;;  %v4897_v16 = vpack.i.bf16 %v7122_v49, %v7121_v6 }
 0x269   : > { %v5044_v17 = vpop.eup %5043  ;;  %4735 = vmatpush3.bf16.xpose.msk.msra.mxu0 %vm5265_vm2, %v4733_v48  ;;  %v1266_v45 = vpop.xlane.xlu1 %1265  ;;  %4317 = vmatprep.mubr.msk.f32.mxu0 %vm5208_vm0, %v7117_v39  ;;  %v1321_v50 = vmul.f32 %v5042_v14, %v5915_v55 }
 0x26a   : > { %5053 = vrcp.f32 %v1266_v45  ;;  %v1248_v23 = vpop.xlane.xlu0 %1247  ;;  %v1315_v29 = vmul.f32 %v5044_v17, %v5917_v9  ;;  %4736 = vmatprep.subr.bf16.mxu0 %v7107_v0  ;;  %4893 = vrot.lane.b32.xlu0 %v4892_v38, %s5210_s22  ;;  %v7123_v17 = vld [vmem:[#allocation12_spill] sm:$0xff]  ;;  %v7124_v45 = vld [vmem:[#allocation13_spill] sm:$0xff] }
 0x26b   : > { %5055 = vrcp.f32 %v1248_v23  ;;  %4350 = vmatmul.mubr.msk.f32.gmra.mrb[46].mxu1 %vm1016_vm6, %v1321_v50  ;;  %v4907_v50 = vpack.i.bf16 %v7124_v45, %v7123_v17  ;;  %v7126_v23 = vld [vmem:[#allocation17_spill] sm:$0xff] }
 0x26c   : > { %v5046_v63 = vpop.eup %5045  ;;  %4318 = vmatmul.mubr.msk.f32.gmra.mrb[48].mxu0 %vm1016_vm6, %v1315_v29  ;;  %4747 = vmatpush3.bf16.xpose.msk.msra.mxu1 %vm5265_vm2, %v4745_v54  ;;  %v4912_v29 = vpack.i.bf16 %v7126_v23, %v7125_v7 }
 0x26d   : > { %v5048_v55 = vpop.eup %5047  ;;  %4320 = vmatprep.mubr.msk.f32.mxu0 %vm5208_vm0, %v7117_v39  ;;  %4352 = vmatprep.mubr.msk.f32.mxu1 %vm5208_vm0, %v7117_v39  ;;  %v1322_v9 = vmul.f32 %v5046_v63, %v5923_v35  ;;  %v1984_v15 = vpop.permute.xlu1 %1983 }
 0x26e   : > { %v1316_v28 = vmul.f32 %v5048_v55, %v5925_v42  ;;  %4748 = vmatprep.subr.bf16.mxu1 %v7107_v0  ;;  %v6179_v32 = vpop.permute.xlu0 %4873  ;;  %v4749_v42 = vpack.c.bf16 %v4856_v40, %v4855_v36  ;;  %4898 = vrot.lane.b32.xlu0 %v4897_v16, %s5210_s22 }
 0x26f   : > { %4353 = vmatmul.mubr.msk.f32.gmra.mrb[48].mxu1 %vm1016_vm6, %v1322_v9  ;;  %v7127_v9 = vld [vmem:[#allocation6_spill] sm:$0xff] }
 0x270   : > { %v5050_v43 = vpop.eup %5049  ;;  %4321 = vmatmul.mubr.msk.f32.gmra.mrb[50].mxu0 %vm1016_vm6, %v1316_v28  ;;  %4355 = vmatprep.mubr.msk.f32.mxu1 %vm5208_vm0, %v7117_v39  ;;  %v4866_v40 = vunpack.i.h.bf16 %v7127_v9  ;;  %v4865_v36 = vunpack.i.l.bf16 %v7127_v9 }
 0x271   : > { %v5052_v35 = vpop.eup %5051  ;;  %4739 = vmatpush3.bf16.xpose.msk.msra.mxu0 %vm5265_vm2, %v4737_v20  ;;  %4323 = vmatprep.mubr.msk.f32.mxu0 %vm5208_vm0, %v7117_v39  ;;  %v1323_v41 = vmul.f32 %v5050_v43, %v5931_v18  ;;  %v7129_v43 = vld [vmem:[#allocation7_spill] sm:$0xff] }
 0x272   : > { %v1317_v46 = vmul.f32 %v5052_v35, %v5933_v51  ;;  %4376 = vmatprep.subr.mxu0 %v7117_v39  ;;  %v1830_v52 = vpop.permute.xlu0 %1829  ;;  %4908 = vrot.lane.b32.xlu0 %v4907_v50, %s5210_s22  ;;  %v4765_v20 = vpack.c.bf16 %v4866_v40, %v4865_v36 }
 0x273   : > { %4356 = vmatmul.mubr.msk.f32.gmra.mrb[50].mxu1 %vm1016_vm6, %v1323_v41  ;;  %v4922_v41 = vpack.i.bf16 %v6027_v12, %v6024_v10  ;;  %v4927_v10 = vpack.i.bf16 %v6018_v4, %v6015_v62 }
 0x274   : > { %v5054_v44 = vpop.eup %5053  ;;  %4324 = vmatmul.mubr.msk.f32.gmra.mrb[52].mxu0 %vm1016_vm6, %v1317_v46  ;;  %4751 = vmatpush3.bf16.xpose.msk.msra.mxu1 %vm5265_vm2, %v4749_v42  ;;  %v4876_v42 = vunpack.i.h.bf16 %v6179_v32  ;;  %v4875_v46 = vunpack.i.l.bf16 %v6179_v32 }
 0x275   : > { %v5056_v24 = vpop.eup %5055  ;;  %4326 = vmatprep.mubr.msk.f32.mxu0 %vm5208_vm0, %v7117_v39  ;;  %4358 = vmatprep.mubr.msk.f32.mxu1 %vm5208_vm0, %v7117_v39  ;;  %v1324_v18 = vmul.f32 %v5054_v44, %v5939_v31 }
 0x276   : > { %v1318_v51 = vmul.f32 %v5056_v24, %v5941_v56  ;;  %4411 = vmatprep.subr.mxu1 %v7117_v39  ;;  %v4879_v31 = vpop.permute.xlu0 %4878  ;;  %v4753_v56 = vpack.c.bf16 %v4861_v26, %v4860_v13  ;;  %4913 = vrot.lane.b32.xlu0 %v4912_v29, %s5210_s22  ;;  %v4769_v12 = vpack.c.bf16 %v4876_v42, %v4875_v46 }
 0x277   : > { %4359 = vmatmul.mubr.msk.f32.gmra.mrb[52].mxu1 %vm1016_vm6, %v1324_v18  ;;  %v4881_v61 = vunpack.i.h.bf16 %v4879_v31  ;;  %v4880_v47 = vunpack.i.l.bf16 %v4879_v31 }
 0x278   : > { %4327 = vmatmul.mubr.msk.f32.gmra.mrb[54].mxu0 %vm1016_vm6, %v1318_v51  ;;  %4361 = vmatprep.mubr.msk.f32.mxu1 %vm5208_vm0, %v7117_v39 }
 0x279   : > { %4377 = vmatpush3.xpose.msk.msra.mxu0 %vm363_vm1, %v5730_v3  ;;  %4378 = vmatprep.mubr.msk.f32.mxu0 %vm5208_vm0, %v7117_v39  ;;  %v4871_v3 = vunpack.i.h.bf16 %v5995_v8 }
 0x27a   : > { %4752 = vmatprep.subr.bf16.mxu0 %v7107_v0 }
 0x27c   : > { %4379 = vmatmul.mubr.msk.f32.vlgmr.msra.gmra.mrb[56].mxu0 %vm363_vm1, %v5736_v19  ;;  %4412 = vmatpush3.xpose.msk.msra.mxu1 %vm363_vm1, %v5732_v5  ;;  %v6228_v19 = vpop.permute.xlu0 %4883  ;;  %v4757_v5 = vpack.c.bf16 %v4871_v3, %v4870_v11  ;;  %v5194_v3 = vld [vmem:[%s5789_s5 + $0x8] sm:$0xff] }
 0x27d   : > { %4755 = vmatpush3.bf16.xpose.msk.msra.mxu0 %vm5265_vm2, %v4753_v56  ;;  %4381 = vmatprep.mubr.msk.f32.mxu0 %vm5208_vm0, %v7117_v39  ;;  %v4886_v18 = vunpack.i.h.bf16 %v6228_v19  ;;  %v4885_v51 = vunpack.i.l.bf16 %v6228_v19  ;;  %v5193_v56 = vld [vmem:[%s5789_s5] sm:$0xff] }
 0x27e   : > { %4756 = vmatprep.subr.bf16.mxu0 %v7107_v0  ;;  %4764 = vmatprep.subr.bf16.mxu1 %v7107_v0  ;;  %v4887_v11 = vpack.i.bf16 %v5194_v3, %v5193_v56 }
 0x27f   : > { %v4773_v4 = vpack.c.bf16 %v4886_v18, %v4885_v51 }
 0x280   : > { %4382 = vmatmul.mubr.msk.f32.gmra.mrb[58].mxu0 %vm363_vm1, %v5742_v30  ;;  %v1834_v8 = vpop.permute.xlu0 %1833  ;;  %v4761_v30 = vpack.c.bf16 %v4881_v61, %v4880_v47  ;;  %4888 = vrot.lane.b32.xlu1 %v4887_v11, %s5210_s22  ;;  %v7132_v61 = vld [vmem:[#allocation15_spill] sm:$0xff] }
 0x281   : > { %4384 = vmatprep.mubr.msk.f32.mxu0 %vm5208_vm0, %v7117_v39 }
 0x284   : > { %4385 = vmatmul.mubr.msk.f32.gmra.mrb[60].mxu0 %vm363_vm1, %v5959_v37  ;;  %v1836_v34 = vpop.permute.xlu0 %1835 }
 0x285   : > { %4759 = vmatpush3.bf16.xpose.msk.msra.mxu0 %vm5265_vm2, %v4757_v5  ;;  %4387 = vmatprep.mubr.msk.f32.mxu0 %vm5208_vm0, %v7117_v39  ;;  %v7131_v5 = vld [vmem:[#allocation14_spill] sm:$0xff] }
 0x286   : > { %4760 = vmatprep.subr.bf16.mxu0 %v7107_v0  ;;  %v4902_v47 = vpack.i.bf16 %v7132_v61, %v7131_v5 }
 0x288   : > { %4388 = vmatmul.mubr.msk.f32.gmra.mrb[62].mxu0 %vm363_vm1, %v1830_v52  ;;  %v2162_v37 = vpop.permute.xlu0 %2161  ;;  %v7130_v52 = vld [vmem:[#allocation8_spill] sm:$0xff]  ;;  %4903 = vrot.lane.b32.xlu1 %v4902_v47, %s5210_s22 }
 0x289   : > { %4390 = vmatprep.mubr.msk.f32.mxu0 %vm5208_vm0, %v7117_v39 }
 0x28c   : > { %v2136_v14 = vpop.permute.xlu0 %2135 }
 0x28d   : > { %4763 = vmatpush3.bf16.xpose.msk.msra.mxu0 %vm5265_vm2, %v4761_v30  ;;  %v7133_v30 = vld [vmem:[#allocation18_spill] sm:$0xff] }
 0x28e   : > { %4446 = vmatprep.subr.mxu0 %v7117_v39  ;;  %2829 = vrot.lane.b32.xlu1 %v7133_v30, %s5210_s22 }
 0x290   : > { %v2138_v63 = vpop.permute.xlu0 %2137 }
 0x294   : > { %v2140_v35 = vpop.permute.xlu0 %2139 }
 0x295   : > { %4447 = vmatpush3.xpose.msk.msra.mxu0 %vm363_vm1, %v2162_v37  ;;  %v4917_v37 = vpack.i.bf16 %v6007_v27, %v6004_v22 }
 0x296   : > { %4776 = vmatprep.subr.bf16.mxu0 %v7107_v0 }
 0x297   : > { %4918 = vrot.lane.b32.xlu1 %v4917_v37, %s5210_s22 }
 0x298   : > { %v2142_v32 = vpop.permute.xlu0 %2141 }
 0x29c   : > { %v2144_v62 = vpop.permute.xlu0 %2143 }
 0x29e   : > { %v1269_v57 = vpop.xlane.xlu1 %1268 }
 0x29f   : > { %5057 = vrcp.f32 %v1269_v57 }
 0x2a0   : > { %v2146_v13 = vpop.permute.xlu0 %2145 }
 0x2a2   : > { %v1986_v48 = vpop.permute.xlu1 %1985 }
 0x2a4   : > { %v2148_v2 = vpop.permute.xlu0 %2147 }
 0x2a6   : > { %v1832_v54 = vpop.permute.xlu1 %1831 }
 0x2a7   : > { %4391 = vmatmul.mubr.msk.f32.gmra.mrb[64].mxu0 %vm363_vm1, %v1832_v54 }
 0x2a8   : > { %4393 = vmatprep.mubr.msk.f32.mxu0 %vm5208_vm0, %v7117_v39 }
 0x2a9   : > { %v5058_v58 = vpop.eup %5057 }
 0x2aa   : > { %v1325_v1 = vmul.f32 %v5058_v58, %v5969_v33  ;;  %v1988_v55 = vpop.permute.xlu1 %1987  ;;  %v7128_v33 = vld [vmem:[#allocation19_spill] sm:$0xff] }
 0x2ab   : > { %4394 = vmatmul.mubr.msk.f32.gmra.mrb[66].mxu0 %vm363_vm1, %v1834_v8  ;;  %2978 = vrot.lane.b32.xlu0 %v7128_v33, %s5210_s22 }
 0x2ac   : > { %4362 = vmatmul.mubr.msk.f32.gmra.mrb[54].mxu1 %vm1016_vm6, %v1325_v1  ;;  %4396 = vmatprep.mubr.msk.f32.mxu0 %vm5208_vm0, %v7117_v39 }
 0x2ad   : > { %4413 = vmatprep.mubr.msk.f32.mxu1 %vm5208_vm0, %v7117_v39 }
 0x2ae   : > { %v1990_v28 = vpop.permute.xlu1 %1989 }
 0x2af   : > { %4397 = vmatmul.mubr.msk.f32.gmra.mrb[68].mxu0 %vm363_vm1, %v1836_v34  ;;  %4923 = vrot.lane.b32.xlu0 %v4922_v41, %s5210_s22 }
 0x2b0   : > { %4414 = vmatmul.mubr.msk.f32.vlgmr.msra.gmra.mrb[56].mxu1 %vm363_vm1, %v7129_v43  ;;  %4448 = vmatprep.mubr.msk.f32.mxu0 %vm5208_vm0, %v7117_v39 }
 0x2b1   : > { %4767 = vmatpush3.bf16.xpose.msk.msra.mxu1 %vm5265_vm2, %v4765_v20  ;;  %4416 = vmatprep.mubr.msk.f32.mxu1 %vm5208_vm0, %v7117_v39 }
 0x2b2   : > { %4768 = vmatprep.subr.bf16.mxu1 %v7107_v0  ;;  %v1992_v44 = vpop.permute.xlu1 %1991 }
 0x2b3   : > { %4449 = vmatmul.mubr.msk.f32.vlgmr.msra.gmra.mrb[70].mxu0 %vm363_vm1, %v2136_v14  ;;  %4928 = vrot.lane.b32.xlu0 %v4927_v10, %s5210_s22 }
 0x2b4   : > { %4417 = vmatmul.mubr.msk.f32.gmra.mrb[58].mxu1 %vm363_vm1, %v7130_v52  ;;  %4451 = vmatprep.mubr.msk.f32.mxu0 %vm5208_vm0, %v7117_v39 }
 0x2b5   : > { %4419 = vmatprep.mubr.msk.f32.mxu1 %vm5208_vm0, %v7117_v39 }
 0x2b6   : > { %v2318_v24 = vpop.permute.xlu1 %2317 }
 0x2b7   : > { %4452 = vmatmul.mubr.msk.f32.gmra.mrb[72].mxu0 %vm363_vm1, %v2138_v63 }
 0x2b8   : > { %4420 = vmatmul.mubr.msk.f32.gmra.mrb[60].mxu1 %vm363_vm1, %v1984_v15  ;;  %4454 = vmatprep.mubr.msk.f32.mxu0 %vm5208_vm0, %v7117_v39 }
 0x2b9   : > { %4771 = vmatpush3.bf16.xpose.msk.msra.mxu1 %vm5265_vm2, %v4769_v12  ;;  %4422 = vmatprep.mubr.msk.f32.mxu1 %vm5208_vm0, %v7117_v39 }
 0x2ba   : > { %4772 = vmatprep.subr.bf16.mxu1 %v7107_v0  ;;  %v2292_v26 = vpop.permute.xlu1 %2291 }
 0x2bb   : > { %4455 = vmatmul.mubr.msk.f32.gmra.mrb[74].mxu0 %vm363_vm1, %v2140_v35 }
 0x2bc   : > { %4457 = vmatprep.mubr.msk.f32.mxu0 %vm5208_vm0, %v7117_v39  ;;  %4423 = vmatmul.mubr.msk.f32.gmra.mrb[62].mxu1 %vm363_vm1, %v1986_v48 }
 0x2bd   : > { %4425 = vmatprep.mubr.msk.f32.mxu1 %vm5208_vm0, %v7117_v39 }
 0x2be   : > { %v2294_v31 = vpop.permute.xlu1 %2293 }
 0x2bf   : > { %4458 = vmatmul.mubr.msk.f32.gmra.mrb[76].mxu0 %vm363_vm1, %v2142_v32 }
 0x2c0   : > { %4460 = vmatprep.mubr.msk.f32.mxu0 %vm5208_vm0, %v7117_v39  ;;  %4426 = vmatmul.mubr.msk.f32.gmra.mrb[64].mxu1 %vm363_vm1, %v1988_v55 }
 0x2c1   : > { %4775 = vmatpush3.bf16.xpose.msk.msra.mxu1 %vm5265_vm2, %v4773_v4  ;;  %4428 = vmatprep.mubr.msk.f32.mxu1 %vm5208_vm0, %v7117_v39 }
 0x2c2   : > { %4481 = vmatprep.subr.mxu1 %v7117_v39  ;;  %v2296_v19 = vpop.permute.xlu1 %2295 }
 0x2c3   : > { %4461 = vmatmul.mubr.msk.f32.gmra.mrb[78].mxu0 %vm363_vm1, %v2144_v62 }
 0x2c4   : > { %4463 = vmatprep.mubr.msk.f32.mxu0 %vm5208_vm0, %v7117_v39  ;;  %4429 = vmatmul.mubr.msk.f32.gmra.mrb[66].mxu1 %vm363_vm1, %v1990_v28 }
 0x2c5   : > { %4431 = vmatprep.mubr.msk.f32.mxu1 %vm5208_vm0, %v7117_v39 }
 0x2c6   : > { %v2298_v8 = vpop.permute.xlu1 %2297 }
 0x2c7   : > { %4464 = vmatmul.mubr.msk.f32.gmra.mrb[80].mxu0 %vm363_vm1, %v2146_v13 }
 0x2c8   : > { %4466 = vmatprep.mubr.msk.f32.mxu0 %vm5208_vm0, %v7117_v39  ;;  %4432 = vmatmul.mubr.msk.f32.gmra.mrb[68].mxu1 %vm363_vm1, %v1992_v44 }
 0x2c9   : > { %4482 = vmatpush3.xpose.msk.msra.mxu1 %vm363_vm1, %v2318_v24  ;;  %4483 = vmatprep.mubr.msk.f32.mxu1 %vm5208_vm0, %v7117_v39 }
 0x2ca   : > { %4785 = vmatprep.subr.bf16.mxu1 %v7107_v0  ;;  %v2300_v34 = vpop.permute.xlu1 %2299 }
 0x2cb   : > { %4467 = vmatmul.mubr.msk.f32.gmra.mrb[82].mxu0 %vm363_vm1, %v2148_v2 }
 0x2cc   : > { %4484 = vmatmul.mubr.msk.f32.vlgmr.msra.gmra.mrb[70].mxu1 %vm363_vm1, %v2292_v26  ;;  %4518 = vmatprep.mubr.msk.f32.mxu0 %vm5208_vm0, %v7117_v39 }
 0x2cd   : > { %4486 = vmatprep.mubr.msk.f32.mxu1 %vm5208_vm0, %v7117_v39 }
 0x2ce   : > { %v2302_v15 = vpop.permute.xlu1 %2301 }
 0x2d0   : > { %4487 = vmatmul.mubr.msk.f32.gmra.mrb[72].mxu1 %vm363_vm1, %v2294_v31 }
 0x2d1   : > { %4489 = vmatprep.mubr.msk.f32.mxu1 %vm5208_vm0, %v7117_v39 }
 0x2d2   : > { %v2304_v21 = vpop.permute.xlu1 %2303 }
 0x2d4   : > { %4490 = vmatmul.mubr.msk.f32.gmra.mrb[74].mxu1 %vm363_vm1, %v2296_v19 }
 0x2d5   : > { %4492 = vmatprep.mubr.msk.f32.mxu1 %vm5208_vm0, %v7117_v39 }
 0x2d8   : > { %4493 = vmatmul.mubr.msk.f32.gmra.mrb[76].mxu1 %vm363_vm1, %v2298_v8 }
 0x2d9   : > { %4495 = vmatprep.mubr.msk.f32.mxu1 %vm5208_vm0, %v7117_v39 }
 0x2dc   : > { %4496 = vmatmul.mubr.msk.f32.gmra.mrb[78].mxu1 %vm363_vm1, %v2300_v34  ;;  %v4894_v46 = vpop.permute.xlu0 %4893 }
 0x2dd   : > { %4498 = vmatprep.mubr.msk.f32.mxu1 %vm5208_vm0, %v7117_v39  ;;  %v4896_v52 = vunpack.i.h.bf16 %v4894_v46  ;;  %v4895_v10 = vunpack.i.l.bf16 %v4894_v46 }
 0x2df   : > { %v4786_v18 = vpack.c.bf16 %v4896_v52, %v4895_v10 }
 0x2e0   : > { %4499 = vmatmul.mubr.msk.f32.gmra.mrb[80].mxu1 %vm363_vm1, %v2302_v15  ;;  %v4899_v51 = vpop.permute.xlu0 %4898 }
 0x2e1   : > { %4501 = vmatprep.mubr.msk.f32.mxu1 %vm5208_vm0, %v7117_v39  ;;  %4787 = vmatpush3.bf16.msra.mxu1 %v4786_v18  ;;  %v4901_v2 = vunpack.i.h.bf16 %v4899_v51  ;;  %v4900_v56 = vunpack.i.l.bf16 %v4899_v51 }
 0x2e2   : > { %4788 = vmatprep.subr.bf16.mxu1 %v7107_v0 }
 0x2e3   : > { %v4780_v34 = vpack.c.bf16 %v4901_v2, %v4900_v56 }
 0x2e4   : > { %4502 = vmatmul.mubr.msk.f32.gmra.mrb[82].mxu1 %vm363_vm1, %v2304_v21  ;;  %v4909_v19 = vpop.permute.xlu0 %4908 }
 0x2e5   : > { %4553 = vmatprep.mubr.msk.f32.mxu1 %vm5208_vm0, %v7117_v39 }
 0x2f2   : > { %v4889_v31 = vpop.permute.xlu1 %4888 }
 0x2f3   : > { %v4891_v3 = vunpack.i.h.bf16 %v4889_v31  ;;  %v4890_v11 = vunpack.i.l.bf16 %v4889_v31 }
 0x2f5   : > { %v4777_v8 = vpack.c.bf16 %v4891_v3, %v4890_v11 }
 0x2f7   : > { %4778 = vmatpush3.bf16.msra.mxu0 %v4777_v8 }
 0x2f8   : > { %4779 = vmatprep.subr.bf16.mxu0 %v7107_v0 }
 0x2fa   : > { %v4904_v37 = vpop.permute.xlu1 %4903 }
 0x2fb   : > { %v4906_v15 = vunpack.i.h.bf16 %v4904_v37  ;;  %v4905_v21 = vunpack.i.l.bf16 %v4904_v37  ;;  %4781 = vmatpush3.bf16.msra.mxu0 %v4780_v34  ;;  %v4937_v37 = vpack.i.bf16 %v6042_v60, %v6039_v25  ;;  %v5195_v25 = vld [vmem:[%s5789_s5 + $0xc8] sm:$0xff] }
 0x2fc   : > { %4782 = vmatprep.subr.bf16.mxu0 %v7107_v0 }
 0x300   : > { %v2830_v31 = vpop.permute.xlu1 %2829 }
 0x316   : > { %v6373_v22 = vpop.f32.mrb[28].mxu0 }
 0x317   : > { %v4240_v27 = vpop.f32.mrb[29].mxu0 }
 0x318   : > { %v4911_v27 = vunpack.i.h.bf16 %v4909_v19 }
 0x31a   : > { %v6375_v38 = vpop.f32.mrb[28].mxu1 }
 0x31b   : > { %v6377_v57 = vpop.f32.mrb[30].mxu0  ;;  %v4275_v6 = vpop.f32.mrb[29].mxu1 }
 0x31c   : > { %v4243_v49 = vpop.f32.mrb[31].mxu0  ;;  %v4910_v6 = vunpack.i.l.bf16 %v4909_v19 }
 0x31d   : > { %v4914_v49 = vpop.permute.xlu0 %4913 }
 0x31e   : > { %v6379_v16 = vpop.f32.mrb[30].mxu1 }
 0x31f   : > { %v6381_v48 = vpop.f32.mrb[32].mxu0  ;;  %v4278_v14 = vpop.f32.mrb[31].mxu1 }
 0x320   : > { %v4246_v17 = vpop.f32.mrb[33].mxu0 }
 0x321   : > { %v4916_v17 = vunpack.i.h.bf16 %v4914_v49  ;;  %v2979_v10 = vpop.permute.xlu0 %2978 }
 0x322   : > { %v6383_v45 = vpop.f32.mrb[32].mxu1 }
 0x323   : > { %v6385_v50 = vpop.f32.mrb[34].mxu0  ;;  %v4281_v54 = vpop.f32.mrb[33].mxu1 }
 0x324   : > { %v4249_v7 = vpop.f32.mrb[35].mxu0  ;;  %v4915_v54 = vunpack.i.l.bf16 %v4914_v49 }
 0x326   : > { %v6387_v23 = vpop.f32.mrb[34].mxu1 }
 0x327   : > { %v6389_v29 = vpop.f32.mrb[36].mxu0  ;;  %v4284_v58 = vpop.f32.mrb[35].mxu1 }
 0x328   : > { %v4252_v1 = vpop.f32.mrb[37].mxu0 }
 0x329   : > { %v4789_v1 = vpack.c.bf16 %v4906_v15, %v4905_v21 }
 0x32a   : > { %v6391_v63 = vpop.f32.mrb[36].mxu1 }
 0x32b   : > { %v6393_v55 = vpop.f32.mrb[38].mxu0  ;;  %v4287_v9 = vpop.f32.mrb[37].mxu1  ;;  %4790 = vmatpush3.bf16.msra.mxu1 %v4789_v1 }
 0x32c   : > { %v4255_v40 = vpop.f32.mrb[39].mxu0  ;;  %4791 = vmatprep.subr.bf16.mxu1 %v7107_v0 }
 0x32d   : > { %v4783_v40 = vpack.c.bf16 %v4911_v27, %v4910_v6 }
 0x32e   : > { %v6395_v36 = vpop.f32.mrb[38].mxu1 }
 0x32f   : > { %7134 = vst [vmem:[#allocation11_spill] sm:$0xff] %v6395_v36  ;;  %v6397_v28 = vpop.f32.mrb[40].mxu0  ;;  %v4290_v33 = vpop.f32.mrb[39].mxu1  ;;  %4784 = vmatpush3.bf16.msra.mxu0 %v4783_v40 }
 0x330   : > { %v4258_v20 = vpop.f32.mrb[41].mxu0  ;;  %v4792_v33 = vpack.c.bf16 %v4916_v17, %v4915_v54  ;;  %4516 = vmatprep.subr.mxu0 %v7117_v39 }
 0x332   : > { %v6399_v43 = vpop.f32.mrb[40].mxu1  ;;  %4793 = vmatpush3.bf16.msra.mxu1 %v4792_v33 }
 0x333   : > { %7135 = vst [vmem:[#allocation9_spill] sm:$0xff] %v6399_v43  ;;  %v6401_v35 = vpop.f32.mrb[42].mxu0  ;;  %v4293_v41 = vpop.f32.mrb[41].mxu1  ;;  %4551 = vmatprep.subr.mxu1 %v7117_v39  ;;  %4517 = vmatpush3.msk.msra.mxu0 %vm1347_vm13, %v2830_v31 }
 0x334   : > { %7136 = vst [vmem:[#allocation10_spill] sm:$0xff] %v6401_v35  ;;  %v4310_v42 = vpop.f32.mrb[43].mxu0  ;;  %4794 = vmatprep.subr.bf16.mxu0 %v7107_v0 }
 0x336   : > { %v6403_v44 = vpop.f32.mrb[42].mxu1  ;;  %4552 = vmatpush3.msk.msra.mxu1 %vm1347_vm13, %v2979_v10 }
 0x337   : > { %7137 = vst [vmem:[#allocation12_spill] sm:$0xff] %v6403_v44  ;;  %v6405_v12 = vpop.f32.mrb[44].mxu0  ;;  %v4345_v32 = vpop.f32.mrb[43].mxu1  ;;  %4803 = vmatprep.subr.bf16.mxu1 %v7107_v0 }
 0x338   : > { %7138 = vst [vmem:[#allocation13_spill] sm:$0xff] %v6405_v12  ;;  %v4313_v24 = vpop.f32.mrb[45].mxu0 }
 0x33a   : > { %v6407_v62 = vpop.f32.mrb[44].mxu1 }
 0x33b   : > { %7139 = vst [vmem:[#allocation16_spill] sm:$0xff] %v6407_v62  ;;  %v6409_v4 = vpop.f32.mrb[46].mxu0  ;;  %v4348_v26 = vpop.f32.mrb[45].mxu1 }
 0x33c   : > { %7140 = vst [vmem:[#allocation17_spill] sm:$0xff] %v6409_v4  ;;  %v4316_v13 = vpop.f32.mrb[47].mxu0 }
 0x33e   : > { %v6412_v5 = vpop.f32.mrb[46].mxu1 }
 0x33f   : > { %7141 = vst [vmem:[#allocation6_spill] sm:$0xff] %v6412_v5  ;;  %v6414_v61 = vpop.f32.mrb[48].mxu0  ;;  %v4351_v47 = vpop.f32.mrb[47].mxu1 }
 0x340   : > { %7142 = vst [vmem:[#allocation19_spill] sm:$0xff] %v6414_v61  ;;  %v4319_v30 = vpop.f32.mrb[49].mxu0 }
 0x342   : > { %v6416_v14 = vpop.f32.mrb[48].mxu1 }
 0x343   : > { %7143 = vst [vmem:[#allocation7_spill] sm:$0xff] %v6416_v14  ;;  %v6419_v7 = vpop.f32.mrb[50].mxu0  ;;  %v4354_v58 = vpop.f32.mrb[49].mxu1 }
 0x344   : > { %7144 = vst [vmem:[#allocation8_spill] sm:$0xff] %v6419_v7  ;;  %v4322_v9 = vpop.f32.mrb[51].mxu0 }
 0x346   : > { %v6421_v20 = vpop.f32.mrb[50].mxu1 }
 0x347   : > { %7145 = vst [vmem:[#allocation14_spill] sm:$0xff] %v6421_v20  ;;  %v6425_v41 = vpop.f32.mrb[52].mxu0  ;;  %v4357_v42 = vpop.f32.mrb[51].mxu1 }
 0x348   : > { %7146 = vst [vmem:[#allocation15_spill] sm:$0xff] %v6425_v41  ;;  %v4325_v46 = vpop.f32.mrb[53].mxu0 }
 0x34a   : > { %v6427_v52 = vpop.f32.mrb[52].mxu1 }
 0x34b   : > { %7147 = vst [vmem:[#allocation18_spill] sm:$0xff] %v6427_v52  ;;  %v6431_v32 = vpop.f32.mrb[54].mxu0  ;;  %v4360_v24 = vpop.f32.mrb[53].mxu1 }
 0x34c   : > { %7148 = vst [vmem:[#allocation20_spill] sm:$0xff] %v6431_v32  ;;  %v4328_v18 = vpop.f32.mrb[55].mxu0 }
 0x34f   : > { %v1945_v51 = vpop.f32.mrb[56].mxu0 }
 0x350   : > { %v2447_v26 = vmul.f32 0.25, %v1945_v51  ;;  %v4380_v13 = vpop.f32.mrb[57].mxu0 }
 0x352   : > { %v6437_v56 = vsel %vm5523_vm5, %v2447_v26, -1e+30 }
 0x353   : > { %v1950_v3 = vpop.f32.mrb[58].mxu0  ;;  %v2503_v11 = vsel %vm1016_vm6, %v6437_v56, -inf }
 0x354   : > { %2504 = vmax.xlane.f32.xlu0 %v2503_v11  ;;  %v4383_v19 = vpop.f32.mrb[59].mxu0  ;;  %v2448_v54 = vmul.f32 0.25, %v1950_v3 }
 0x356   : > { %v6450_v42 = vsel %vm5523_vm5, %v2448_v54, -1e+30 }
 0x357   : > { %v1955_v47 = vpop.f32.mrb[60].mxu0  ;;  %v2506_v13 = vsel %vm1016_vm6, %v6450_v42, -inf }
 0x358   : > { %v4386_v8 = vpop.f32.mrb[61].mxu0  ;;  %v2449_v31 = vmul.f32 0.25, %v1955_v47 }
 0x35b   : > { %v1960_v30 = vpop.f32.mrb[62].mxu0 }
 0x35c   : > { %v4389_v34 = vpop.f32.mrb[63].mxu0 }
 0x35d   : > { %v2450_v34 = vmul.f32 0.25, %v1960_v30 }
 0x36a   : > { %4938 = vrot.lane.b32.xlu0 %v4937_v37, %s5210_s22 }
 0x37a   : > { %v1965_v15 = vpop.f32.mrb[64].mxu0 }
 0x37b   : > { %v4392_v21 = vpop.f32.mrb[65].mxu0  ;;  %v2451_v54 = vmul.f32 0.25, %v1965_v15 }
 0x37e   : > { %v1970_v27 = vpop.f32.mrb[66].mxu0 }
 0x37f   : > { %v6446_v6 = vpop.f32.mrb[54].mxu1  ;;  %v4395_v49 = vpop.f32.mrb[67].mxu0 }
 0x380   : > { %7150 = vst [vmem:[#allocation2_spill] sm:$0xff] %v6446_v6  ;;  %v4363_v17 = vpop.f32.mrb[55].mxu1  ;;  %v6470_v49 = vsel %vm5523_vm5, %v2449_v31, -1e+30 }
 0x381   : > { %v6474_v17 = vsel %vm5523_vm5, %v2450_v34, -1e+30 }
 0x382   : > { %v1975_v58 = vpop.f32.mrb[68].mxu0 }
 0x383   : > { %v2101_v1 = vpop.f32.mrb[56].mxu1  ;;  %v4398_v9 = vpop.f32.mrb[69].mxu0 }
 0x384   : > { %v2454_v40 = vmul.f32 0.25, %v2101_v1  ;;  %v4415_v33 = vpop.f32.mrb[57].mxu1 }
 0x385   : > { %v2512_v33 = vsel %vm1016_vm6, %v6474_v17, -inf }
 0x386   : > { %v6454_v60 = vsel %vm5527_vm7, %v2454_v40, -1e+30  ;;  %v2257_v46 = vpop.f32.mrb[70].mxu0  ;;  %v2509_v40 = vsel %vm1016_vm6, %v6470_v49, -inf }
 0x387   : > { %v2106_v10 = vpop.f32.mrb[58].mxu1  ;;  %v2524_v24 = vsel %vm1016_vm6, %v6454_v60, -inf  ;;  %v4450_v18 = vpop.f32.mrb[71].mxu0 }
 0x388   : > { %v2455_v51 = vmul.f32 0.25, %v2106_v10  ;;  %2525 = vmax.xlane.f32.xlu1 %v2524_v24  ;;  %v4418_v26 = vpop.f32.mrb[59].mxu1  ;;  %v6484_v24 = vsel %vm5523_vm5, %v2451_v54, -1e+30  ;;  %v2452_v18 = vmul.f32 0.25, %v1970_v27 }
 0x389   : > { %2507 = vmax.xlane.f32.xlu0 %v2506_v13  ;;  %v4932_v13 = vpack.i.bf16 %v6051_v53, %v6048_v59  ;;  %v2515_v31 = vsel %vm1016_vm6, %v6484_v24, -inf }
 0x38a   : > { %v6462_v3 = vsel %vm5527_vm7, %v2455_v51, -1e+30  ;;  %v2262_v11 = vpop.f32.mrb[72].mxu0  ;;  %v6494_v34 = vsel %vm5523_vm5, %v2452_v18, -1e+30 }
 0x38b   : > { %v6464_v19 = vpop.f32.mrb[60].mxu1  ;;  %v2527_v8 = vsel %vm1016_vm6, %v6462_v3, -inf  ;;  %v4453_v37 = vpop.f32.mrb[73].mxu0 }
 0x38c   : > { %v4421_v21 = vpop.f32.mrb[61].mxu1  ;;  %v2453_v37 = vmul.f32 0.25, %v1975_v58  ;;  %v2456_v41 = vmul.f32 0.25, %v6464_v19 }
 0x38d   : > { %2528 = vmax.xlane.f32.xlu0 %v2527_v8 }
 0x38e   : > { %v2267_v47 = vpop.f32.mrb[74].mxu0  ;;  %v6503_v53 = vsel %vm5523_vm5, %v2453_v37, -1e+30  ;;  %v6550_v7 = vsel %vm5527_vm7, %v2456_v41, -1e+30 }
 0x38f   : > { %v4456_v1 = vpop.f32.mrb[75].mxu0  ;;  %v6476_v9 = vpop.f32.mrb[62].mxu1  ;;  %v2521_v58 = vsel %vm1035_vm10, %v6503_v53, -inf  ;;  %v2463_v37 = vmul.f32 0.25, %v2267_v47 }
 0x390   : > { %v4424_v30 = vpop.f32.mrb[63].mxu1  ;;  %v2518_v1 = vsel %vm1016_vm6, %v6494_v34, -inf }
 0x391   : > { %2510 = vmax.xlane.f32.xlu0 %v2509_v40  ;;  %v2461_v40 = vmul.f32 0.25, %v2257_v46 }
 0x392   : > { %v2272_v10 = vpop.f32.mrb[76].mxu0 }
 0x393   : > { %v4459_v51 = vpop.f32.mrb[77].mxu0  ;;  %v6486_v26 = vpop.f32.mrb[64].mxu1 }
 0x394   : > { %v4427_v15 = vpop.f32.mrb[65].mxu1 }
 0x395   : > { %2513 = vmax.xlane.f32.xlu0 %v2512_v33 }
 0x396   : > { %v2277_v8 = vpop.f32.mrb[78].mxu0 }
 0x397   : > { %v4462_v21 = vpop.f32.mrb[79].mxu0  ;;  %v6496_v54 = vpop.f32.mrb[66].mxu1 }
 0x398   : > { %v4430_v27 = vpop.f32.mrb[67].mxu1 }
 0x399   : > { %2516 = vmax.xlane.f32.xlu0 %v2515_v31  ;;  %4933 = vrot.lane.b32.xlu1 %v4932_v13, %s5210_s22  ;;  %v6509_v13 = vsel %vm5615_vm11, %v2461_v40, -1e+30  ;;  %v2462_v31 = vmul.f32 0.25, %v2262_v11  ;;  %v6521_v11 = vsel %vm5615_vm11, %v2463_v37, -1e+30 }
 0x39a   : > { %v2282_v59 = vpop.f32.mrb[80].mxu0  ;;  %v2545_v2 = vsel %vm1016_vm6, %v6509_v13, -inf }
 0x39b   : > { %v4465_v30 = vpop.f32.mrb[81].mxu0  ;;  %v2131_v33 = vpop.f32.mrb[68].mxu1  ;;  %v6515_v46 = vsel %vm5615_vm11, %v2462_v31, -1e+30  ;;  %v2465_v31 = vmul.f32 0.25, %v2277_v8  ;;  %v2466_v37 = vmul.f32 0.25, %v2282_v59 }
 0x39c   : > { %v4433_v18 = vpop.f32.mrb[69].mxu1  ;;  %v2548_v40 = vsel %vm1016_vm6, %v6515_v46, -inf }
 0x39d   : > { %2519 = vmax.xlane.f32.xlu0 %v2518_v1  ;;  %v6539_v8 = vsel %vm5615_vm11, %v2466_v37, -1e+30  ;;  %v2530_v37 = vsel %vm1016_vm6, %v6550_v7, -inf }
 0x39e   : > { %v2287_v51 = vpop.f32.mrb[82].mxu0 }
 0x39f   : > { %v2413_v21 = vpop.f32.mrb[70].mxu1  ;;  %v4468_v27 = vpop.f32.mrb[83].mxu0 }
 0x3a0   : > { %v4485_v52 = vpop.f32.mrb[71].mxu1  ;;  %v2551_v27 = vsel %vm1016_vm6, %v6521_v11, -inf }
 0x3a1   : > { %2522 = vmax.xlane.f32.xlu0 %v2521_v58  ;;  %v2464_v52 = vmul.f32 0.25, %v2272_v10  ;;  %v6533_v10 = vsel %vm5615_vm11, %v2465_v31, -1e+30  ;;  %v2560_v31 = vsel %vm1016_vm6, %v6539_v8, -inf }
 0x3a2   : > { %v2557_v6 = vsel %vm1016_vm6, %v6533_v10, -inf }
 0x3a3   : > { %v2418_v1 = vpop.f32.mrb[72].mxu1  ;;  %v6527_v47 = vsel %vm5615_vm11, %v2464_v52, -1e+30  ;;  %v2467_v52 = vmul.f32 0.25, %v2287_v51  ;;  %v2457_v51 = vmul.f32 0.25, %v6476_v9  ;;  %v2459_v9 = vmul.f32 0.25, %v6496_v54 }
 0x3a4   : > { %v4488_v30 = vpop.f32.mrb[73].mxu1  ;;  %v2554_v32 = vsel %vm1016_vm6, %v6527_v47, -inf }
 0x3a5   : > { %2546 = vmax.xlane.f32.xlu0 %v2545_v2  ;;  %v6546_v59 = vsel %vm5615_vm11, %v2467_v52, -1e+30  ;;  %v6560_v15 = vsel %vm5527_vm7, %v2457_v51, -1e+30  ;;  %v2468_v51 = vmul.f32 0.25, %v2413_v21 }
 0x3a6   : > { %v2563_v19 = vsel %vm1035_vm10, %v6546_v59, -inf  ;;  %v2533_v52 = vsel %vm1016_vm6, %v6560_v15, -inf }
 0x3a7   : > { %v2423_v18 = vpop.f32.mrb[74].mxu1 }
 0x3a8   : > { %v4491_v58 = vpop.f32.mrb[75].mxu1 }
 0x3a9   : > { %2549 = vmax.xlane.f32.xlu0 %v2548_v40 }
 0x3ab   : > { %v2428_v2 = vpop.f32.mrb[76].mxu1 }
 0x3ac   : > { %v4494_v30 = vpop.f32.mrb[77].mxu1 }
 0x3ad   : > { %2552 = vmax.xlane.f32.xlu0 %v2551_v27 }
 0x3af   : > { %v2433_v40 = vpop.f32.mrb[78].mxu1 }
 0x3b0   : > { %v4497_v58 = vpop.f32.mrb[79].mxu1 }
 0x3b1   : > { %2555 = vmax.xlane.f32.xlu0 %v2554_v32 }
 0x3b3   : > { %v2438_v27 = vpop.f32.mrb[80].mxu1 }
 0x3b4   : > { %v4500_v30 = vpop.f32.mrb[81].mxu1 }
 0x3b5   : > { %2558 = vmax.xlane.f32.xlu0 %v2557_v6  ;;  %v2458_v6 = vmul.f32 0.25, %v6486_v26  ;;  %v6573_v30 = vsel %vm5527_vm7, %v2459_v9, -1e+30  ;;  %v2469_v9 = vmul.f32 0.25, %v2418_v1 }
 0x3b7   : > { %v2443_v32 = vpop.f32.mrb[82].mxu1  ;;  %v6564_v41 = vsel %vm5527_vm7, %v2458_v6, -1e+30 }
 0x3b8   : > { %v4503_v58 = vpop.f32.mrb[83].mxu1  ;;  %v2536_v26 = vsel %vm1016_vm6, %v6564_v41, -inf }
 0x3b9   : > { %2561 = vmax.xlane.f32.xlu0 %v2560_v31  ;;  %v2460_v31 = vmul.f32 0.25, %v2131_v33  ;;  %v2539_v58 = vsel %vm1016_vm6, %v6573_v30, -inf }
 0x3bb   : > { %v6579_v54 = vsel %vm5527_vm7, %v2460_v31, -1e+30  ;;  %v2470_v31 = vmul.f32 0.25, %v2423_v18 }
 0x3bd   : > { %2564 = vmax.xlane.f32.xlu0 %v2563_v19  ;;  %2531 = vmax.xlane.f32.xlu1 %v2530_v37  ;;  %v2542_v19 = vsel %vm1035_vm10, %v6579_v54, -inf  ;;  %v6585_v37 = vsel %vm5625_vm12, %v2468_v51, -1e+30  ;;  %v6600_v1 = vsel %vm5625_vm12, %v2470_v31, -1e+30  ;;  %v2471_v51 = vmul.f32 0.25, %v2428_v2 }
 0x3be   : > { %v2566_v33 = vsel %vm1016_vm6, %v6585_v37, -inf  ;;  %v2473_v2 = vmul.f32 0.25, %v2438_v27 }
 0x3bf   : > { %v6608_v18 = vsel %vm5625_vm12, %v2471_v51, -1e+30 }
 0x3c1   : > { %2534 = vmax.xlane.f32.xlu1 %v2533_v52  ;;  %v6591_v52 = vsel %vm5625_vm12, %v2469_v9, -1e+30  ;;  %v6604_v9 = vpop.permute.xlu0 %4923 }
 0x3c5   : > { %2537 = vmax.xlane.f32.xlu1 %v2536_v26  ;;  %v5196_v26 = vld [vmem:[%s5789_s5 + $0xd0] sm:$0xff] }
 0x3c6   : > { %v4942_v21 = vpack.i.bf16 %v5196_v26, %v5195_v25  ;;  %v2575_v25 = vsel %vm1016_vm6, %v6608_v18, -inf }
 0x3c9   : > { %2540 = vmax.xlane.f32.xlu1 %v2539_v58  ;;  %v2569_v58 = vsel %vm1016_vm6, %v6591_v52, -inf }
 0x3cd   : > { %2543 = vmax.xlane.f32.xlu1 %v2542_v19  ;;  %v2572_v19 = vsel %vm1016_vm6, %v6600_v1, -inf }
 0x3d1   : > { %2567 = vmax.xlane.f32.xlu1 %v2566_v33  ;;  %v2472_v33 = vmul.f32 0.25, %v2433_v40  ;;  %v2474_v40 = vmul.f32 0.25, %v2443_v32 }
 0x3d3   : > { %4943 = vrot.lane.b32.xlu0 %v4942_v21, %s5210_s22  ;;  %v6614_v26 = vsel %vm5625_vm12, %v2472_v33, -1e+30  ;;  %v6616_v21 = vpop.permute.xlu0 %4928  ;;  %v6629_v27 = vsel %vm5625_vm12, %v2474_v40, -1e+30 }
 0x3d4   : > { %v2578_v31 = vsel %vm1016_vm6, %v6614_v26, -inf  ;;  %v2584_v20 = vsel %vm1035_vm10, %v6629_v27, -inf }
 0x3d5   : > { %2570 = vmax.xlane.f32.xlu1 %v2569_v58  ;;  %v6622_v58 = vsel %vm5625_vm12, %v2473_v2, -1e+30 }
 0x3d6   : > { %v2581_v33 = vsel %vm1016_vm6, %v6622_v58, -inf }
 0x3d9   : > { %2573 = vmax.xlane.f32.xlu1 %v2572_v19 }
 0x3dd   : > { %2576 = vmax.xlane.f32.xlu1 %v2575_v25 }
 0x3e1   : > { %v2505_v51 = vpop.xlane.xlu0 %2504  ;;  %2579 = vmax.xlane.f32.xlu1 %v2578_v31 }
 0x3e2   : > { %v2587_v19 = vsub.f32 %v6437_v56, %v2505_v51  ;;  %v6637_v56 = vpop.permute.xlu1 %4918 }
 0x3e4   : > { %v2615_v25 = vmul.f32 1.442695, %v2587_v19 }
 0x3e5   : > { %2582 = vmax.xlane.f32.xlu1 %v2581_v33  ;;  %v6639_v31 = vpop.permute.xlu0 %4938 }
 0x3e6   : > { %5059 = vpow2.f32 %v2615_v25 }
 0x3e9   : > { %2585 = vmax.xlane.f32.xlu1 %v2584_v20 }
 0x3f0   : > { %v6633_v2 = vpop.eup %5059 }
 0x3f1   : > { %v2671_v32 = vsel %vm1016_vm6, %v6633_v2, 0.0 }
 0x3f2   : > { %2672 = vadd.xlane.f32.xlu0 %v2671_v32 }
 0x415   : > { %v2526_v6 = vpop.xlane.xlu1 %2525 }
 0x416   : > { %v2594_v40 = vsub.f32 %v6454_v60, %v2526_v6  ;;  %v2508_v51 = vpop.xlane.xlu0 %2507 }
 0x417   : > { %v2588_v19 = vsub.f32 %v6450_v42, %v2508_v51 }
 0x418   : > { %v2629_v33 = vmul.f32 1.442695, %v2594_v40 }
 0x419   : > { %v2617_v25 = vmul.f32 1.442695, %v2588_v19 }
 0x41a   : > { %5061 = vpow2.f32 %v2629_v33  ;;  %v2529_v20 = vpop.xlane.xlu0 %2528 }
 0x41b   : > { %5063 = vpow2.f32 %v2617_v25  ;;  %v2595_v61 = vsub.f32 %v6462_v3, %v2529_v20  ;;  %v6666_v25 = vpop.permute.xlu1 %4933 }
 0x41d   : > { %v2631_v14 = vmul.f32 1.442695, %v2595_v61 }
 0x41e   : > { %v2511_v4 = vpop.xlane.xlu0 %2510 }
 0x41f   : > { %5065 = vpow2.f32 %v2631_v14  ;;  %v2589_v32 = vsub.f32 %v6470_v49, %v2511_v4 }
 0x421   : > { %v2619_v5 = vmul.f32 1.442695, %v2589_v32 }
 0x422   : > { %v2514_v12 = vpop.xlane.xlu0 %2513 }
 0x423   : > { %5067 = vpow2.f32 %v2619_v5  ;;  %v2590_v60 = vsub.f32 %v6474_v17, %v2514_v12 }
 0x424   : > { %v6646_v6 = vpop.eup %5061 }
 0x425   : > { %v6648_v42 = vpop.eup %5063  ;;  %v2621_v40 = vmul.f32 1.442695, %v2590_v60  ;;  %v2692_v51 = vsel %vm1016_vm6, %v6646_v6, 0.0 }
 0x426   : > { %2693 = vadd.xlane.f32.xlu1 %v2692_v51  ;;  %v2674_v61 = vsel %vm1016_vm6, %v6648_v42, 0.0  ;;  %v2517_v17 = vpop.xlane.xlu0 %2516 }
 0x427   : > { %5069 = vpow2.f32 %v2621_v40  ;;  %2675 = vadd.xlane.f32.xlu0 %v2674_v61  ;;  %v2591_v32 = vsub.f32 %v6484_v24, %v2517_v17 }
 0x429   : > { %v6654_v4 = vpop.eup %5065  ;;  %v2623_v61 = vmul.f32 1.442695, %v2591_v32 }
 0x42a   : > { %v2695_v5 = vsel %vm1016_vm6, %v6654_v4, 0.0  ;;  %v2520_v19 = vpop.xlane.xlu0 %2519 }
 0x42b   : > { %2696 = vadd.xlane.f32.xlu1 %v2695_v5 }
 0x42d   : > { %v6658_v12 = vpop.eup %5067 }
 0x42e   : > { %v2677_v14 = vsel %vm1016_vm6, %v6658_v12, 0.0  ;;  %v2523_v33 = vpop.xlane.xlu0 %2522 }
 0x42f   : > { %2678 = vadd.xlane.f32.xlu0 %v2677_v14  ;;  %v2593_v17 = vsub.f32 %v6503_v53, %v2523_v33 }
 0x431   : > { %v6662_v3 = vpop.eup %5069 }
 0x432   : > { %v2680_v49 = vsel %vm1016_vm6, %v6662_v3, 0.0  ;;  %v2547_v20 = vpop.xlane.xlu0 %2546 }
 0x433   : > { %2681 = vadd.xlane.f32.xlu0 %v2680_v49  ;;  %v2592_v49 = vsub.f32 %v6494_v34, %v2520_v19 }
 0x435   : > { %v2625_v24 = vmul.f32 1.442695, %v2592_v49 }
 0x436   : > { %v2550_v5 = vpop.xlane.xlu0 %2549 }
 0x43a   : > { %v2553_v36 = vpop.xlane.xlu0 %2552 }
 0x43e   : > { %v2556_v19 = vpop.xlane.xlu0 %2555 }
 0x43f   : > { %v2604_v33 = vsub.f32 %v6527_v47, %v2556_v19 }
 0x441   : > { %v2649_v49 = vmul.f32 1.442695, %v2604_v33 }
 0x44a   : > { %v2532_v60 = vpop.xlane.xlu1 %2531 }
 0x44b   : > { %v2596_v40 = vsub.f32 %v6550_v7, %v2532_v60 }
 0x44d   : > { %v2633_v51 = vmul.f32 1.442695, %v2596_v40  ;;  %v2601_v40 = vsub.f32 %v6509_v13, %v2547_v20 }
 0x44e   : > { %v2535_v14 = vpop.xlane.xlu1 %2534 }
 0x44f   : > { %v2597_v62 = vsub.f32 %v6560_v15, %v2535_v14  ;;  %5071 = vpow2.f32 %v2633_v51  ;;  %v2627_v15 = vmul.f32 1.442695, %v2593_v17  ;;  %v2643_v13 = vmul.f32 1.442695, %v2601_v40 }
 0x450   : > { %5073 = vpow2.f32 %v2623_v61 }
 0x451   : > { %v2635_v44 = vmul.f32 1.442695, %v2597_v62 }
 0x452   : > { %v2538_v35 = vpop.xlane.xlu1 %2537 }
 0x453   : > { %5075 = vpow2.f32 %v2635_v44  ;;  %v2598_v43 = vsub.f32 %v6564_v41, %v2538_v35  ;;  %v2602_v41 = vsub.f32 %v6515_v46, %v2550_v5 }
 0x455   : > { %v2637_v7 = vmul.f32 1.442695, %v2598_v43  ;;  %v2645_v46 = vmul.f32 1.442695, %v2602_v41 }
 0x456   : > { %v2541_v60 = vpop.xlane.xlu1 %2540 }
 0x457   : > { %5077 = vpow2.f32 %v2637_v7  ;;  %v2599_v32 = vsub.f32 %v6573_v30, %v2541_v60 }
 0x458   : > { %5079 = vpow2.f32 %v2625_v24  ;;  %v2559_v24 = vpop.xlane.xlu0 %2558 }
 0x459   : > { %v2639_v34 = vmul.f32 1.442695, %v2599_v32  ;;  %v6676_v62 = vpop.eup %5071 }
 0x45a   : > { %v2544_v44 = vpop.xlane.xlu1 %2543  ;;  %v2698_v53 = vsel %vm1016_vm6, %v6676_v62, 0.0  ;;  %v6681_v43 = vpop.eup %5073 }
 0x45b   : > { %5081 = vpow2.f32 %v2639_v34  ;;  %v2600_v35 = vsub.f32 %v6579_v54, %v2544_v44  ;;  %2699 = vadd.xlane.f32.xlu1 %v2698_v53  ;;  %v2683_v14 = vsel %vm1016_vm6, %v6681_v43, 0.0 }
 0x45c   : > { %5083 = vpow2.f32 %v2627_v15  ;;  %v2603_v15 = vsub.f32 %v6521_v11, %v2553_v36  ;;  %v2562_v53 = vpop.xlane.xlu0 %2561 }
 0x45d   : > { %v6684_v30 = vpop.eup %5075  ;;  %v2641_v20 = vmul.f32 1.442695, %v2600_v35 }
 0x45e   : > { %v2568_v51 = vpop.xlane.xlu1 %2567  ;;  %v2701_v61 = vsel %vm1016_vm6, %v6684_v30, 0.0  ;;  %v2647_v41 = vmul.f32 1.442695, %v2603_v15 }
 0x45f   : > { %5085 = vpow2.f32 %v2641_v20  ;;  %v2608_v54 = vsub.f32 %v6585_v37, %v2568_v51  ;;  %2702 = vadd.xlane.f32.xlu0 %v2701_v61  ;;  %2684 = vadd.xlane.f32.xlu1 %v2683_v14  ;;  %v2605_v61 = vsub.f32 %v6533_v10, %v2559_v24 }
 0x460   : > { %5087 = vpow2.f32 %v2643_v13  ;;  %v2565_v14 = vpop.xlane.xlu0 %2564 }
 0x461   : > { %v6692_v5 = vpop.eup %5077  ;;  %v2657_v47 = vmul.f32 1.442695, %v2608_v54  ;;  %v2607_v24 = vsub.f32 %v6546_v59, %v2565_v14 }
 0x462   : > { %v2571_v17 = vpop.xlane.xlu1 %2570  ;;  %v2704_v7 = vsel %vm1016_vm6, %v6692_v5, 0.0  ;;  %v6696_v60 = vpop.eup %5079 }
 0x463   : > { %5089 = vpow2.f32 %v2657_v47  ;;  %v2609_v37 = vsub.f32 %v6591_v52, %v2571_v17  ;;  %2705 = vadd.xlane.f32.xlu0 %v2704_v7  ;;  %v2686_v44 = vsel %vm1016_vm6, %v6696_v60, 0.0 }
 0x464   : > { %5091 = vpow2.f32 %v2645_v46 }
 0x465   : > { %v6699_v32 = vpop.eup %5081  ;;  %5093 = vpow2.f32 %v2649_v49  ;;  %v2659_v40 = vmul.f32 1.442695, %v2609_v37 }
 0x466   : > { %v2574_v34 = vpop.xlane.xlu1 %2573  ;;  %v2707_v19 = vsel %vm1016_vm6, %v6699_v32, 0.0  ;;  %v6706_v35 = vpop.eup %5083 }
 0x467   : > { %2708 = vadd.xlane.f32.xlu1 %v2707_v19  ;;  %2687 = vadd.xlane.f32.xlu0 %v2686_v44  ;;  %5095 = vpow2.f32 %v2659_v40  ;;  %v2610_v36 = vsub.f32 %v6600_v1, %v2574_v34  ;;  %v2689_v33 = vsel %vm1035_vm10, %v6706_v35, 0.0  ;;  %v2606_v1 = vsub.f32 %v6539_v8, %v2562_v53 }
 0x468   : > { %5097 = vpow2.f32 %v2647_v41  ;;  %v2651_v8 = vmul.f32 1.442695, %v2605_v61  ;;  %v2655_v41 = vmul.f32 1.442695, %v2607_v24  ;;  %v6746_v61 = vpop.permute.xlu0 %4943 }
 0x469   : > { %v6708_v52 = vpop.eup %5085  ;;  %v2661_v46 = vmul.f32 1.442695, %v2610_v36  ;;  %v2653_v15 = vmul.f32 1.442695, %v2606_v1 }
 0x46a   : > { %v2577_v11 = vpop.xlane.xlu1 %2576  ;;  %v2710_v13 = vsel %vm1035_vm10, %v6708_v52, 0.0  ;;  %v6715_v20 = vpop.eup %5087 }
 0x46b   : > { %v2611_v51 = vsub.f32 %v6608_v18, %v2577_v11  ;;  %2711 = vadd.xlane.f32.xlu1 %v2710_v13  ;;  %2690 = vadd.xlane.f32.xlu0 %v2689_v33  ;;  %v2713_v7 = vsel %vm1016_vm6, %v6715_v20, 0.0 }
 0x46d   : > { %v6719_v54 = vpop.eup %5089  ;;  %v2663_v49 = vmul.f32 1.442695, %v2611_v51 }
 0x46e   : > { %v6722_v47 = vpop.eup %5091  ;;  %v2580_v17 = vpop.xlane.xlu1 %2579  ;;  %v2734_v18 = vsel %vm1016_vm6, %v6719_v54, 0.0 }
 0x46f   : > { %v6728_v37 = vpop.eup %5093  ;;  %5099 = vpow2.f32 %v2663_v49  ;;  %v2612_v10 = vsub.f32 %v6614_v26, %v2580_v17  ;;  %2714 = vadd.xlane.f32.xlu1 %v2713_v7  ;;  %2735 = vadd.xlane.f32.xlu0 %v2734_v18  ;;  %v2716_v19 = vsel %vm1016_vm6, %v6722_v47, 0.0 }
 0x470   : > { %5101 = vpow2.f32 %v2661_v46  ;;  %v2722_v44 = vsel %vm1016_vm6, %v6728_v37, 0.0 }
 0x471   : > { %v2665_v40 = vmul.f32 1.442695, %v2612_v10  ;;  %v6736_v53 = vpop.eup %5095 }
 0x472   : > { %v2583_v34 = vpop.xlane.xlu1 %2582  ;;  %v2737_v11 = vsel %vm1016_vm6, %v6736_v53, 0.0  ;;  %v6741_v13 = vpop.eup %5097 }
 0x473   : > { %5103 = vpow2.f32 %v2665_v40  ;;  %v2613_v26 = vsub.f32 %v6622_v58, %v2583_v34  ;;  %2717 = vadd.xlane.f32.xlu1 %v2716_v19  ;;  %2723 = vadd.xlane.f32.xlu0 %v2722_v44  ;;  %v2719_v1 = vsel %vm1016_vm6, %v6741_v13, 0.0 }
 0x474   : > { %5105 = vpow2.f32 %v2651_v8 }
 0x475   : > { %5107 = vpow2.f32 %v2653_v15  ;;  %v2667_v59 = vmul.f32 1.442695, %v2613_v26  ;;  %v4921_v26 = vunpack.i.h.bf16 %v6637_v56 }
 0x476   : > { %v2586_v36 = vpop.xlane.xlu1 %2585  ;;  %5109 = vpow2.f32 %v2655_v41  ;;  %v4920_v41 = vunpack.i.l.bf16 %v6637_v56 }
 0x477   : > { %v2614_v33 = vsub.f32 %v6629_v27, %v2586_v36  ;;  %2738 = vadd.xlane.f32.xlu1 %v2737_v11  ;;  %5111 = vpow2.f32 %v2667_v59 }
 0x479   : > { %v6744_v51 = vpop.eup %5099  ;;  %v2669_v58 = vmul.f32 1.442695, %v2614_v33  ;;  %v4931_v33 = vunpack.i.h.bf16 %v6616_v21 }
 0x47a   : > { %v2743_v14 = vsel %vm1016_vm6, %v6744_v51, 0.0  ;;  %v6752_v46 = vpop.eup %5101 }
 0x47b   : > { %2720 = vadd.xlane.f32.xlu1 %v2719_v1  ;;  %2744 = vadd.xlane.f32.xlu0 %v2743_v14  ;;  %5113 = vpow2.f32 %v2669_v58  ;;  %v2740_v17 = vsel %vm1016_vm6, %v6752_v46, 0.0  ;;  %v4930_v58 = vunpack.i.l.bf16 %v6616_v21  ;;  %v4795_v1 = vpack.c.bf16 %v4921_v26, %v4920_v41  ;;  %v5197_v21 = vld [vmem:[%s5789_s5 + $0xa0] sm:$0x3] }
 0x47c   : > { %v4941_v14 = vunpack.i.h.bf16 %v6639_v31 }
 0x47d   : > { %v6754_v49 = vpop.eup %5103  ;;  %v4798_v56 = vpack.c.bf16 %v4931_v33, %v4930_v58  ;;  %v4936_v58 = vunpack.i.h.bf16 %v6666_v25 }
 0x47e   : > { %v6756_v27 = vpop.eup %5105  ;;  %v2746_v7 = vsel %vm1016_vm6, %v6754_v49, 0.0 }
 0x47f   : > { %v6762_v18 = vpop.eup %5107  ;;  %v2673_v10 = vpop.xlane.xlu0 %2672  ;;  %2741 = vadd.xlane.f32.xlu1 %v2740_v17  ;;  %2747 = vadd.xlane.f32.xlu0 %v2746_v7  ;;  %v2725_v24 = vsel %vm1016_vm6, %v6756_v27, 0.0  ;;  %v5198_v7 = vld [vmem:[%s5789_s5 + $0xd8] sm:$0x3] }
 0x480   : > { %5115 = vrcp.f32 %v2673_v10  ;;  %v6764_v8 = vpop.eup %5109  ;;  %v2728_v15 = vsel %vm1016_vm6, %v6762_v18, 0.0 }
 0x481   : > { %v6770_v40 = vpop.eup %5111  ;;  %v2731_v19 = vsel %vm1035_vm10, %v6764_v8, 0.0 }
 0x482   : > { %v2749_v34 = vsel %vm1016_vm6, %v6770_v40, 0.0 }
 0x483   : > { %2726 = vadd.xlane.f32.xlu1 %v2725_v24  ;;  %2729 = vadd.xlane.f32.xlu0 %v2728_v15 }
 0x485   : > { %v6776_v44 = vpop.eup %5113 }
 0x486   : > { %v2752_v36 = vsel %vm1035_vm10, %v6776_v44, 0.0 }
 0x487   : > { %2750 = vadd.xlane.f32.xlu1 %v2749_v34  ;;  %2732 = vadd.xlane.f32.xlu0 %v2731_v19  ;;  %v4925_v34 = vunpack.i.l.bf16 %v6604_v9 }
 0x48a   : > { %v5116_v59 = vpop.eup %5115 }
 0x48b   : > { %v2783_v11 = vmul.f32 %v5116_v59, %v6633_v2  ;;  %2753 = vadd.xlane.f32.xlu1 %v2752_v36  ;;  %v4940_v2 = vunpack.i.l.bf16 %v6639_v31  ;;  %v4926_v31 = vunpack.i.h.bf16 %v6604_v9 }
 0x48d   : > { %4519 = vmatmul.mubr.msk.f32.vlgmr.msra.gmra.mrb[84].mxu0 %vm1016_vm6, %v2783_v11  ;;  %v4801_v17 = vpack.c.bf16 %v4941_v14, %v4940_v2  ;;  %v4804_v36 = vpack.c.bf16 %v4926_v31, %v4925_v34 }
 0x48e   : > { %4796 = vmatpush3.bf16.msra.mxu0 %v4795_v1  ;;  %4521 = vmatprep.mubr.msk.f32.mxu0 %vm5208_vm0, %v7117_v39  ;;  %v4935_v1 = vunpack.i.l.bf16 %v6666_v25  ;;  %v4946_v25 = vunpack.i.h.bf16 %v6746_v61 }
 0x48f   : > { %4797 = vmatprep.subr.bf16.mxu0 %v7107_v0 }
 0x492   : > { %4799 = vmatpush3.bf16.msra.mxu0 %v4798_v56  ;;  %v4945_v56 = vunpack.i.l.bf16 %v6746_v61 }
 0x493   : > { %4800 = vmatprep.subr.bf16.mxu0 %v7107_v0 }
 0x496   : > { %4802 = vmatpush3.bf16.msra.mxu0 %v4801_v17 }
 0x497   : > { %4586 = vmatprep.subr.mxu0 %v7117_v39 }
 0x49c   : > { %3127 = vrot.lane.b32.xlu1 %v5197_v21, %s5210_s22 }
 0x49d   : > { %3276 = vrot.lane.b32.xlu0 %v5198_v7, %s5210_s22 }
 0x4b3   : > { %v2694_v10 = vpop.xlane.xlu1 %2693 }
 0x4b4   : > { %5117 = vrcp.f32 %v2694_v10  ;;  %v2676_v24 = vpop.xlane.xlu0 %2675 }
 0x4b5   : > { %5119 = vrcp.f32 %v2676_v24 }
 0x4b8   : > { %v2697_v15 = vpop.xlane.xlu1 %2696 }
 0x4b9   : > { %5121 = vrcp.f32 %v2697_v15 }
 0x4bc   : > { %v2679_v19 = vpop.xlane.xlu0 %2678 }
 0x4bd   : > { %5123 = vrcp.f32 %v2679_v19 }
 0x4be   : > { %v5118_v26 = vpop.eup %5117 }
 0x4bf   : > { %v5120_v41 = vpop.eup %5119  ;;  %v2790_v59 = vmul.f32 %v5118_v26, %v6646_v6 }
 0x4c0   : > { %v2682_v11 = vpop.xlane.xlu0 %2681  ;;  %v2784_v33 = vmul.f32 %v5120_v41, %v6648_v42  ;;  %v4807_v42 = vpack.c.bf16 %v4936_v58, %v4935_v1 }
 0x4c1   : > { %5125 = vrcp.f32 %v2682_v11  ;;  %4554 = vmatmul.mubr.msk.f32.vlgmr.msra.gmra.mrb[84].mxu1 %vm1016_vm6, %v2790_v59 }
 0x4c2   : > { %4522 = vmatmul.mubr.msk.f32.gmra.mrb[86].mxu0 %vm1016_vm6, %v2784_v33  ;;  %4805 = vmatpush3.bf16.msra.mxu1 %v4804_v36 }
 0x4c3   : > { %v5122_v9 = vpop.eup %5121  ;;  %4556 = vmatprep.mubr.msk.f32.mxu1 %vm5208_vm0, %v7117_v39  ;;  %4806 = vmatprep.subr.bf16.mxu1 %v7107_v0 }
 0x4c4   : > { %v2791_v6 = vmul.f32 %v5122_v9, %v6654_v4  ;;  %4524 = vmatprep.mubr.msk.f32.mxu0 %vm5208_vm0, %v7117_v39  ;;  %v4810_v4 = vpack.c.bf16 %v4946_v25, %v4945_v56 }
 0x4c6   : > { %4557 = vmatmul.mubr.msk.f32.gmra.mrb[86].mxu1 %vm1016_vm6, %v2791_v6 }
 0x4c7   : > { %v5124_v14 = vpop.eup %5123  ;;  %4808 = vmatpush3.bf16.msra.mxu1 %v4807_v42  ;;  %4559 = vmatprep.mubr.msk.f32.mxu1 %vm5208_vm0, %v7117_v39 }
 0x4c8   : > { %4809 = vmatprep.subr.bf16.mxu1 %v7107_v0  ;;  %v2785_v2 = vmul.f32 %v5124_v14, %v6658_v12 }
 0x4ca   : > { %4525 = vmatmul.mubr.msk.f32.gmra.mrb[88].mxu0 %vm1016_vm6, %v2785_v2 }
 0x4cb   : > { %v5126_v17 = vpop.eup %5125  ;;  %4811 = vmatpush3.bf16.msra.mxu1 %v4810_v4  ;;  %4527 = vmatprep.mubr.msk.f32.mxu0 %vm5208_vm0, %v7117_v39 }
 0x4cc   : > { %v2786_v61 = vmul.f32 %v5126_v17, %v6662_v3  ;;  %4621 = vmatprep.subr.mxu1 %v7117_v39 }
 0x4ce   : > { %4528 = vmatmul.mubr.msk.f32.gmra.mrb[90].mxu0 %vm1016_vm6, %v2786_v61 }
 0x4cf   : > { %4530 = vmatprep.mubr.msk.f32.mxu0 %vm5208_vm0, %v7117_v39 }
 0x4e8   : > { %v2700_v0 = vpop.xlane.xlu1 %2699 }
 0x4e9   : > { %5127 = vrcp.f32 %v2700_v0 }
 0x4ec   : > { %v2703_v12 = vpop.xlane.xlu0 %2702  ;;  %v2685_v21 = vpop.xlane.xlu1 %2684 }
 0x4ed   : > { %5129 = vrcp.f32 %v2703_v12 }
 0x4ee   : > { %5131 = vrcp.f32 %v2685_v21 }
 0x4f0   : > { %v2706_v7 = vpop.xlane.xlu0 %2705 }
 0x4f1   : > { %5133 = vrcp.f32 %v2706_v7 }
 0x4f3   : > { %v5128_v10 = vpop.eup %5127 }
 0x4f4   : > { %v2709_v24 = vpop.xlane.xlu1 %2708  ;;  %v2688_v15 = vpop.xlane.xlu0 %2687  ;;  %v2792_v3 = vmul.f32 %v5128_v10, %v6676_v62 }
 0x4f5   : > { %5135 = vrcp.f32 %v2709_v24 }
 0x4f6   : > { %5137 = vrcp.f32 %v2688_v15  ;;  %4560 = vmatmul.mubr.msk.f32.gmra.mrb[88].mxu1 %vm1016_vm6, %v2792_v3 }
 0x4f7   : > { %v5130_v31 = vpop.eup %5129  ;;  %4562 = vmatprep.mubr.msk.f32.mxu1 %vm5208_vm0, %v7117_v39 }
 0x4f8   : > { %v5132_v34 = vpop.eup %5131  ;;  %v2712_v19 = vpop.xlane.xlu1 %2711  ;;  %v2793_v41 = vmul.f32 %v5130_v31, %v6684_v30 }
 0x4f9   : > { %v2691_v26 = vpop.xlane.xlu0 %2690  ;;  %5139 = vrcp.f32 %v2712_v19  ;;  %v2787_v59 = vmul.f32 %v5132_v34, %v6681_v43 }
 0x4fa   : > { %5141 = vrcp.f32 %v2691_v26  ;;  %4563 = vmatmul.mubr.msk.f32.gmra.mrb[90].mxu1 %vm1016_vm6, %v2793_v41 }
 0x4fb   : > { %v5134_v36 = vpop.eup %5133  ;;  %4531 = vmatmul.mubr.msk.f32.gmra.mrb[92].mxu0 %vm1016_vm6, %v2787_v59  ;;  %4565 = vmatprep.mubr.msk.f32.mxu1 %vm5208_vm0, %v7117_v39 }
 0x4fc   : > { %v2715_v62 = vpop.xlane.xlu1 %2714  ;;  %v2794_v11 = vmul.f32 %v5134_v36, %v6692_v5  ;;  %4533 = vmatprep.mubr.msk.f32.mxu0 %vm5208_vm0, %v7117_v39 }
 0x4fd   : > { %v2736_v33 = vpop.xlane.xlu0 %2735 }
 0x4fe   : > { %4566 = vmatmul.mubr.msk.f32.gmra.mrb[92].mxu1 %vm1016_vm6, %v2794_v11  ;;  %5143 = vrcp.f32 %v2736_v33 }
 0x4ff   : > { %v5136_v30 = vpop.eup %5135  ;;  %4568 = vmatprep.mubr.msk.f32.mxu1 %vm5208_vm0, %v7117_v39  ;;  %5145 = vrcp.f32 %v2715_v62 }
 0x500   : > { %v5138_v43 = vpop.eup %5137  ;;  %v2718_v58 = vpop.xlane.xlu1 %2717  ;;  %v2795_v1 = vmul.f32 %v5136_v30, %v6699_v32 }
 0x501   : > { %v2788_v9 = vmul.f32 %v5138_v43, %v6696_v60  ;;  %v2724_v42 = vpop.xlane.xlu0 %2723 }
 0x502   : > { %4569 = vmatmul.mubr.msk.f32.gmra.mrb[94].mxu1 %vm1016_vm6, %v2795_v1 }
 0x503   : > { %v5140_v6 = vpop.eup %5139  ;;  %4534 = vmatmul.mubr.msk.f32.gmra.mrb[94].mxu0 %vm1016_vm6, %v2788_v9  ;;  %4571 = vmatprep.mubr.msk.f32.mxu1 %vm5208_vm0, %v7117_v39 }
 0x504   : > { %v5142_v5 = vpop.eup %5141  ;;  %v2739_v25 = vpop.xlane.xlu1 %2738  ;;  %4536 = vmatprep.mubr.msk.f32.mxu0 %vm5208_vm0, %v7117_v39  ;;  %v2796_v56 = vmul.f32 %v5140_v6, %v6708_v52 }
 0x505   : > { %v2789_v32 = vmul.f32 %v5142_v5, %v6706_v35  ;;  %5147 = vrcp.f32 %v2739_v25 }
 0x506   : > { %4572 = vmatmul.mubr.msk.f32.gmra.mrb[96].mxu1 %vm1016_vm6, %v2796_v56  ;;  %5149 = vrcp.f32 %v2718_v58 }
 0x507   : > { %4537 = vmatmul.mubr.msk.f32.gmra.mrb[96].mxu0 %vm1016_vm6, %v2789_v32  ;;  %4623 = vmatprep.mubr.msk.f32.mxu1 %vm5208_vm0, %v7117_v39 }
 0x508   : > { %v2721_v60 = vpop.xlane.xlu1 %2720  ;;  %v2745_v14 = vpop.xlane.xlu0 %2744  ;;  %4588 = vmatprep.mubr.msk.f32.mxu0 %vm5208_vm0, %v7117_v39 }
 0x509   : > { %v5144_v0 = vpop.eup %5143 }
 0x50a   : > { %v5146_v12 = vpop.eup %5145  ;;  %v2804_v21 = vmul.f32 %v5144_v0, %v6719_v54 }
 0x50b   : > { %v2797_v3 = vmul.f32 %v5146_v12, %v6715_v20 }
 0x50c   : > { %v2742_v2 = vpop.xlane.xlu1 %2741  ;;  %v2748_v4 = vpop.xlane.xlu0 %2747 }
 0x50d   : > { %5151 = vrcp.f32 %v2742_v2 }
 0x50e   : > { %5153 = vrcp.f32 %v2721_v60 }
 0x50f   : > { %5155 = vrcp.f32 %v2745_v14  ;;  %v5148_v24 = vpop.eup %5147 }
 0x510   : > { %v2727_v52 = vpop.xlane.xlu1 %2726  ;;  %v2730_v17 = vpop.xlane.xlu0 %2729  ;;  %5157 = vrcp.f32 %v2724_v42  ;;  %v2805_v34 = vmul.f32 %v5148_v24, %v6736_v53 }
 0x511   : > { %5159 = vrcp.f32 %v2748_v4  ;;  %v5150_v15 = vpop.eup %5149 }
 0x512   : > { %5161 = vrcp.f32 %v2727_v52  ;;  %v2798_v20 = vmul.f32 %v5150_v15, %v6722_v47 }
 0x514   : > { %v2751_v35 = vpop.xlane.xlu1 %2750  ;;  %v2733_v61 = vpop.xlane.xlu0 %2732 }
 0x515   : > { %5163 = vrcp.f32 %v2751_v35 }
 0x516   : > { %5165 = vrcp.f32 %v2730_v17 }
 0x517   : > { %v5152_v19 = vpop.eup %5151 }
 0x518   : > { %v2754_v7 = vpop.xlane.xlu1 %2753  ;;  %v3277_v10 = vpop.permute.xlu0 %3276  ;;  %v2806_v53 = vmul.f32 %v5152_v19, %v6752_v46 }
 0x519   : > { %4622 = vmatpush3.msk.msra.mxu1 %vm1347_vm13, %v3277_v10  ;;  %v5154_v54 = vpop.eup %5153  ;;  %5167 = vrcp.f32 %v2754_v7 }
 0x51a   : > { %4624 = vmatmul.mubr.msk.f32.vlgmr.msra.gmra.mrb[98].mxu1 %vm1016_vm6, %v2804_v21  ;;  %v5156_v26 = vpop.eup %5155  ;;  %v2799_v59 = vmul.f32 %v5154_v54, %v6741_v13  ;;  %5169 = vrcp.f32 %v2733_v61 }
 0x51b   : > { %4626 = vmatprep.mubr.msk.f32.mxu1 %vm5208_vm0, %v7117_v39  ;;  %v5158_v41 = vpop.eup %5157  ;;  %v2807_v47 = vmul.f32 %v5156_v26, %v6744_v51 }
 0x51c   : > { %v3128_v31 = vpop.permute.xlu1 %3127  ;;  %v5160_v36 = vpop.eup %5159  ;;  %v2800_v62 = vmul.f32 %v5158_v41, %v6728_v37 }
 0x51d   : > { %4587 = vmatpush3.msk.msra.mxu0 %vm1347_vm13, %v3128_v31  ;;  %v5162_v46 = vpop.eup %5161  ;;  %v2808_v11 = vmul.f32 %v5160_v36, %v6754_v49 }
 0x51e   : > { %4589 = vmatmul.mubr.msk.f32.vlgmr.msra.gmra.mrb[98].mxu0 %vm1016_vm6, %v2797_v3  ;;  %4627 = vmatmul.mubr.msk.f32.gmra.mrb[100].mxu1 %vm1016_vm6, %v2805_v34  ;;  %v2801_v33 = vmul.f32 %v5162_v46, %v6756_v27 }
 0x51f   : > { %4591 = vmatprep.mubr.msk.f32.mxu0 %vm5208_vm0, %v7117_v39  ;;  %4629 = vmatprep.mubr.msk.f32.mxu1 %vm5208_vm0, %v7117_v39  ;;  %v5164_v13 = vpop.eup %5163 }
 0x520   : > { %v5166_v51 = vpop.eup %5165  ;;  %v2809_v30 = vmul.f32 %v5164_v13, %v6770_v40 }
 0x521   : > { %v2802_v37 = vmul.f32 %v5166_v51, %v6762_v18 }
 0x522   : > { %4592 = vmatmul.mubr.msk.f32.gmra.mrb[100].mxu0 %vm1016_vm6, %v2798_v20  ;;  %4630 = vmatmul.mubr.msk.f32.gmra.mrb[102].mxu1 %vm1016_vm6, %v2806_v53 }
 0x523   : > { %4594 = vmatprep.mubr.msk.f32.mxu0 %vm5208_vm0, %v7117_v39  ;;  %4632 = vmatprep.mubr.msk.f32.mxu1 %vm5208_vm0, %v7117_v39  ;;  %v5168_v43 = vpop.eup %5167 }
 0x524   : > { %v2810_v49 = vmul.f32 %v5168_v43, %v6776_v44  ;;  %v5170_v58 = vpop.eup %5169 }
 0x525   : > { %v2803_v27 = vmul.f32 %v5170_v58, %v6764_v8 }
 0x526   : > { %4595 = vmatmul.mubr.msk.f32.gmra.mrb[102].mxu0 %vm1016_vm6, %v2799_v59  ;;  %4633 = vmatmul.mubr.msk.f32.gmra.mrb[104].mxu1 %vm1016_vm6, %v2807_v47 }
 0x527   : > { %4597 = vmatprep.mubr.msk.f32.mxu0 %vm5208_vm0, %v7117_v39  ;;  %4635 = vmatprep.mubr.msk.f32.mxu1 %vm5208_vm0, %v7117_v39 }
 0x52a   : > { %4598 = vmatmul.mubr.msk.f32.gmra.mrb[104].mxu0 %vm1016_vm6, %v2800_v62  ;;  %4636 = vmatmul.mubr.msk.f32.gmra.mrb[106].mxu1 %vm1016_vm6, %v2808_v11 }
 0x52b   : > { %4600 = vmatprep.mubr.msk.f32.mxu0 %vm5208_vm0, %v7117_v39  ;;  %4638 = vmatprep.mubr.msk.f32.mxu1 %vm5208_vm0, %v7117_v39 }
 0x52e   : > { %4601 = vmatmul.mubr.msk.f32.gmra.mrb[106].mxu0 %vm1016_vm6, %v2801_v33  ;;  %4639 = vmatmul.mubr.msk.f32.gmra.mrb[108].mxu1 %vm1016_vm6, %v2809_v30 }
 0x52f   : > { %4603 = vmatprep.mubr.msk.f32.mxu0 %vm5208_vm0, %v7117_v39  ;;  %4641 = vmatprep.mubr.msk.f32.mxu1 %vm5208_vm0, %v7117_v39 }
 0x532   : > { %4604 = vmatmul.mubr.msk.f32.gmra.mrb[108].mxu0 %vm1016_vm6, %v2802_v37  ;;  %4642 = vmatmul.mubr.msk.f32.gmra.mrb[110].mxu1 %vm1016_vm6, %v2810_v49 }
 0x533   : > { %4606 = vmatprep.mubr.msk.f32.mxu0 %vm5208_vm0, %v7117_v39 }
 0x536   : > { %4607 = vmatmul.mubr.msk.f32.gmra.mrb[110].mxu0 %vm1016_vm6, %v2803_v27 }
 0x560   : > { %v2926_v40 = vpop.f32.mrb[84].mxu0 }
 0x561   : > { %3435 = vrot.lane.b32.xlu1 %v2926_v40, %s5212_s6  ;;  %v4520_v1 = vpop.f32.mrb[85].mxu0 }
 0x594   : > { %v3075_v18 = vpop.f32.mrb[84].mxu1 }
 0x595   : > { %v2931_v9 = vpop.f32.mrb[86].mxu0  ;;  %v4555_v44 = vpop.f32.mrb[85].mxu1  ;;  %3449 = vrot.lane.b32.xlu1 %v3075_v18, %s5212_s6 }
 0x596   : > { %v4523_v6 = vpop.f32.mrb[87].mxu0 }
 0x599   : > { %v3080_v5 = vpop.f32.mrb[86].mxu1  ;;  %3437 = vrot.lane.b32.xlu1 %v2931_v9, %s5212_s6 }
 0x59a   : > { %v4558_v42 = vpop.f32.mrb[87].mxu1  ;;  %3451 = vrot.lane.b32.xlu0 %v3080_v5, %s5212_s6 }
 0x59d   : > { %v2936_v39 = vpop.f32.mrb[88].mxu0 }
 0x59e   : > { %3439 = vrot.lane.b32.xlu1 %v2936_v39, %s5212_s6  ;;  %v4526_v8 = vpop.f32.mrb[89].mxu0 }
 0x5a1   : > { %v2941_v25 = vpop.f32.mrb[90].mxu0 }
 0x5a2   : > { %v4529_v56 = vpop.f32.mrb[91].mxu0 }
 0x5c9   : > { %v3085_v32 = vpop.f32.mrb[88].mxu1 }
 0x5ca   : > { %v4561_v60 = vpop.f32.mrb[89].mxu1  ;;  %3453 = vrot.lane.b32.xlu1 %v3085_v32, %s5212_s6 }
 0x5cd   : > { %v3090_v2 = vpop.f32.mrb[90].mxu1 }
 0x5ce   : > { %v2946_v14 = vpop.f32.mrb[92].mxu0  ;;  %3455 = vrot.lane.b32.xlu0 %v3090_v2, %s5212_s6  ;;  %v4564_v4 = vpop.f32.mrb[91].mxu1  ;;  %3441 = vrot.lane.b32.xlu1 %v2941_v25, %s5212_s6 }
 0x5cf   : > { %v4532_v52 = vpop.f32.mrb[93].mxu0 }
 0x5d1   : > { %v3095_v17 = vpop.f32.mrb[92].mxu1 }
 0x5d2   : > { %v4567_v35 = vpop.f32.mrb[93].mxu1  ;;  %3443 = vrot.lane.b32.xlu1 %v2946_v14, %s5212_s6 }
 0x5d3   : > { %v3436_v61 = vpop.permute.xlu1 %3435 }
 0x5d4   : > { %v3519_v0 = vsel %vm363_vm1, %v6373_v22, %v3436_v61  ;;  %v7154_v61 = vld [vmem:[#allocation11_spill] sm:$0xff] }
 0x5d5   : > { %3548 = vst.msk [vmem:[%s6924_s9] sm:$0xff] %vm3547_vm14, %v3519_v0  ;;  %v3100_v21 = vpop.f32.mrb[94].mxu1 }
 0x5d6   : > { %v2951_v12 = vpop.f32.mrb[94].mxu0  ;;  %3459 = vrot.lane.b32.xlu0 %v3100_v21, %s5212_s6  ;;  %v4570_v7 = vpop.f32.mrb[95].mxu1  ;;  %3457 = vrot.lane.b32.xlu1 %v3095_v17, %s5212_s6 }
 0x5d7   : > { %v4535_v10 = vpop.f32.mrb[95].mxu0  ;;  %v7156_v7 = vld [vmem:[#allocation10_spill] sm:$0xff] }
 0x5d9   : > { %v3105_v15 = vpop.f32.mrb[96].mxu1 }
 0x5da   : > { %v2956_v24 = vpop.f32.mrb[96].mxu0  ;;  %v4573_v3 = vpop.f32.mrb[97].mxu1  ;;  %3445 = vrot.lane.b32.xlu1 %v2951_v12, %s5212_s6  ;;  %v7155_v12 = vld [vmem:[#allocation9_spill] sm:$0xff] }
 0x5db   : > { %3447 = vrot.lane.b32.xlu0 %v2956_v24, %s5212_s6  ;;  %v4538_v31 = vpop.f32.mrb[97].mxu0  ;;  %v7157_v24 = vld [vmem:[#allocation12_spill] sm:$0xff] }
 0x5de   : > { %3461 = vrot.lane.b32.xlu1 %v3105_v15, %s5212_s6 }
 0x5ed   : > { %v3373_v22 = vpop.f32.mrb[98].mxu1 }
 0x5ee   : > { %v4625_v34 = vpop.f32.mrb[99].mxu1  ;;  %3477 = vrot.lane.b32.xlu1 %v3373_v22, %s5212_s6  ;;  %v7158_v22 = vld [vmem:[#allocation16_spill] sm:$0xff] }
 0x5f1   : > { %v3224_v19 = vpop.f32.mrb[98].mxu0  ;;  %v3378_v54 = vpop.f32.mrb[100].mxu1 }
 0x5f2   : > { %v4628_v20 = vpop.f32.mrb[101].mxu1  ;;  %3463 = vrot.lane.b32.xlu0 %v3224_v19, %s5212_s6  ;;  %v4590_v53 = vpop.f32.mrb[99].mxu0  ;;  %v7159_v19 = vld [vmem:[#allocation13_spill] sm:$0xff] }
 0x5f5   : > { %v3229_v26 = vpop.f32.mrb[100].mxu0  ;;  %v3383_v41 = vpop.f32.mrb[102].mxu1 }
 0x5f6   : > { %v4631_v59 = vpop.f32.mrb[103].mxu1  ;;  %3479 = vrot.lane.b32.xlu0 %v3378_v54, %s5212_s6  ;;  %3465 = vrot.lane.b32.xlu1 %v3229_v26, %s5212_s6  ;;  %v4593_v47 = vpop.f32.mrb[101].mxu0  ;;  %v7160_v26 = vld [vmem:[#allocation6_spill] sm:$0xff] }
 0x5f7   : > { %v7161_v59 = vld [vmem:[#allocation17_spill] sm:$0xff] }
 0x5f9   : > { %v3234_v36 = vpop.f32.mrb[102].mxu0  ;;  %v3388_v46 = vpop.f32.mrb[104].mxu1 }
 0x5fa   : > { %v4634_v62 = vpop.f32.mrb[105].mxu1  ;;  %3481 = vrot.lane.b32.xlu1 %v3383_v41, %s5212_s6  ;;  %3467 = vrot.lane.b32.xlu0 %v3234_v36, %s5212_s6  ;;  %v4596_v11 = vpop.f32.mrb[103].mxu0 }
 0x5fb   : > { %v7162_v62 = vld [vmem:[#allocation7_spill] sm:$0xff] }
 0x5fd   : > { %v3239_v13 = vpop.f32.mrb[104].mxu0  ;;  %v3393_v51 = vpop.f32.mrb[106].mxu1 }
 0x5fe   : > { %v4637_v33 = vpop.f32.mrb[107].mxu1  ;;  %3483 = vrot.lane.b32.xlu0 %v3388_v46, %s5212_s6  ;;  %3469 = vrot.lane.b32.xlu1 %v3239_v13, %s5212_s6  ;;  %v4599_v30 = vpop.f32.mrb[105].mxu0  ;;  %v7163_v13 = vld [vmem:[#allocation19_spill] sm:$0xff] }
 0x601   : > { %v3244_v43 = vpop.f32.mrb[106].mxu0  ;;  %v3398_v37 = vpop.f32.mrb[108].mxu1 }
 0x602   : > { %v4640_v49 = vpop.f32.mrb[109].mxu1  ;;  %3485 = vrot.lane.b32.xlu1 %v3393_v51, %s5212_s6  ;;  %3471 = vrot.lane.b32.xlu0 %v3244_v43, %s5212_s6  ;;  %v4602_v58 = vpop.f32.mrb[107].mxu0  ;;  %v7164_v43 = vld [vmem:[#allocation14_spill] sm:$0xff] }
 0x603   : > { %v7165_v49 = vld [vmem:[#allocation8_spill] sm:$0xff] }
 0x605   : > { %v3249_v27 = vpop.f32.mrb[108].mxu0  ;;  %v3403_v40 = vpop.f32.mrb[110].mxu1 }
 0x606   : > { %v4643_v1 = vpop.f32.mrb[111].mxu1  ;;  %3473 = vrot.lane.b32.xlu1 %v3249_v27, %s5212_s6  ;;  %v4605_v18 = vpop.f32.mrb[109].mxu0 }
 0x607   : > { %v3450_v9 = vpop.permute.xlu1 %3449 }
 0x608   : > { %v3526_v44 = vsel %vm363_vm1, %v6375_v38, %v3450_v9 }
 0x609   : > { %3556 = vst.msk [vmem:[%s6924_s9 + $0x38] sm:$0xff] %vm3547_vm14, %v3526_v44  ;;  %v3254_v6 = vpop.f32.mrb[110].mxu0  ;;  %v7167_v44 = vld [vmem:[#allocation2_spill] sm:$0xff] }
 0x60a   : > { %3489 = vrot.lane.b32.xlu1 %v3403_v40, %s5212_s6  ;;  %3475 = vrot.lane.b32.xlu0 %v3254_v6, %s5212_s6  ;;  %v4608_v5 = vpop.f32.mrb[111].mxu0  ;;  %v7166_v40 = vld [vmem:[#allocation15_spill] sm:$0xff] }
 0x60b   : > { %v3438_v42 = vpop.permute.xlu1 %3437  ;;  %v7168_v5 = vld [vmem:[#allocation20_spill] sm:$0xff] }
 0x60c   : > { %v3452_v39 = vpop.permute.xlu0 %3451  ;;  %v3520_v8 = vsel %vm363_vm1, %v6377_v57, %v3438_v42 }
 0x60d   : > { %v3527_v25 = vsel %vm363_vm1, %v6379_v16, %v3452_v39  ;;  %3549 = vst.msk [vmem:[%s6924_s9 + $0x8] sm:$0xff] %vm3547_vm14, %v3520_v8  ;;  %v7169_v8 = vld [vmem:[#allocation18_spill] sm:$0xff] }
 0x60e   : > { %3557 = vst.msk [vmem:[%s6924_s9 + $0x40] sm:$0xff] %vm3547_vm14, %v3527_v25  ;;  %3487 = vrot.lane.b32.xlu0 %v3398_v37, %s5212_s6 }
 0x610   : > { %v3440_v38 = vpop.permute.xlu1 %3439 }
 0x611   : > { %v3521_v56 = vsel %vm363_vm1, %v6381_v48, %v3440_v38 }
 0x612   : > { %3550 = vst.msk [vmem:[%s6924_s9 + $0x10] sm:$0xff] %vm3547_vm14, %v3521_v56 }
 0x63c   : > { %v3454_v32 = vpop.permute.xlu1 %3453 }
 0x63d   : > { %v3528_v57 = vsel %vm363_vm1, %v6383_v45, %v3454_v32 }
 0x63e   : > { %3558 = vst.msk [vmem:[%s6924_s9 + $0x48] sm:$0xff] %vm3547_vm14, %v3528_v57 }
 0x640   : > { %v3456_v16 = vpop.permute.xlu0 %3455  ;;  %v3442_v60 = vpop.permute.xlu1 %3441 }
 0x641   : > { %v3529_v14 = vsel %vm363_vm1, %v6387_v23, %v3456_v16  ;;  %v3522_v2 = vsel %vm363_vm1, %v6385_v50, %v3442_v60 }
 0x642   : > { %3551 = vst.msk [vmem:[%s6924_s9 + $0x18] sm:$0xff] %vm3547_vm14, %v3522_v2  ;;  %3559 = vst.msk [vmem:[%s6924_s9 + $0x50] sm:$0xff] %vm3547_vm14, %v3529_v14 }
 0x644   : > { %v3444_v48 = vpop.permute.xlu1 %3443 }
 0x645   : > { %v3523_v45 = vsel %vm363_vm1, %v6389_v29, %v3444_v48 }
 0x646   : > { %3552 = vst.msk [vmem:[%s6924_s9 + $0x20] sm:$0xff] %vm3547_vm14, %v3523_v45 }
 0x648   : > { %v3460_v4 = vpop.permute.xlu0 %3459  ;;  %v3458_v52 = vpop.permute.xlu1 %3457 }
 0x649   : > { %v3530_v23 = vsel %vm363_vm1, %v6391_v63, %v3458_v52  ;;  %v3531_v0 = vsel %vm363_vm1, %v7154_v61, %v3460_v4 }
 0x64a   : > { %3560 = vst.msk [vmem:[%s6924_s9 + $0x58] sm:$0xff] %vm3547_vm14, %v3530_v23  ;;  %3561 = vst.msk [vmem:[%s6924_s9 + $0x60] sm:$0xff] %vm3547_vm14, %v3531_v0 }
 0x64c   : > { %v3446_v50 = vpop.permute.xlu1 %3445 }
 0x64d   : > { %v3448_v17 = vpop.permute.xlu0 %3447  ;;  %v3524_v35 = vsel %vm363_vm1, %v6393_v55, %v3446_v50 }
 0x64e   : > { %v3525_v29 = vsel %vm363_vm1, %v6397_v28, %v3448_v17  ;;  %3553 = vst.msk [vmem:[%s6924_s9 + $0x28] sm:$0xff] %vm3547_vm14, %v3524_v35 }
 0x64f   : > { %3555 = vst.msk [vmem:[%s6924_s9 + $0x30] sm:$0x3] %vm3554_vm15, %v3525_v29 }
 0x650   : > { %v3462_v63 = vpop.permute.xlu1 %3461 }
 0x651   : > { %v3532_v21 = vsel %vm363_vm1, %v7155_v12, %v3462_v63 }
 0x652   : > { %3562 = vst.msk [vmem:[%s6924_s9 + $0x68] sm:$0x3] %vm3554_vm15, %v3532_v21 }
 0x660   : > { %v3478_v55 = vpop.permute.xlu1 %3477 }
 0x661   : > { %v3540_v15 = vsel %vm363_vm1, %v7157_v24, %v3478_v55 }
 0x662   : > { %3570 = vst.msk [vmem:[%s6924_s9 + $0xa8] sm:$0xff] %vm3547_vm14, %v3540_v15 }
 0x664   : > { %v3464_v28 = vpop.permute.xlu0 %3463 }
 0x665   : > { %v3533_v10 = vsel %vm363_vm1, %v7156_v7, %v3464_v28 }
 0x666   : > { %3563 = vst.msk [vmem:[%s6924_s9 + $0x70] sm:$0xff] %vm3547_vm14, %v3533_v10 }
 0x668   : > { %v3480_v3 = vpop.permute.xlu0 %3479  ;;  %v3466_v31 = vpop.permute.xlu1 %3465 }
 0x669   : > { %v3541_v34 = vsel %vm363_vm1, %v7158_v22, %v3480_v3  ;;  %v3534_v54 = vsel %vm363_vm1, %v7159_v19, %v3466_v31 }
 0x66a   : > { %3564 = vst.msk [vmem:[%s6924_s9 + $0x78] sm:$0xff] %vm3547_vm14, %v3534_v54  ;;  %3571 = vst.msk [vmem:[%s6924_s9 + $0xb0] sm:$0xff] %vm3547_vm14, %v3541_v34 }
 0x66c   : > { %v3482_v20 = vpop.permute.xlu1 %3481  ;;  %v3468_v53 = vpop.permute.xlu0 %3467 }
 0x66d   : > { %v3542_v41 = vsel %vm363_vm1, %v7160_v26, %v3482_v20  ;;  %v3535_v47 = vsel %vm363_vm1, %v7161_v59, %v3468_v53 }
 0x66e   : > { %3565 = vst.msk [vmem:[%s6924_s9 + $0x80] sm:$0xff] %vm3547_vm14, %v3535_v47  ;;  %3572 = vst.msk [vmem:[%s6924_s9 + $0xb8] sm:$0xff] %vm3547_vm14, %v3542_v41 }
 0x670   : > { %v3484_v36 = vpop.permute.xlu0 %3483  ;;  %v3470_v46 = vpop.permute.xlu1 %3469 }
 0x671   : > { %v3543_v11 = vsel %vm363_vm1, %v7162_v62, %v3484_v36  ;;  %v3536_v51 = vsel %vm363_vm1, %v7163_v13, %v3470_v46 }
 0x672   : > { %3566 = vst.msk [vmem:[%s6924_s9 + $0x88] sm:$0xff] %vm3547_vm14, %v3536_v51  ;;  %3573 = vst.msk [vmem:[%s6924_s9 + $0xc0] sm:$0xff] %vm3547_vm14, %v3543_v11 }
 0x674   : > { %v3486_v33 = vpop.permute.xlu1 %3485  ;;  %v3472_v30 = vpop.permute.xlu0 %3471 }
 0x675   : > { %v3544_v37 = vsel %vm363_vm1, %v7164_v43, %v3486_v33  ;;  %v3537_v58 = vsel %vm363_vm1, %v7165_v49, %v3472_v30 }
 0x676   : > { %3567 = vst.msk [vmem:[%s6924_s9 + $0x90] sm:$0xff] %vm3547_vm14, %v3537_v58  ;;  %3574 = vst.msk [vmem:[%s6924_s9 + $0xc8] sm:$0xff] %vm3547_vm14, %v3544_v37 }
 0x678   : > { %v3474_v27 = vpop.permute.xlu1 %3473 }
 0x679   : > { %v3538_v1 = vsel %vm363_vm1, %v7166_v40, %v3474_v27 }
 0x67a   : > { %3568 = vst.msk [vmem:[%s6924_s9 + $0x98] sm:$0xff] %vm3547_vm14, %v3538_v1 }
 0x67c   : > { %v3490_v18 = vpop.permute.xlu1 %3489  ;;  %v3476_v9 = vpop.permute.xlu0 %3475 }
 0x67d   : > { %v3546_v6 = vsel %vm363_vm1, %v7167_v44, %v3490_v18  ;;  %v3539_v42 = vsel %vm363_vm1, %v7168_v5, %v3476_v9 }
 0x67e   : > { %3569 = vst.msk [vmem:[%s6924_s9 + $0xa0] sm:$0x3] %vm3554_vm15, %v3539_v42  ;;  %3576 = vst.msk [vmem:[%s6924_s9 + $0xd8] sm:$0x3] %vm3554_vm15, %v3546_v6 }
 0x680   : > { %v3488_v39 = vpop.permute.xlu0 %3487 }
 0x681   : > { %v3545_v25 = vsel %vm363_vm1, %v7169_v8, %v3488_v39 }
 0x682   : > { %3575 = vst.msk [vmem:[%s6924_s9 + $0xd0] sm:$0xff] %vm3547_vm14, %v3545_v25 }
 0x683 PF: > { %s14_s15 = sadd.s32 1, %s5205_s15  }
 0x684   : > { %p11_p4 = scmp.ge.s32.totalorder %s14_s15, 4  }
 0x686   :  { %13 = sbr.rel (!%p11_p4) target bundleno = 1 (0x1), region = 75 }

// kernel: tkl3_forward.5
= control target key start
LH: loop header
LB: loop body
LE: loop exit
PB: predicated region body
PF: predicated region fallthrough
CT: control target
= control target key end

     0   :  { %s1463_s12 = smov 0   ;;  %s1808_s0 = inlined_call_operand.vmem [shape: f32[8,8,32], index: 0, kind: input, shape index: {}]   ;;  %s1809_s1 = inlined_call_operand.vmem [shape: f32[8,40,32], index: 1, kind: input, shape index: {}]   ;;  %s1810_s2 = inlined_call_operand.vmem [shape: f32[8,1,40], index: 2, kind: input, shape index: {}]   ;;  %s1811_s3 = inlined_call_operand.vmem [shape: f32[8,8,8,40], index: 3, kind: output, shape index: {}]  }
   0x1 LB: > { %s1100_s13 = sadd.s32 4294967295, %s1438_s12   ;;  %p1104_p0 = scmp.ge.s32.totalorder %s1438_s12, 1  ;;  %s1438_s12 = sphi %s1463_s12, %s13_s12  }
   0x2   : > { %p160_p1 = scmp.lt.s32.totalorder %s1438_s12, 3 }
   0x4   : > { %p161_p2 = pnand %p1104_p0, %p160_p1 }
   0x5   : > { %s1105_s14 = sshll.u32 (!%p161_p2), %s1100_s13, 2  ;;  %vm252_vm0 = vcmask (!%p161_p2), 261120   ;;  %vm1441_vm1 = vmmov (!%p161_p2), 0   ;;  %vm817_vm3 = vcmask (!%p161_p2), 326656  }
   0x6   : > { %164 = sbr.rel (%p161_p2) target bundleno = 482 (0x1e2), region = 32  ;;  %p196_p3 = scmp.lt.s32.totalorder (!%p161_p2), %s1105_s14, 7  ;;  %vm1641_vm2 = vmpackc.low (!%p161_p2), %vm252_vm0, %vm252_vm0 }
   0xd   : > { %s1815_s14 = smov (!%p196_p3, %s1105_s14), 7 }
   0xe   : > { %s1308_s15 = smul.u32 40, %s1815_s14  ;;  %s1106_s19 = sshll.u32 %s1815_s14, 3 }
   0xf   : > { %s1559_s22 = scalar_lea.vmem %s1808_s0, %s1106_s19  ;;  %s1716_s25 = scalar_lea.vmem %s1810_s2, %s1815_s14 }
  0x10   : > { %s1477_s18 = scalar_lea.vmem %s1809_s1, %s1308_s15  ;;  %v1568_v40 = vld [vmem:[%s1559_s22 + $0x8] sm:$0xff]  ;;  %v1571_v41 = vld [vmem:[%s1559_s22] sm:$0xff]  ;;  %s1199_s26 = sshll.u32 %s1815_s14, 6 }
  0x11   : > { %v1480_v0 = vld [vmem:[%s1477_s18 + $0x28] sm:$0xff]  ;;  %v1483_v1 = vld [vmem:[%s1477_s18] sm:$0xff]  ;;  %v1486_v2 = vld [vmem:[%s1477_s18 + $0x30] sm:$0xff]  ;;  %v249_v44 = vmul.f32 %v1568_v40, %v1568_v40  ;;  %v248_v45 = vmul.f32 %v1571_v41, %v1571_v41  ;;  %s1725_s29 = scalar_lea.vmem %s1811_s3, %s1199_s26 }
  0x12   : > { %v282_v3 = vmul.f32 %v1480_v0, %v1480_v0  ;;  %v277_v4 = vmul.f32 %v1483_v1, %v1483_v1  ;;  %v283_v5 = vmul.f32 %v1486_v2, %v1486_v2  ;;  %v1495_v6 = vld [vmem:[%s1477_s18 + $0x8] sm:$0xff]  ;;  %v1500_v8 = vld [vmem:[%s1477_s18 + $0x18] sm:$0xff]  ;;  %v1503_v9 = vld [vmem:[%s1477_s18 + $0x10] sm:$0xff] }
  0x13   : > { %v278_v7 = vmul.f32 %v1495_v6, %v1495_v6  ;;  %v280_v14 = vmul.f32 %v1500_v8, %v1500_v8  ;;  %v279_v15 = vmul.f32 %v1503_v9, %v1503_v9  ;;  %v1514_v16 = vld [vmem:[%s1477_s18 + $0x40] sm:$0xff]  ;;  %v1517_v17 = vld [vmem:[%s1477_s18 + $0x38] sm:$0xff]  ;;  %v1526_v22 = vld [vmem:[%s1477_s18 + $0x48] sm:$0xff]  ;;  %v256_v48 = vsel %vm252_vm0, %v249_v44, 0.0 }
  0x14   : > { %v312_v10 = vsel %vm252_vm0, %v282_v3, 0.0  ;;  %v297_v11 = vsel %vm252_vm0, %v277_v4, 0.0  ;;  %v315_v12 = vsel %vm252_vm0, %v283_v5, 0.0  ;;  %v285_v20 = vmul.f32 %v1514_v16, %v1514_v16  ;;  %v1529_v23 = vld [vmem:[%s1477_s18 + $0x20] sm:$0xff]  ;;  %v1538_v28 = vld [vmem:[%s1477_s18 + $0x58] sm:$0xff]  ;;  %v1541_v29 = vld [vmem:[%s1477_s18 + $0x50] sm:$0xff] }
  0x15   : > { %313 = vadd.xlane.f32.xlu1 %v312_v10  ;;  %298 = vadd.xlane.f32.xlu0 %v297_v11  ;;  %v300_v13 = vsel %vm252_vm0, %v278_v7, 0.0  ;;  %v306_v18 = vsel %vm252_vm0, %v280_v14, 0.0  ;;  %v303_v19 = vsel %vm252_vm0, %v279_v15, 0.0  ;;  %v284_v21 = vmul.f32 %v1517_v17, %v1517_v17  ;;  %v1551_v34 = vld [vmem:[%s1477_s18 + $0x80] sm:$0xff]  ;;  %v1554_v35 = vld [vmem:[%s1477_s18 + $0x78] sm:$0xff]  ;;  %v1580_v46 = vld [vmem:[%s1477_s18 + $0x68] sm:$0xff] }
  0x16   : > { %v321_v24 = vsel %vm252_vm0, %v285_v20, 0.0  ;;  %v286_v26 = vmul.f32 %v1526_v22, %v1526_v22  ;;  %v281_v27 = vmul.f32 %v1529_v23, %v1529_v23  ;;  %v288_v32 = vmul.f32 %v1538_v28, %v1538_v28  ;;  %v1583_v47 = vld [vmem:[%s1477_s18 + $0x60] sm:$0xff]  ;;  %v1592_v52 = vld [vmem:[%s1477_s18 + $0x90] sm:$0xff]  ;;  %v1595_v53 = vld [vmem:[%s1477_s18 + $0x88] sm:$0xff] }
  0x17   : > { %v318_v25 = vsel %vm252_vm0, %v284_v21, 0.0  ;;  %v287_v33 = vmul.f32 %v1541_v29, %v1541_v29  ;;  %v293_v38 = vmul.f32 %v1551_v34, %v1551_v34  ;;  %v292_v39 = vmul.f32 %v1554_v35, %v1554_v35  ;;  %v1604_v58 = vld [vmem:[%s1477_s18 + $0x70] sm:$0xff]  ;;  %v1607_v59 = vld [vmem:[%s1477_s18 + $0x98] sm:$0xff] }
  0x18   : > { %v324_v30 = vsel %vm252_vm0, %v286_v26, 0.0  ;;  %v309_v31 = vsel %vm252_vm0, %v281_v27, 0.0  ;;  %v330_v36 = vsel %vm252_vm0, %v288_v32, 0.0  ;;  %v253_v49 = vsel %vm252_vm0, %v248_v45, 0.0  ;;  %v1616_v3 = vld [vmem:[%s1559_s22 + $0x10] sm:$0xff]  ;;  %v1619_v4 = vld [vmem:[%s1559_s22 + $0x18] sm:$0xff] }
  0x19   : > { %316 = vadd.xlane.f32.xlu1 %v315_v12  ;;  %301 = vadd.xlane.f32.xlu0 %v300_v13  ;;  %v327_v37 = vsel %vm252_vm0, %v287_v33, 0.0  ;;  %v345_v42 = vsel %vm252_vm0, %v293_v38, 0.0  ;;  %v342_v43 = vsel %vm252_vm0, %v292_v39, 0.0  ;;  %v290_v50 = vmul.f32 %v1580_v46, %v1580_v46 }
  0x1a   : > { %v289_v51 = vmul.f32 %v1583_v47, %v1583_v47  ;;  %v295_v56 = vmul.f32 %v1592_v52, %v1592_v52  ;;  %v294_v57 = vmul.f32 %v1595_v53, %v1595_v53  ;;  %v291_v62 = vmul.f32 %v1604_v58, %v1604_v58 }
  0x1b   : > { %v336_v54 = vsel %vm252_vm0, %v290_v50, 0.0  ;;  %v296_v63 = vmul.f32 %v1607_v59, %v1607_v59  ;;  %v1440_v5 = vmov 0.0|0.0   ;;  %v250_v11 = vmul.f32 %v1616_v3, %v1616_v3 }
  0x1c   : > { %v333_v55 = vsel %vm252_vm0, %v289_v51, 0.0  ;;  %v351_v60 = vsel %vm252_vm0, %v295_v56, 0.0  ;;  %v348_v61 = vsel %vm252_vm0, %v294_v57, 0.0  ;;  %1276 = vmatprep.subr.bf16.mxu0 %v1440_v5  ;;  %1284 = vmatprep.subr.bf16.mxu1 %v1440_v5  ;;  %v339_v7 = vsel %vm252_vm0, %v291_v62, 0.0 }
  0x1d   : > { %307 = vadd.xlane.f32.xlu1 %v306_v18  ;;  %304 = vadd.xlane.f32.xlu0 %v303_v19  ;;  %v354_v10 = vsel %vm252_vm0, %v296_v63, 0.0  ;;  %v251_v12 = vmul.f32 %v1619_v4, %v1619_v4  ;;  %v259_v13 = vsel %vm252_vm0, %v250_v11, 0.0  ;;  %v1442_v15 = vmov 0.0  }
  0x1e   : > { %1234 = vmatprep.mubr.msk.f32.mxu0 %vm1441_vm1, %v1442_v15  ;;  %1247 = vmatprep.mubr.msk.f32.mxu1 %vm1441_vm1, %v1442_v15 }
  0x1f   : > { %v262_v14 = vsel %vm252_vm0, %v251_v12, 0.0 }
  0x21   : > { %322 = vadd.xlane.f32.xlu1 %v321_v24  ;;  %319 = vadd.xlane.f32.xlu0 %v318_v25 }
  0x25   : > { %325 = vadd.xlane.f32.xlu1 %v324_v30  ;;  %310 = vadd.xlane.f32.xlu0 %v309_v31 }
  0x29   : > { %331 = vadd.xlane.f32.xlu1 %v330_v36  ;;  %328 = vadd.xlane.f32.xlu0 %v327_v37 }
  0x2d   : > { %346 = vadd.xlane.f32.xlu1 %v345_v42  ;;  %343 = vadd.xlane.f32.xlu0 %v342_v43 }
  0x31   : > { %257 = vadd.xlane.f32.xlu1 %v256_v48  ;;  %254 = vadd.xlane.f32.xlu0 %v253_v49 }
  0x35   : > { %337 = vadd.xlane.f32.xlu1 %v336_v54  ;;  %334 = vadd.xlane.f32.xlu0 %v333_v55 }
  0x39   : > { %352 = vadd.xlane.f32.xlu1 %v351_v60  ;;  %349 = vadd.xlane.f32.xlu0 %v348_v61 }
  0x3d   : > { %340 = vadd.xlane.f32.xlu0 %v339_v7  ;;  %355 = vadd.xlane.f32.xlu1 %v354_v10 }
  0x41   : > { %260 = vadd.xlane.f32.xlu0 %v259_v13  ;;  %263 = vadd.xlane.f32.xlu1 %v262_v14 }
  0xa2   : > { %v314_v18 = vpop.xlane.xlu1 %313  ;;  %v299_v19 = vpop.xlane.xlu0 %298 }
  0xa3   : > { %v362_v20 = vadd.f32 1e-26, %v314_v18  ;;  %v357_v21 = vadd.f32 1e-26, %v299_v19 }
  0xa5   : > { %1320 = vrsqrt.f32 %v362_v20 }
  0xa6   : > { %v317_v24 = vpop.xlane.xlu1 %316  ;;  %v302_v25 = vpop.xlane.xlu0 %301  ;;  %1322 = vrsqrt.f32 %v357_v21 }
  0xa7   : > { %v363_v26 = vadd.f32 1e-26, %v317_v24  ;;  %v358_v27 = vadd.f32 1e-26, %v302_v25 }
  0xa9   : > { %1324 = vrsqrt.f32 %v363_v26 }
  0xaa   : > { %1326 = vrsqrt.f32 %v358_v27  ;;  %v308_v30 = vpop.xlane.xlu1 %307  ;;  %v305_v31 = vpop.xlane.xlu0 %304 }
  0xab   : > { %v360_v32 = vadd.f32 1e-26, %v308_v30  ;;  %v359_v33 = vadd.f32 1e-26, %v305_v31 }
  0xad   : > { %1328 = vrsqrt.f32 %v360_v32 }
  0xae   : > { %1330 = vrsqrt.f32 %v359_v33  ;;  %v323_v36 = vpop.xlane.xlu1 %322  ;;  %v320_v37 = vpop.xlane.xlu0 %319 }
  0xaf   : > { %v365_v38 = vadd.f32 1e-26, %v323_v36  ;;  %v364_v39 = vadd.f32 1e-26, %v320_v37  ;;  %v1321_v42 = vpop.eup %1320 }
  0xb0   : > { %v1323_v43 = vpop.eup %1322  ;;  %v402_v50 = vmul.f32 %v1321_v42, %v1480_v0 }
  0xb1   : > { %1332 = vrsqrt.f32 %v365_v38  ;;  %v397_v55 = vmul.f32 %v1323_v43, %v1483_v1 }
  0xb2   : > { %1334 = vrsqrt.f32 %v364_v39  ;;  %v326_v44 = vpop.xlane.xlu1 %325  ;;  %v311_v45 = vpop.xlane.xlu0 %310 }
  0xb3   : > { %v1325_v48 = vpop.eup %1324  ;;  %v366_v54 = vadd.f32 1e-26, %v326_v44  ;;  %v361_v60 = vadd.f32 1e-26, %v311_v45 }
  0xb4   : > { %v1327_v49 = vpop.eup %1326  ;;  %v403_v51 = vmul.f32 %v1325_v48, %v1486_v2 }
  0xb5   : > { %v398_v56 = vmul.f32 %v1327_v49, %v1495_v6  ;;  %1336 = vrsqrt.f32 %v366_v54 }
  0xb6   : > { %v332_v61 = vpop.xlane.xlu1 %331  ;;  %v329_v62 = vpop.xlane.xlu0 %328  ;;  %v1285_v63 = vpack.c.bf16 %v403_v51, %v402_v50  ;;  %1338 = vrsqrt.f32 %v361_v60 }
  0xb7   : > { %v1329_v7 = vpop.eup %1328  ;;  %v368_v10 = vadd.f32 1e-26, %v332_v61  ;;  %v1277_v0 = vpack.c.bf16 %v398_v56, %v397_v55  ;;  %v367_v2 = vadd.f32 1e-26, %v329_v62 }
  0xb8   : > { %v1331_v11 = vpop.eup %1330  ;;  %1287 = vmatpush3.bf16.xpose.msk.msra.mxu1 %vm1641_vm2, %v1285_v63  ;;  %v400_v12 = vmul.f32 %v1329_v7, %v1500_v8 }
  0xb9   : > { %1279 = vmatpush3.bf16.xpose.msk.msra.mxu0 %vm1641_vm2, %v1277_v0  ;;  %1288 = vmatprep.subr.bf16.mxu1 %v1440_v5  ;;  %1340 = vrsqrt.f32 %v368_v10  ;;  %v399_v19 = vmul.f32 %v1331_v11, %v1503_v9 }
  0xba   : > { %v347_v1 = vpop.xlane.xlu1 %346  ;;  %v344_v6 = vpop.xlane.xlu0 %343  ;;  %1280 = vmatprep.subr.bf16.mxu0 %v1440_v5  ;;  %1342 = vrsqrt.f32 %v367_v2 }
  0xbb   : > { %v1333_v13 = vpop.eup %1332  ;;  %v373_v14 = vadd.f32 1e-26, %v347_v1  ;;  %v372_v18 = vadd.f32 1e-26, %v344_v6  ;;  %v1281_v31 = vpack.c.bf16 %v400_v12, %v399_v19 }
  0xbc   : > { %v1335_v20 = vpop.eup %1334  ;;  %v405_v21 = vmul.f32 %v1333_v13, %v1514_v16 }
  0xbd   : > { %1344 = vrsqrt.f32 %v373_v14  ;;  %v404_v24 = vmul.f32 %v1335_v20, %v1517_v17 }
  0xbe   : > { %1346 = vrsqrt.f32 %v372_v18  ;;  %v258_v25 = vpop.xlane.xlu1 %257  ;;  %v255_v26 = vpop.xlane.xlu0 %254 }
  0xbf   : > { %v266_v27 = vadd.f32 1e-26, %v258_v25  ;;  %v265_v30 = vadd.f32 1e-26, %v255_v26  ;;  %v1289_v8 = vpack.c.bf16 %v405_v21, %v404_v24  ;;  %v1337_v17 = vpop.eup %1336 }
  0xc0   : > { %v1339_v36 = vpop.eup %1338  ;;  %v406_v49 = vmul.f32 %v1337_v17, %v1526_v22 }
  0xc1   : > { %1348 = vrsqrt.f32 %v266_v27  ;;  %1283 = vmatpush3.bf16.xpose.msk.msra.mxu0 %vm1641_vm2, %v1281_v31  ;;  %1291 = vmatpush3.bf16.xpose.msk.msra.mxu1 %vm1641_vm2, %v1289_v8  ;;  %v401_v48 = vmul.f32 %v1339_v36, %v1529_v23 }
  0xc2   : > { %1350 = vrsqrt.f32 %v265_v30  ;;  %v338_v9 = vpop.xlane.xlu1 %337  ;;  %v335_v16 = vpop.xlane.xlu0 %334  ;;  %1232 = vmatprep.subr.mxu0 %v1442_v15  ;;  %1245 = vmatprep.subr.mxu1 %v1442_v15 }
  0xc3   : > { %v370_v32 = vadd.f32 1e-26, %v338_v9  ;;  %v369_v33 = vadd.f32 1e-26, %v335_v16  ;;  %v1341_v37 = vpop.eup %1340 }
  0xc4   : > { %v1343_v38 = vpop.eup %1342  ;;  %v408_v55 = vmul.f32 %v1341_v37, %v1538_v28 }
  0xc5   : > { %1352 = vrsqrt.f32 %v370_v32  ;;  %v407_v56 = vmul.f32 %v1343_v38, %v1541_v29 }
  0xc6   : > { %1354 = vrsqrt.f32 %v369_v33  ;;  %v353_v39 = vpop.xlane.xlu1 %352  ;;  %v350_v42 = vpop.xlane.xlu0 %349 }
  0xc7   : > { %v1345_v43 = vpop.eup %1344  ;;  %v375_v44 = vadd.f32 1e-26, %v353_v39  ;;  %v374_v45 = vadd.f32 1e-26, %v350_v42  ;;  %v1293_v28 = vpack.c.bf16 %v408_v55, %v407_v56 }
  0xc8   : > { %v1347_v50 = vpop.eup %1346  ;;  %v413_v51 = vmul.f32 %v1345_v43, %v1551_v34 }
  0xc9   : > { %v412_v54 = vmul.f32 %v1347_v50, %v1554_v35  ;;  %1356 = vrsqrt.f32 %v375_v44  ;;  %1233 = vmatpush3.xpose.msk.msra.mxu0 %vm252_vm0, %v401_v48  ;;  %1246 = vmatpush3.xpose.msk.msra.mxu1 %vm252_vm0, %v406_v49 }
  0xca   : > { %1358 = vrsqrt.f32 %v374_v45  ;;  %1292 = vmatprep.subr.bf16.mxu0 %v1440_v5  ;;  %1300 = vmatprep.subr.bf16.mxu1 %v1440_v5  ;;  %v341_v22 = vpop.xlane.xlu0 %340  ;;  %v356_v23 = vpop.xlane.xlu1 %355 }
  0xcb   : > { %v1349_v60 = vpop.eup %1348  ;;  %v371_v34 = vadd.f32 1e-26, %v341_v22  ;;  %v376_v62 = vadd.f32 1e-26, %v356_v23  ;;  %v1301_v7 = vpack.c.bf16 %v413_v51, %v412_v54 }
  0xcc   : > { %v1351_v61 = vpop.eup %1350  ;;  %v274_v35 = vmul.f32 %v1349_v60, %v1568_v40 }
  0xcd   : > { %v273_v63 = vmul.f32 %v1351_v61, %v1571_v41  ;;  %1360 = vrsqrt.f32 %v371_v34 }
  0xce   : > { %1248 = vmatmul.mubr.msk.f32.vlgmr.msra.gmra.mrb[0].mxu1 %vm252_vm0, %v274_v35  ;;  %v261_v29 = vpop.xlane.xlu0 %260  ;;  %v264_v10 = vpop.xlane.xlu1 %263  ;;  %1362 = vrsqrt.f32 %v376_v62 }
  0xcf   : > { %v1353_v0 = vpop.eup %1352  ;;  %1235 = vmatmul.mubr.msk.f32.vlgmr.msra.gmra.mrb[0].mxu0 %vm252_vm0, %v273_v63  ;;  %1303 = vmatpush3.bf16.xpose.msk.msra.mxu1 %vm1641_vm2, %v1301_v7  ;;  %v267_v11 = vadd.f32 1e-26, %v261_v29  ;;  %v268_v2 = vadd.f32 1e-26, %v264_v10 }
  0xd0   : > { %v1355_v1 = vpop.eup %1354  ;;  %1295 = vmatpush3.bf16.xpose.msk.msra.mxu0 %vm1641_vm2, %v1293_v28  ;;  %1304 = vmatprep.subr.bf16.mxu1 %v1440_v5  ;;  %v410_v40 = vmul.f32 %v1353_v0, %v1580_v46 }
  0xd1   : > { %1296 = vmatprep.subr.bf16.mxu0 %v1440_v5  ;;  %1260 = vmatprep.mubr.msk.f32.mxu0 %vm1441_vm1, %v1442_v15  ;;  %v409_v41 = vmul.f32 %v1355_v1, %v1583_v47  ;;  %1364 = vrsqrt.f32 %v267_v11 }
  0xd2   : > { %1273 = vmatprep.mubr.msk.f32.mxu1 %vm1441_vm1, %v1442_v15  ;;  %1366 = vrsqrt.f32 %v268_v2 }
  0xd3   : > { %v1357_v6 = vpop.eup %1356  ;;  %v1297_v18 = vpack.c.bf16 %v410_v40, %v409_v41 }
  0xd4   : > { %v1359_v12 = vpop.eup %1358  ;;  %v415_v13 = vmul.f32 %v1357_v6, %v1592_v52 }
  0xd5   : > { %v414_v14 = vmul.f32 %v1359_v12, %v1595_v53 }
  0xd7   : > { %v1305_v5 = vpack.c.bf16 %v415_v13, %v414_v14  ;;  %v1361_v19 = vpop.eup %1360 }
  0xd8   : > { %1299 = vmatpush3.bf16.xpose.msk.msra.mxu0 %vm1641_vm2, %v1297_v18  ;;  %v1363_v46 = vpop.eup %1362  ;;  %v411_v20 = vmul.f32 %v1361_v19, %v1604_v58  ;;  %v1141_v19 = vld [vmem:[%s1716_s25] ss:$0 sm:$0xff] }
  0xd9   : > { %1307 = vmatpush3.bf16.xpose.msk.msra.mxu1 %vm1641_vm2, %v1305_v5  ;;  %1258 = vmatprep.subr.mxu0 %v1442_v15  ;;  %v416_v53 = vmul.f32 %v1363_v46, %v1607_v59 }
  0xda   : > { %1271 = vmatprep.subr.mxu1 %v1442_v15 }
  0xdb   : > { %v1365_v47 = vpop.eup %1364 }
  0xdc   : > { %v1367_v52 = vpop.eup %1366  ;;  %v275_v21 = vmul.f32 %v1365_v47, %v1616_v3 }
  0xdd   : > { %v276_v24 = vmul.f32 %v1367_v52, %v1619_v4 }
  0xe0   : > { %1259 = vmatpush3.xpose.msk.msra.mxu0 %vm252_vm0, %v411_v20 }
  0xe1   : > { %1272 = vmatpush3.xpose.msk.msra.mxu1 %vm252_vm0, %v416_v53 }
  0xe3   : > { %1261 = vmatmul.mubr.msk.f32.vlgmr.msra.gmra.mrb[2].mxu0 %vm252_vm0, %v275_v21 }
  0xe4   : > { %1274 = vmatmul.mubr.msk.f32.vlgmr.msra.gmra.mrb[2].mxu1 %vm252_vm0, %v276_v24 }
 0x1a1   : > { %v1703_v57 = vpop.f32.mrb[0].mxu1 }
 0x1a2   : > { %v501_v15 = vpop.f32.mrb[0].mxu0  ;;  %v1138_v58 = vadd.f32 0.75, %v1703_v57  ;;  %v1146_v25 = vadd.f32 0.5, %v1703_v57  ;;  %v1154_v59 = vadd.f32 0.25, %v1703_v57  ;;  %v881_v3 = vmul.f32 %v1703_v57, %v1703_v57  ;;  %v1249_v4 = vpop.f32.mrb[1].mxu1 }
 0x1a3   : > { %v1137_v26 = vadd.f32 0.75, %v501_v15  ;;  %v1145_v27 = vadd.f32 0.5, %v501_v15  ;;  %v1153_v30 = vadd.f32 0.25, %v501_v15  ;;  %v880_v31 = vmul.f32 %v501_v15, %v501_v15  ;;  %v1236_v8 = vpop.f32.mrb[1].mxu0 }
 0x1a4   : > { %v1165_v9 = vadd.f32 -0.25, %v501_v15  ;;  %v1173_v16 = vadd.f32 -0.5, %v501_v15  ;;  %v1181_v17 = vadd.f32 -0.75, %v501_v15  ;;  %v1189_v32 = vadd.f32 -1.0, %v501_v15 }
 0x1a5   : > { %v773_v33 = vmul.f32 %v1137_v26, %v1137_v26  ;;  %v826_v36 = vmul.f32 %v1145_v27, %v1145_v27  ;;  %v855_v37 = vmul.f32 %v1153_v30, %v1153_v30  ;;  %v884_v38 = vmul.f32 -50.0, %v880_v31 }
 0x1a6   : > { %v909_v39 = vmul.f32 %v1165_v9, %v1165_v9  ;;  %v938_v42 = vmul.f32 %v1173_v16, %v1173_v16  ;;  %v967_v43 = vmul.f32 %v1181_v17, %v1181_v17  ;;  %v996_v44 = vmul.f32 %v1189_v32, %v1189_v32 }
 0x1a7   : > { %v777_v45 = vmul.f32 -50.0, %v773_v33  ;;  %v830_v48 = vmul.f32 -50.0, %v826_v36  ;;  %v859_v49 = vmul.f32 -50.0, %v855_v37  ;;  %v888_v50 = vmul.f32 1.442695, %v884_v38 }
 0x1a8   : > { %v913_v51 = vmul.f32 -50.0, %v909_v39  ;;  %v942_v54 = vmul.f32 -50.0, %v938_v42  ;;  %v971_v55 = vmul.f32 -50.0, %v967_v43  ;;  %v1000_v56 = vmul.f32 -50.0, %v996_v44 }
 0x1a9   : > { %v781_v22 = vmul.f32 1.442695, %v777_v45  ;;  %v834_v23 = vmul.f32 1.442695, %v830_v48  ;;  %v863_v60 = vmul.f32 1.442695, %v859_v49  ;;  %1368 = vpow2.f32 %v888_v50 }
 0x1aa   : > { %v917_v34 = vmul.f32 1.442695, %v913_v51  ;;  %v946_v61 = vmul.f32 1.442695, %v942_v54  ;;  %v975_v35 = vmul.f32 1.442695, %v971_v55  ;;  %v774_v62 = vmul.f32 %v1138_v58, %v1138_v58 }
 0x1ab   : > { %1370 = vpow2.f32 %v781_v22  ;;  %v1004_v63 = vmul.f32 1.442695, %v1000_v56  ;;  %v827_v7 = vmul.f32 %v1146_v25, %v1146_v25  ;;  %v856_v28 = vmul.f32 %v1154_v59, %v1154_v59 }
 0x1ac   : > { %1372 = vpow2.f32 %v834_v23  ;;  %v778_v29 = vmul.f32 -50.0, %v774_v62  ;;  %v885_v10 = vmul.f32 -50.0, %v881_v3  ;;  %v1166_v0 = vadd.f32 -0.25, %v1703_v57 }
 0x1ad   : > { %1374 = vpow2.f32 %v863_v60  ;;  %v831_v11 = vmul.f32 -50.0, %v827_v7  ;;  %v860_v2 = vmul.f32 -50.0, %v856_v28  ;;  %v1174_v1 = vadd.f32 -0.5, %v1703_v57 }
 0x1ae   : > { %1376 = vpow2.f32 %v917_v34  ;;  %v783_v40 = vmul.f32 1.442695, %v778_v29  ;;  %v910_v41 = vmul.f32 %v1166_v0, %v1166_v0  ;;  %v1182_v18 = vadd.f32 -0.75, %v1703_v57 }
 0x1af   : > { %1378 = vpow2.f32 %v946_v61  ;;  %v836_v6 = vmul.f32 1.442695, %v831_v11  ;;  %v865_v12 = vmul.f32 1.442695, %v860_v2  ;;  %v939_v13 = vmul.f32 %v1174_v1, %v1174_v1  ;;  %v1142_v61 = vld [vmem:[%s1716_s25 + $0x1] ss:$0 sm:$0xff] }
 0x1b0   : > { %1380 = vpow2.f32 %v975_v35  ;;  %v914_v14 = vmul.f32 -50.0, %v910_v41  ;;  %v1190_v5 = vadd.f32 -1.0, %v1703_v57  ;;  %v890_v46 = vmul.f32 1.442695, %v885_v10 }
 0x1b1   : > { %1382 = vpow2.f32 %v1004_v63  ;;  %v943_v47 = vmul.f32 -50.0, %v939_v13  ;;  %v968_v52 = vmul.f32 %v1182_v18, %v1182_v18 }
 0x1b2   : > { %1384 = vpow2.f32 %v783_v40  ;;  %v919_v20 = vmul.f32 1.442695, %v914_v14  ;;  %v997_v53 = vmul.f32 %v1190_v5, %v1190_v5 }
 0x1b3   : > { %v1369_v21 = vpop.eup %1368  ;;  %1386 = vpow2.f32 %v836_v6  ;;  %v948_v24 = vmul.f32 1.442695, %v943_v47  ;;  %v972_v57 = vmul.f32 -50.0, %v968_v52 }
 0x1b4   : > { %v896_v15 = vmul.f32 %v1369_v21, %v1141_v19  ;;  %1388 = vpow2.f32 %v865_v12  ;;  %v1001_v58 = vmul.f32 -50.0, %v997_v53 }
 0x1b5   : > { %v1371_v25 = vpop.eup %1370  ;;  %1390 = vpow2.f32 %v890_v46  ;;  %v977_v4 = vmul.f32 1.442695, %v972_v57 }
 0x1b6   : > { %v1373_v59 = vpop.eup %1372  ;;  %v813_v3 = vmul.f32 %v1371_v25, %v1141_v19  ;;  %1161 = vst.msk [vmem:[%s1725_s29 + $0x18] sm:$0xff] %vm817_vm3, %v896_v15  ;;  %1392 = vpow2.f32 %v919_v20  ;;  %v1006_v26 = vmul.f32 1.442695, %v1001_v58  ;;  %v677_v27 = vpop.f32.mrb[2].mxu0 }
 0x1b7   : > { %v1375_v30 = vpop.eup %1374  ;;  %v842_v31 = vmul.f32 %v1373_v59, %v1141_v19  ;;  %1394 = vpow2.f32 %v948_v24  ;;  %v1139_v8 = vadd.f32 0.75, %v677_v27  ;;  %v1147_v9 = vadd.f32 0.5, %v677_v27  ;;  %v1262_v16 = vpop.f32.mrb[3].mxu0 }
 0x1b8   : > { %v1729_v17 = vpop.f32.mrb[2].mxu1  ;;  %v1377_v32 = vpop.eup %1376  ;;  %818 = vst.msk [vmem:[%s1725_s29] sm:$0xff] %vm817_vm3, %v813_v3  ;;  %v871_v33 = vmul.f32 %v1375_v30, %v1141_v19  ;;  %1396 = vpow2.f32 %v977_v4  ;;  %v1155_v36 = vadd.f32 0.25, %v677_v27  ;;  %v882_v37 = vmul.f32 %v677_v27, %v677_v27  ;;  %v1143_v16 = vld [vmem:[%s1716_s25 + $0x2] ss:$0 sm:$0xff] }
 0x1b9   : > { %v1275_v38 = vpop.f32.mrb[3].mxu1  ;;  %v1379_v39 = vpop.eup %1378  ;;  %1149 = vst.msk [vmem:[%s1725_s29 + $0x8] sm:$0xff] %vm817_vm3, %v842_v31  ;;  %v925_v42 = vmul.f32 %v1377_v32, %v1141_v19  ;;  %1398 = vpow2.f32 %v1006_v26  ;;  %v775_v43 = vmul.f32 %v1139_v8, %v1139_v8  ;;  %v828_v44 = vmul.f32 %v1147_v9, %v1147_v9 }
 0x1ba   : > { %v1381_v45 = vpop.eup %1380  ;;  %1157 = vst.msk [vmem:[%s1725_s29 + $0x10] sm:$0xff] %vm817_vm3, %v871_v33  ;;  %v954_v48 = vmul.f32 %v1379_v39, %v1141_v19  ;;  %v857_v49 = vmul.f32 %v1155_v36, %v1155_v36  ;;  %v886_v50 = vmul.f32 -50.0, %v882_v37  ;;  %v1167_v51 = vadd.f32 -0.25, %v677_v27 }
 0x1bb   : > { %v1383_v54 = vpop.eup %1382  ;;  %1169 = vst.msk [vmem:[%s1725_s29 + $0x20] sm:$0xff] %vm817_vm3, %v925_v42  ;;  %v983_v55 = vmul.f32 %v1381_v45, %v1141_v19  ;;  %v779_v56 = vmul.f32 -50.0, %v775_v43  ;;  %v832_v22 = vmul.f32 -50.0, %v828_v44  ;;  %v1175_v23 = vadd.f32 -0.5, %v677_v27 }
 0x1bc   : > { %v1385_v60 = vpop.eup %1384  ;;  %1177 = vst.msk [vmem:[%s1725_s29 + $0x28] sm:$0xff] %vm817_vm3, %v954_v48  ;;  %v1012_v34 = vmul.f32 %v1383_v54, %v1141_v19  ;;  %v861_v35 = vmul.f32 -50.0, %v857_v49  ;;  %v892_v62 = vmul.f32 1.442695, %v886_v50  ;;  %v911_v63 = vmul.f32 %v1167_v51, %v1167_v51 }
 0x1bd   : > { %v1387_v7 = vpop.eup %1386  ;;  %1185 = vst.msk [vmem:[%s1725_s29 + $0x30] sm:$0xff] %vm817_vm3, %v983_v55  ;;  %v814_v28 = vmul.f32 %v1385_v60, %v1142_v61  ;;  %v785_v29 = vmul.f32 1.442695, %v779_v56  ;;  %v838_v10 = vmul.f32 1.442695, %v832_v22  ;;  %v940_v0 = vmul.f32 %v1175_v23, %v1175_v23 }
 0x1be   : > { %v1389_v11 = vpop.eup %1388  ;;  %1193 = vst.msk [vmem:[%s1725_s29 + $0x38] sm:$0xff] %vm817_vm3, %v1012_v34  ;;  %v843_v2 = vmul.f32 %v1387_v7, %v1142_v61  ;;  %v867_v1 = vmul.f32 1.442695, %v861_v35  ;;  %1400 = vpow2.f32 %v892_v62  ;;  %v915_v40 = vmul.f32 -50.0, %v911_v63 }
 0x1bf   : > { %v1391_v41 = vpop.eup %1390  ;;  %819 = vst.msk [vmem:[%s1725_s29 + $0x40] sm:$0xff] %vm817_vm3, %v814_v28  ;;  %v872_v6 = vmul.f32 %v1389_v11, %v1142_v61  ;;  %1402 = vpow2.f32 %v785_v29  ;;  %v944_v12 = vmul.f32 -50.0, %v940_v0  ;;  %v1183_v13 = vadd.f32 -0.75, %v677_v27 }
 0x1c0   : > { %v1393_v14 = vpop.eup %1392  ;;  %1150 = vst.msk [vmem:[%s1725_s29 + $0x48] sm:$0xff] %vm817_vm3, %v843_v2  ;;  %v897_v18 = vmul.f32 %v1391_v41, %v1142_v61  ;;  %1404 = vpow2.f32 %v838_v10  ;;  %v921_v5 = vmul.f32 1.442695, %v915_v40  ;;  %v1191_v19 = vadd.f32 -1.0, %v677_v27 }
 0x1c1   : > { %v1395_v46 = vpop.eup %1394  ;;  %1158 = vst.msk [vmem:[%s1725_s29 + $0x50] sm:$0xff] %vm817_vm3, %v872_v6  ;;  %v926_v47 = vmul.f32 %v1393_v14, %v1142_v61  ;;  %1406 = vpow2.f32 %v867_v1  ;;  %v950_v20 = vmul.f32 1.442695, %v944_v12  ;;  %v969_v52 = vmul.f32 %v1183_v13, %v1183_v13 }
 0x1c2   : > { %v1397_v53 = vpop.eup %1396  ;;  %1162 = vst.msk [vmem:[%s1725_s29 + $0x58] sm:$0xff] %vm817_vm3, %v897_v18  ;;  %v955_v21 = vmul.f32 %v1395_v46, %v1142_v61  ;;  %1408 = vpow2.f32 %v921_v5  ;;  %v998_v24 = vmul.f32 %v1191_v19, %v1191_v19  ;;  %v1140_v15 = vadd.f32 0.75, %v1729_v17  ;;  %v1144_v19 = vld [vmem:[%s1716_s25 + $0x3] ss:$0 sm:$0xff] }
 0x1c3   : > { %v1399_v57 = vpop.eup %1398  ;;  %1170 = vst.msk [vmem:[%s1725_s29 + $0x60] sm:$0xff] %vm817_vm3, %v926_v47  ;;  %v984_v58 = vmul.f32 %v1397_v53, %v1142_v61  ;;  %1410 = vpow2.f32 %v950_v20  ;;  %v973_v25 = vmul.f32 -50.0, %v969_v52  ;;  %v1148_v59 = vadd.f32 0.5, %v1729_v17 }
 0x1c4   : > { %1178 = vst.msk [vmem:[%s1725_s29 + $0x68] sm:$0xff] %vm817_vm3, %v955_v21  ;;  %v1013_v3 = vmul.f32 %v1399_v57, %v1142_v61  ;;  %v1002_v4 = vmul.f32 -50.0, %v998_v24  ;;  %v776_v26 = vmul.f32 %v1140_v15, %v1140_v15  ;;  %v1156_v27 = vadd.f32 0.25, %v1729_v17 }
 0x1c5   : > { %1186 = vst.msk [vmem:[%s1725_s29 + $0x70] sm:$0xff] %vm817_vm3, %v984_v58  ;;  %v979_v30 = vmul.f32 1.442695, %v973_v25  ;;  %v829_v31 = vmul.f32 %v1148_v59, %v1148_v59  ;;  %v883_v8 = vmul.f32 %v1729_v17, %v1729_v17  ;;  %v1168_v9 = vadd.f32 -0.25, %v1729_v17 }
 0x1c6   : > { %1194 = vst.msk [vmem:[%s1725_s29 + $0x78] sm:$0xff] %vm817_vm3, %v1013_v3  ;;  %v1008_v32 = vmul.f32 1.442695, %v1002_v4  ;;  %v780_v33 = vmul.f32 -50.0, %v776_v26  ;;  %v858_v36 = vmul.f32 %v1156_v27, %v1156_v27  ;;  %v1176_v37 = vadd.f32 -0.5, %v1729_v17 }
 0x1c7   : > { %1412 = vpow2.f32 %v979_v30  ;;  %v833_v38 = vmul.f32 -50.0, %v829_v31  ;;  %v887_v39 = vmul.f32 -50.0, %v883_v8  ;;  %v912_v42 = vmul.f32 %v1168_v9, %v1168_v9 }
 0x1c8   : > { %v1401_v43 = vpop.eup %1400  ;;  %1414 = vpow2.f32 %v1008_v32  ;;  %v787_v44 = vmul.f32 1.442695, %v780_v33  ;;  %v862_v45 = vmul.f32 -50.0, %v858_v36  ;;  %v941_v48 = vmul.f32 %v1176_v37, %v1176_v37 }
 0x1c9   : > { %v1403_v49 = vpop.eup %1402  ;;  %v898_v50 = vmul.f32 %v1401_v43, %v1143_v16  ;;  %v840_v51 = vmul.f32 1.442695, %v833_v38  ;;  %v894_v54 = vmul.f32 1.442695, %v887_v39  ;;  %v916_v55 = vmul.f32 -50.0, %v912_v42 }
 0x1ca   : > { %v1405_v56 = vpop.eup %1404  ;;  %v815_v22 = vmul.f32 %v1403_v49, %v1143_v16  ;;  %1416 = vpow2.f32 %v787_v44  ;;  %v869_v23 = vmul.f32 1.442695, %v862_v45  ;;  %v945_v60 = vmul.f32 -50.0, %v941_v48 }
 0x1cb   : > { %v1407_v34 = vpop.eup %1406  ;;  %v844_v61 = vmul.f32 %v1405_v56, %v1143_v16  ;;  %1163 = vst.msk [vmem:[%s1725_s29 + $0x98] sm:$0xff] %vm817_vm3, %v898_v50  ;;  %1418 = vpow2.f32 %v840_v51  ;;  %v923_v35 = vmul.f32 1.442695, %v916_v55  ;;  %v1184_v62 = vadd.f32 -0.75, %v1729_v17 }
 0x1cc   : > { %v1409_v63 = vpop.eup %1408  ;;  %820 = vst.msk [vmem:[%s1725_s29 + $0x80] sm:$0xff] %vm817_vm3, %v815_v22  ;;  %v873_v7 = vmul.f32 %v1407_v34, %v1143_v16  ;;  %1420 = vpow2.f32 %v869_v23  ;;  %v952_v28 = vmul.f32 1.442695, %v945_v60  ;;  %v1192_v29 = vadd.f32 -1.0, %v1729_v17 }
 0x1cd   : > { %v1411_v10 = vpop.eup %1410  ;;  %1151 = vst.msk [vmem:[%s1725_s29 + $0x88] sm:$0xff] %vm817_vm3, %v844_v61  ;;  %v927_v0 = vmul.f32 %v1409_v63, %v1143_v16  ;;  %1422 = vpow2.f32 %v894_v54  ;;  %v970_v11 = vmul.f32 %v1184_v62, %v1184_v62 }
 0x1ce   : > { %1159 = vst.msk [vmem:[%s1725_s29 + $0x90] sm:$0xff] %vm817_vm3, %v873_v7  ;;  %v956_v2 = vmul.f32 %v1411_v10, %v1143_v16  ;;  %1424 = vpow2.f32 %v923_v35  ;;  %v999_v1 = vmul.f32 %v1192_v29, %v1192_v29 }
 0x1cf   : > { %1171 = vst.msk [vmem:[%s1725_s29 + $0xa0] sm:$0xff] %vm817_vm3, %v927_v0  ;;  %1426 = vpow2.f32 %v952_v28  ;;  %v974_v40 = vmul.f32 -50.0, %v970_v11 }
 0x1d0   : > { %1179 = vst.msk [vmem:[%s1725_s29 + $0xa8] sm:$0xff] %vm817_vm3, %v956_v2  ;;  %v1003_v17 = vmul.f32 -50.0, %v999_v1 }
 0x1d1   : > { %v1413_v41 = vpop.eup %1412  ;;  %v981_v6 = vmul.f32 1.442695, %v974_v40 }
 0x1d2   : > { %v1415_v12 = vpop.eup %1414  ;;  %v985_v13 = vmul.f32 %v1413_v41, %v1143_v16  ;;  %v1010_v14 = vmul.f32 1.442695, %v1003_v17 }
 0x1d3   : > { %v1014_v18 = vmul.f32 %v1415_v12, %v1143_v16  ;;  %1428 = vpow2.f32 %v981_v6 }
 0x1d4   : > { %v1417_v5 = vpop.eup %1416  ;;  %1187 = vst.msk [vmem:[%s1725_s29 + $0xb0] sm:$0xff] %vm817_vm3, %v985_v13  ;;  %1430 = vpow2.f32 %v1010_v14 }
 0x1d5   : > { %v1419_v46 = vpop.eup %1418  ;;  %1195 = vst.msk [vmem:[%s1725_s29 + $0xb8] sm:$0xff] %vm817_vm3, %v1014_v18  ;;  %v816_v47 = vmul.f32 %v1417_v5, %v1144_v19 }
 0x1d6   : > { %v1421_v20 = vpop.eup %1420  ;;  %v845_v52 = vmul.f32 %v1419_v46, %v1144_v19 }
 0x1d7   : > { %v1423_v53 = vpop.eup %1422  ;;  %821 = vst.msk [vmem:[%s1725_s29 + $0xc0] sm:$0xff] %vm817_vm3, %v816_v47  ;;  %v874_v21 = vmul.f32 %v1421_v20, %v1144_v19 }
 0x1d8   : > { %v1425_v24 = vpop.eup %1424  ;;  %1152 = vst.msk [vmem:[%s1725_s29 + $0xc8] sm:$0xff] %vm817_vm3, %v845_v52  ;;  %v899_v15 = vmul.f32 %v1423_v53, %v1144_v19 }
 0x1d9   : > { %v1427_v57 = vpop.eup %1426  ;;  %1160 = vst.msk [vmem:[%s1725_s29 + $0xd0] sm:$0xff] %vm817_vm3, %v874_v21  ;;  %v928_v58 = vmul.f32 %v1425_v24, %v1144_v19 }
 0x1da   : > { %1164 = vst.msk [vmem:[%s1725_s29 + $0xd8] sm:$0xff] %vm817_vm3, %v899_v15  ;;  %v957_v25 = vmul.f32 %v1427_v57, %v1144_v19 }
 0x1db   : > { %1172 = vst.msk [vmem:[%s1725_s29 + $0xe0] sm:$0xff] %vm817_vm3, %v928_v58 }
 0x1dc   : > { %1180 = vst.msk [vmem:[%s1725_s29 + $0xe8] sm:$0xff] %vm817_vm3, %v957_v25 }
 0x1dd   : > { %v1429_v59 = vpop.eup %1428 }
 0x1de   : > { %v1431_v3 = vpop.eup %1430  ;;  %v986_v4 = vmul.f32 %v1429_v59, %v1144_v19 }
 0x1df   : > { %v1015_v26 = vmul.f32 %v1431_v3, %v1144_v19 }
 0x1e0   : > { %1188 = vst.msk [vmem:[%s1725_s29 + $0xf0] sm:$0xff] %vm817_vm3, %v986_v4 }
 0x1e1   : > { %1196 = vst.msk [vmem:[%s1725_s29 + $0xf8] sm:$0xff] %vm817_vm3, %v1015_v26 }
 0x1e2 PF: > { %s13_s12 = sadd.s32 1, %s1438_s12  }
 0x1e3   : > { %p10_p4 = scmp.ge.s32.totalorder %s13_s12, 4  }
 0x1e5   :  { %12 = sbr.rel (!%p10_p4) target bundleno = 1 (0x1), region = 75 }

</bundles_post_ra>
